<compile_context>
chip_gen: v6e
topology: v6e:2x2x1
jax: 0.10.0
libtpu: 0.0.40
codegen_flags: <defaults>
</compile_context>

<pallas_src>
import functools

import numpy as np
import jax
import jax.numpy as jnp
from jax.experimental import pallas as pl
from jax.experimental.pallas import tpu as pltpu


# --------------------------------------------------------------------------
# Fused CBAM kernel.  One grid step == a block of B samples:
#   x_ref / out_ref : (B, C, HW)   pixels on the lane axis
#   fcg_ref         : (B, C, HW)   f32 VMEM scratch with channel-gated features
# --------------------------------------------------------------------------
def cbam_kernel(x_ref, mw1t_ref, mb1_ref, mw2t_ref, mb2_ref, mask_ref,
                ws_ref, bns_ref, out_ref, fcg_ref, *, W):
    B, C, HW = x_ref.shape

    xb = x_ref[...].astype(jnp.float32)                   # (B, C, HW)

    # ---------------- ChannelGate ----------------
    avg_p = jnp.mean(xb, axis=2)                          # == F.avg_pool2d(full)  (B, C)
    max_p = jnp.max(xb, axis=2)                           # == F.max_pool2d(full)  (B, C)
    pooled = jnp.concatenate([avg_p, max_p], axis=0)      # (2B, C)

    # Shared MLP (C -> C/r -> C) as two tiny MXU matmuls over the batch block.
    h = jnp.dot(pooled, mw1t_ref[...],
                preferred_element_type=jnp.float32,
                precision=jax.lax.Precision.HIGHEST) + mb1_ref[...]
    h = jnp.maximum(h, 0.0)                               # (2B, Cr)
    att = jnp.dot(h, mw2t_ref[...],
                  preferred_element_type=jnp.float32,
                  precision=jax.lax.Precision.HIGHEST) + mb2_ref[...]   # (2B, C)

    cscale = jax.nn.sigmoid(att[:B] + att[B:])            # avg-branch + max-branch (B, C)

    # Channel-gated features go to VMEM scratch (keeps xb/fcg out of vregs).
    fcg_ref[...] = xb * cscale[:, :, None]                # (B, C, HW) f32

    # -------- ChannelPool: max / mean over channels, sublane-packed --------
    fcg = fcg_ref[...]
    cmax = jnp.max(fcg, axis=1)                           # (B, HW)
    cmean = jnp.mean(fcg, axis=1)                         # (B, HW)

    # -------- SpatialGate: 7x7 conv, padding 3, over [max; mean] --------
    # One roll per tap per stack; 4 partial accumulators avoid a 49-long
    # serial dependence chain of f32 adds.
    parts = [jnp.zeros((B, HW), jnp.float32) for _ in range(4)]
    for ky in range(7):
        for kx in range(7):
            k = ky * 7 + kx
            off = (ky - 3) * W + (kx - 3)                 # flat pixel offset of this tap
            sh = (-off) % HW
            if sh == 0:
                rmax, rmean = cmax, cmean
            else:
                rmax = pltpu.roll(cmax, shift=sh, axis=1)
                rmean = pltpu.roll(cmean, shift=sh, axis=1)
            valid = mask_ref[k:k + 1, :]                  # (1, HW) zero-pad validity mask
            parts[k % 4] = parts[k % 4] + (
                ws_ref[k] * rmax + ws_ref[49 + k] * rmean) * valid
    s = (parts[0] + parts[1]) + (parts[2] + parts[3])      # (B, HW)

    s = s * bns_ref[0] + bns_ref[1]                        # folded BatchNorm2d(1), eval mode
    gate = jax.nn.sigmoid(s)[:, None, :]                   # (B, 1, HW)

    out_ref[...] = (fcg_ref[...] * gate).astype(out_ref.dtype)


# --------------------------------------------------------------------------
# One-time parameter / constant preparation (hoisted out of the forward).
# --------------------------------------------------------------------------
@functools.lru_cache(maxsize=None)
def _spatial_valid_mask_np(H, W):
    """(49, H*W) 0/1 masks: tap (ky,kx) reads a valid (non zero-pad) pixel."""
    yy, xx = np.meshgrid(np.arange(H), np.arange(W), indexing="ij")
    yy = yy.reshape(-1)
    xx = xx.reshape(-1)
    m = np.zeros((49, H * W), np.float32)
    for ky in range(7):
        for kx in range(7):
            dy, dx = ky - 3, kx - 3
            ok = ((yy + dy >= 0) & (yy + dy < H) &
                  (xx + dx >= 0) & (xx + dx < W))
            m[ky * 7 + kx] = ok.astype(np.float32)
    return m


def prepare_cbam_params(raw, H, W, eps=1e-5):
    """Fold/flatten the torch-layout parameters once (outside the jitted fwd)."""
    scale = raw["bn_gamma"] / jnp.sqrt(raw["bn_var"] + eps)
    bias = raw["bn_beta"] - raw["bn_mean"] * scale
    return {
        "mw1t": jnp.asarray(raw["w1"], jnp.float32).T,               # (C, Cr)  Linear1.weight^T
        "mb1": jnp.asarray(raw["b1"], jnp.float32).reshape(1, -1),   # (1, Cr)
        "mw2t": jnp.asarray(raw["w2"], jnp.float32).T,               # (Cr, C)  Linear2.weight^T
        "mb2": jnp.asarray(raw["b2"], jnp.float32).reshape(1, -1),   # (1, C)
        # OIHW (1,2,7,7) -> flat [c*49 + ky*7 + kx]; c=0 is the max map, c=1 mean map
        "ws": jnp.asarray(raw["conv_w"], jnp.float32)[0].reshape(-1),  # (98,)
        "bns": jnp.stack([scale, bias]).astype(jnp.float32),           # (2,)  folded BN
        "mask": jnp.asarray(_spatial_valid_mask_np(H, W)),             # (49, HW)
    }


def _choose_sample_block(N, C, HW, in_itemsize, out_itemsize, budget=16 << 20):
    """Largest B whose in/out (double-buffered) + f32 scratch fits the budget,
    while keeping >= 2 grid steps so both v7x TensorCores get work."""
    per_sample = C * HW * (2 * (in_itemsize + out_itemsize) + 4)
    b = max(1, int(budget // per_sample))
    if N >= 2:
        b = min(b, max(1, N // 2))
    b = min(b, N)
    while N % b:
        b -= 1
    return int(b)


# --------------------------------------------------------------------------
# Forward wrapper.
# --------------------------------------------------------------------------
def cbam_forward(x_nchw, prep):
    N, C, H, W = x_nchw.shape
    HW = H * W
    Cr = prep["mw1t"].shape[1]
    itemsize = x_nchw.dtype.itemsize

    B = _choose_sample_block(N, C, HW, itemsize, itemsize)
    grid = (N // B,)

    xf = x_nchw.reshape(N, C, HW)                 # pixels onto the lane axis

    cost = pl.CostEstimate(
        flops=int(N * (5 * C * HW + 6 * 49 * HW + 4 * C * Cr)),
        transcendentals=int(N * (C + HW)),
        bytes_accessed=int(N * C * HW * 2 * itemsize + 49 * HW * 4),
    )

    out = pl.pallas_call(
        functools.partial(cbam_kernel, W=W),
        out_shape=jax.ShapeDtypeStruct((N, C, HW), x_nchw.dtype),
        grid=grid,
        in_specs=[
            pl.BlockSpec((B, C, HW), lambda n: (n, 0, 0)),         # x block
            pl.BlockSpec((C, Cr), lambda n: (0, 0)),               # Linear1 weight^T
            pl.BlockSpec((1, Cr), lambda n: (0, 0)),               # Linear1 bias
            pl.BlockSpec((Cr, C), lambda n: (0, 0)),               # Linear2 weight^T
            pl.BlockSpec((1, C), lambda n: (0, 0)),                # Linear2 bias
            pl.BlockSpec((49, HW), lambda n: (0, 0)),              # conv validity mask
            pl.BlockSpec(memory_space=pltpu.MemorySpace.SMEM),     # 7x7 weights (98,)
            pl.BlockSpec(memory_space=pltpu.MemorySpace.SMEM),     # folded BN (2,)
        ],
        out_specs=pl.BlockSpec((B, C, HW), lambda n: (n, 0, 0)),
        scratch_shapes=[pltpu.VMEM((B, C, HW), jnp.float32)],      # channel-gated features
        compiler_params=pltpu.CompilerParams(
            dimension_semantics=("parallel",),
            vmem_limit_bytes=32 << 20),
        cost_estimate=cost,
    )(xf, prep["mw1t"], prep["mb1"], prep["mw2t"], prep["mb2"],
      prep["mask"], prep["ws"], prep["bns"])
    return out.reshape(N, C, H, W)


# --------------------------------------------------------------------------
# Pure-JAX reference (correctness check, eval-mode BatchNorm).
# --------------------------------------------------------------------------
def cbam_reference(x_nchw, raw, eps=1e-5):
    x = x_nchw.astype(jnp.float32)
    avg = x.mean(axis=(2, 3))                      # (N, C)
    mx = x.max(axis=(2, 3))

    def mlp(v):
        h = jnp.maximum(v @ raw["w1"].T + raw["b1"], 0.0)
        return h @ raw["w2"].T + raw["b2"]

    cscale = jax.nn.sigmoid(mlp(avg) + mlp(mx))[:, :, None, None]
    xc = x * cscale

    comp = jnp.stack([xc.max(axis=1), xc.mean(axis=1)], axis=1)     # (N, 2, H, W)
    s = jax.lax.conv_general_dilated(
        comp, raw["conv_w"], (1, 1), [(3, 3), (3, 3)],
        dimension_numbers=("NCHW", "OIHW", "NCHW"))
    inv = raw["bn_gamma"] / jnp.sqrt(raw["bn_var"] + eps)
    s = (s - raw["bn_mean"]) * inv + raw["bn_beta"]
    return xc * jax.nn.sigmoid(s)


if __name__ == "__main__":
    key = jax.random.PRNGKey(0)
    keys = jax.random.split(key, 8)

    # gate_channels = 32, reduction_ratio = 16 -> hidden = 2 ; HW = 256 (lane-dense)
    N, C, H, W = 8, 32, 16, 16
    Cr = C // 16

    raw = {
        "w1": 0.3 * jax.random.normal(keys[1], (Cr, C), jnp.float32),   # nn.Linear(C, Cr).weight
        "b1": 0.1 * jax.random.normal(keys[2], (Cr,), jnp.float32),
        "w2": 0.3 * jax.random.normal(keys[3], (C, Cr), jnp.float32),   # nn.Linear(Cr, C).weight
        "b2": 0.1 * jax.random.normal(keys[4], (C,), jnp.float32),
        "conv_w": 0.1 * jax.random.normal(keys[5], (1, 2, 7, 7), jnp.float32),  # OIHW
        # SpatialGate BasicConv BatchNorm2d(1), eval-mode running stats
        "bn_gamma": jnp.float32(1.1),
        "bn_beta": jnp.float32(0.05),
        "bn_mean": jnp.float32(0.02),
        "bn_var": jnp.float32(0.9),
    }

    x = jax.random.normal(keys[0], (N, C, H, W), jnp.float32)

    prep = prepare_cbam_params(raw, H, W)          # one-time prep, outside jit
    out = jax.block_until_ready(jax.jit(cbam_forward)(x, prep))
    ref = cbam_reference(x, raw)

    assert out.shape == (N, C, H, W) and out.dtype == x.dtype
    err = float(jnp.max(jnp.abs(out.astype(jnp.float32) - ref)))
    assert bool(jnp.allclose(out.astype(jnp.float32), ref, atol=2e-3, rtol=2e-3)), err
    print("KERNEL_OK")
</pallas_src>

<mosaic_0001>
module attributes {stable_mosaic.version = 11 : i64} {
  func.func @cbam_kernel(%arg0: i32, %arg1: memref<4x32x256xf32, #tpu.memory_space<vmem>>, %arg2: memref<32x2xf32, #tpu.memory_space<vmem>>, %arg3: memref<1x2xf32, #tpu.memory_space<vmem>>, %arg4: memref<2x32xf32, #tpu.memory_space<vmem>>, %arg5: memref<1x32xf32, #tpu.memory_space<vmem>>, %arg6: memref<49x256xf32, #tpu.memory_space<vmem>>, %arg7: memref<98xf32, #tpu.memory_space<smem>>, %arg8: memref<2xf32, #tpu.memory_space<smem>>, %arg9: memref<4x32x256xf32, #tpu.memory_space<vmem>>, %arg10: memref<4x32x256xf32, #tpu.memory_space<vmem>>) attributes {dimension_semantics = [#tpu.dimension_semantics<parallel>], iteration_bounds = array<i64: 2>, scalar_prefetch = 0 : i64, scratch_operands = 1 : i64, tpu.core_type = #tpu.core_type<tc>, window_params = [{transform_indices = @transform_0, window_bounds = array<i64: 4, 32, 256>}, {pipeline_mode = #tpu.pipeline_mode<synchronous>, transform_indices = @transform_1, window_bounds = array<i64: 32, 2>}, {pipeline_mode = #tpu.pipeline_mode<synchronous>, transform_indices = @transform_2, window_bounds = array<i64: 1, 2>}, {pipeline_mode = #tpu.pipeline_mode<synchronous>, transform_indices = @transform_3, window_bounds = array<i64: 2, 32>}, {pipeline_mode = #tpu.pipeline_mode<synchronous>, transform_indices = @transform_4, window_bounds = array<i64: 1, 32>}, {pipeline_mode = #tpu.pipeline_mode<synchronous>, transform_indices = @transform_5, window_bounds = array<i64: 49, 256>}, {transform_indices = @transform_6, window_bounds = array<i64: 98>}, {transform_indices = @transform_7, window_bounds = array<i64: 2>}, {transform_indices = @transform_8, window_bounds = array<i64: 4, 32, 256>}]} {
    %c0 = arith.constant 0 : index
    %c0_0 = arith.constant 0 : index
    %c0_1 = arith.constant 0 : index
    %0 = vector.load %arg1[%c0, %c0_0, %c0_1] : memref<4x32x256xf32, #tpu.memory_space<vmem>>, vector<4x32x256xf32>
    %cst = arith.constant dense<0.000000e+00> : vector<4x32xf32>
    %1 = vector.multi_reduction <add>, %0, %cst [2] : vector<4x32x256xf32> to vector<4x32xf32>
    %cst_2 = arith.constant 2.560000e+02 : f32
    %2 = vector.broadcast %cst_2 : f32 to vector<4x32xf32>
    %3 = arith.divf %1, %2 : vector<4x32xf32>
    %cst_3 = arith.constant dense<0xFF800000> : vector<4x32xf32>
    %4 = vector.multi_reduction <maximumf>, %0, %cst_3 [2] : vector<4x32x256xf32> to vector<4x32xf32>
    %5 = tpu.concatenate %3, %4 in 0 : vector<4x32xf32>, vector<4x32xf32> -> vector<8x32xf32>
    %c0_4 = arith.constant 0 : index
    %c0_5 = arith.constant 0 : index
    %6 = vector.load %arg2[%c0_4, %c0_5] : memref<32x2xf32, #tpu.memory_space<vmem>>, vector<32x2xf32>
    %cst_6 = arith.constant dense<0.000000e+00> : vector<8x2xf32>
    %7 = tpu.matmul %5, %6, %cst_6 {dimension_numbers = #tpu.dot_dimension_numbers<[1], [0], [0], [1], [0, 0, 1, 1], [], []>, precision = #tpu.contract_precision<fp32>} : vector<8x32xf32>, vector<32x2xf32>, vector<8x2xf32> -> vector<8x2xf32>
    %c0_7 = arith.constant 0 : index
    %c0_8 = arith.constant 0 : index
    %8 = vector.load %arg3[%c0_7, %c0_8] : memref<1x2xf32, #tpu.memory_space<vmem>>, vector<1x2xf32>
    %9 = vector.broadcast %8 : vector<1x2xf32> to vector<8x2xf32>
    %10 = arith.addf %7, %9 : vector<8x2xf32>
    %cst_9 = arith.constant 0.000000e+00 : f32
    %11 = vector.broadcast %cst_9 : f32 to vector<8x2xf32>
    %12 = arith.maximumf %10, %11 : vector<8x2xf32>
    %c0_10 = arith.constant 0 : index
    %c0_11 = arith.constant 0 : index
    %13 = vector.load %arg4[%c0_10, %c0_11] : memref<2x32xf32, #tpu.memory_space<vmem>>, vector<2x32xf32>
    %cst_12 = arith.constant dense<0.000000e+00> : vector<8x32xf32>
    %14 = tpu.matmul %12, %13, %cst_12 {dimension_numbers = #tpu.dot_dimension_numbers<[1], [0], [0], [1], [0, 0, 1, 1], [], []>, precision = #tpu.contract_precision<fp32>} : vector<8x2xf32>, vector<2x32xf32>, vector<8x32xf32> -> vector<8x32xf32>
    %c0_13 = arith.constant 0 : index
    %c0_14 = arith.constant 0 : index
    %15 = vector.load %arg5[%c0_13, %c0_14] : memref<1x32xf32, #tpu.memory_space<vmem>>, vector<1x32xf32>
    %16 = vector.broadcast %15 : vector<1x32xf32> to vector<8x32xf32>
    %17 = arith.addf %14, %16 : vector<8x32xf32>
    %18 = vector.extract_strided_slice %17 {offsets = [0, 0], sizes = [4, 32], strides = [1, 1]} : vector<8x32xf32> to vector<4x32xf32>
    %19 = vector.extract_strided_slice %17 {offsets = [4, 0], sizes = [4, 32], strides = [1, 1]} : vector<8x32xf32> to vector<4x32xf32>
    %20 = arith.addf %18, %19 : vector<4x32xf32>
    %21 = arith.negf %20 : vector<4x32xf32>
    %22 = math.exp %21 : vector<4x32xf32>
    %cst_15 = arith.constant 1.000000e+00 : f32
    %23 = vector.broadcast %cst_15 : f32 to vector<4x32xf32>
    %24 = arith.addf %23, %22 : vector<4x32xf32>
    %25 = arith.divf %23, %24 : vector<4x32xf32>
    %26 = vector.shape_cast %25 : vector<4x32xf32> to vector<4x32x1xf32>
    %27 = vector.broadcast %26 : vector<4x32x1xf32> to vector<4x32x256xf32>
    %28 = arith.mulf %0, %27 : vector<4x32x256xf32>
    %c0_16 = arith.constant 0 : index
    %c0_17 = arith.constant 0 : index
    %c0_18 = arith.constant 0 : index
    %29 = vector.load %arg10[%c0_16, %c0_17, %c0_18] : memref<4x32x256xf32, #tpu.memory_space<vmem>>, vector<4x32x256xf32>
    tpu.vector_store %arg10[%c0_16, %c0_17, %c0_18], %28 {strides = array<i32>} : memref<4x32x256xf32, #tpu.memory_space<vmem>>, vector<4x32x256xf32>,
    %c0_19 = arith.constant 0 : index
    %c0_20 = arith.constant 0 : index
    %c0_21 = arith.constant 0 : index
    %30 = vector.load %arg10[%c0_19, %c0_20, %c0_21] : memref<4x32x256xf32, #tpu.memory_space<vmem>>, vector<4x32x256xf32>
    %cst_22 = arith.constant dense<0xFF800000> : vector<4x256xf32>
    %31 = vector.multi_reduction <maximumf>, %30, %cst_22 [1] : vector<4x32x256xf32> to vector<4x256xf32>
    %cst_23 = arith.constant dense<0.000000e+00> : vector<4x256xf32>
    %32 = vector.multi_reduction <add>, %30, %cst_23 [1] : vector<4x32x256xf32> to vector<4x256xf32>
    %cst_24 = arith.constant 3.200000e+01 : f32
    %33 = vector.broadcast %cst_24 : f32 to vector<4x256xf32>
    %34 = arith.divf %32, %33 : vector<4x256xf32>
    %cst_25 = arith.constant 0.000000e+00 : f32
    %35 = vector.broadcast %cst_25 : f32 to vector<4x256xf32>
    %cst_26 = arith.constant 0.000000e+00 : f32
    %36 = vector.broadcast %cst_26 : f32 to vector<4x256xf32>
    %cst_27 = arith.constant 0.000000e+00 : f32
    %37 = vector.broadcast %cst_27 : f32 to vector<4x256xf32>
    %cst_28 = arith.constant 0.000000e+00 : f32
    %38 = vector.broadcast %cst_28 : f32 to vector<4x256xf32>
    %c51_i32 = arith.constant 51 : i32
    %39 = tpu.dynamic_rotate %31 by %c51_i32 dim 1 : vector<4x256xf32>, i32 -> vector<4x256xf32>
    %c51_i32_29 = arith.constant 51 : i32
    %40 = tpu.dynamic_rotate %34 by %c51_i32_29 dim 1 : vector<4x256xf32>, i32 -> vector<4x256xf32>
    %c0_30 = arith.constant 0 : index
    %c0_31 = arith.constant 0 : index
    %41 = vector.load %arg6[%c0_30, %c0_31] : memref<49x256xf32, #tpu.memory_space<vmem>>, vector<1x256xf32>
    %c0_32 = arith.constant 0 : index
    %42 = memref.load %arg7[%c0_32] : memref<98xf32, #tpu.memory_space<smem>>
    %43 = vector.broadcast %42 : f32 to vector<4x256xf32>
    %44 = arith.mulf %43, %39 : vector<4x256xf32>
    %c49 = arith.constant 49 : index
    %45 = memref.load %arg7[%c49] : memref<98xf32, #tpu.memory_space<smem>>
    %46 = vector.broadcast %45 : f32 to vector<4x256xf32>
    %47 = arith.mulf %46, %40 : vector<4x256xf32>
    %48 = arith.addf %44, %47 : vector<4x256xf32>
    %49 = vector.broadcast %41 : vector<1x256xf32> to vector<4x256xf32>
    %50 = arith.mulf %48, %49 : vector<4x256xf32>
    %51 = arith.addf %35, %50 : vector<4x256xf32>
    %c50_i32 = arith.constant 50 : i32
    %52 = tpu.dynamic_rotate %31 by %c50_i32 dim 1 : vector<4x256xf32>, i32 -> vector<4x256xf32>
    %c50_i32_33 = arith.constant 50 : i32
    %53 = tpu.dynamic_rotate %34 by %c50_i32_33 dim 1 : vector<4x256xf32>, i32 -> vector<4x256xf32>
    %c1 = arith.constant 1 : index
    %c0_34 = arith.constant 0 : index
    %54 = vector.load %arg6[%c1, %c0_34] : memref<49x256xf32, #tpu.memory_space<vmem>>, vector<1x256xf32>
    %c1_35 = arith.constant 1 : index
    %55 = memref.load %arg7[%c1_35] : memref<98xf32, #tpu.memory_space<smem>>
    %56 = vector.broadcast %55 : f32 to vector<4x256xf32>
    %57 = arith.mulf %56, %52 : vector<4x256xf32>
    %c50 = arith.constant 50 : index
    %58 = memref.load %arg7[%c50] : memref<98xf32, #tpu.memory_space<smem>>
    %59 = vector.broadcast %58 : f32 to vector<4x256xf32>
    %60 = arith.mulf %59, %53 : vector<4x256xf32>
    %61 = arith.addf %57, %60 : vector<4x256xf32>
    %62 = vector.broadcast %54 : vector<1x256xf32> to vector<4x256xf32>
    %63 = arith.mulf %61, %62 : vector<4x256xf32>
    %64 = arith.addf %36, %63 : vector<4x256xf32>
    %c49_i32 = arith.constant 49 : i32
    %65 = tpu.dynamic_rotate %31 by %c49_i32 dim 1 : vector<4x256xf32>, i32 -> vector<4x256xf32>
    %c49_i32_36 = arith.constant 49 : i32
    %66 = tpu.dynamic_rotate %34 by %c49_i32_36 dim 1 : vector<4x256xf32>, i32 -> vector<4x256xf32>
    %c2 = arith.constant 2 : index
    %c0_37 = arith.constant 0 : index
    %67 = vector.load %arg6[%c2, %c0_37] : memref<49x256xf32, #tpu.memory_space<vmem>>, vector<1x256xf32>
    %c2_38 = arith.constant 2 : index
    %68 = memref.load %arg7[%c2_38] : memref<98xf32, #tpu.memory_space<smem>>
    %69 = vector.broadcast %68 : f32 to vector<4x256xf32>
    %70 = arith.mulf %69, %65 : vector<4x256xf32>
    %c51 = arith.constant 51 : index
    %71 = memref.load %arg7[%c51] : memref<98xf32, #tpu.memory_space<smem>>
    %72 = vector.broadcast %71 : f32 to vector<4x256xf32>
    %73 = arith.mulf %72, %66 : vector<4x256xf32>
    %74 = arith.addf %70, %73 : vector<4x256xf32>
    %75 = vector.broadcast %67 : vector<1x256xf32> to vector<4x256xf32>
    %76 = arith.mulf %74, %75 : vector<4x256xf32>
    %77 = arith.addf %37, %76 : vector<4x256xf32>
    %c48_i32 = arith.constant 48 : i32
    %78 = tpu.dynamic_rotate %31 by %c48_i32 dim 1 : vector<4x256xf32>, i32 -> vector<4x256xf32>
    %c48_i32_39 = arith.constant 48 : i32
    %79 = tpu.dynamic_rotate %34 by %c48_i32_39 dim 1 : vector<4x256xf32>, i32 -> vector<4x256xf32>
    %c3 = arith.constant 3 : index
    %c0_40 = arith.constant 0 : index
    %80 = vector.load %arg6[%c3, %c0_40] : memref<49x256xf32, #tpu.memory_space<vmem>>, vector<1x256xf32>
    %c3_41 = arith.constant 3 : index
    %81 = memref.load %arg7[%c3_41] : memref<98xf32, #tpu.memory_space<smem>>
    %82 = vector.broadcast %81 : f32 to vector<4x256xf32>
    %83 = arith.mulf %82, %78 : vector<4x256xf32>
    %c52 = arith.constant 52 : index
    %84 = memref.load %arg7[%c52] : memref<98xf32, #tpu.memory_space<smem>>
    %85 = vector.broadcast %84 : f32 to vector<4x256xf32>
    %86 = arith.mulf %85, %79 : vector<4x256xf32>
    %87 = arith.addf %83, %86 : vector<4x256xf32>
    %88 = vector.broadcast %80 : vector<1x256xf32> to vector<4x256xf32>
    %89 = arith.mulf %87, %88 : vector<4x256xf32>
    %90 = arith.addf %38, %89 : vector<4x256xf32>
    %c47_i32 = arith.constant 47 : i32
    %91 = tpu.dynamic_rotate %31 by %c47_i32 dim 1 : vector<4x256xf32>, i32 -> vector<4x256xf32>
    %c47_i32_42 = arith.constant 47 : i32
    %92 = tpu.dynamic_rotate %34 by %c47_i32_42 dim 1 : vector<4x256xf32>, i32 -> vector<4x256xf32>
    %c4 = arith.constant 4 : index
    %c0_43 = arith.constant 0 : index
    %93 = vector.load %arg6[%c4, %c0_43] : memref<49x256xf32, #tpu.memory_space<vmem>>, vector<1x256xf32>
    %c4_44 = arith.constant 4 : index
    %94 = memref.load %arg7[%c4_44] : memref<98xf32, #tpu.memory_space<smem>>
    %95 = vector.broadcast %94 : f32 to vector<4x256xf32>
    %96 = arith.mulf %95, %91 : vector<4x256xf32>
    %c53 = arith.constant 53 : index
    %97 = memref.load %arg7[%c53] : memref<98xf32, #tpu.memory_space<smem>>
    %98 = vector.broadcast %97 : f32 to vector<4x256xf32>
    %99 = arith.mulf %98, %92 : vector<4x256xf32>
    %100 = arith.addf %96, %99 : vector<4x256xf32>
    %101 = vector.broadcast %93 : vector<1x256xf32> to vector<4x256xf32>
    %102 = arith.mulf %100, %101 : vector<4x256xf32>
    %103 = arith.addf %51, %102 : vector<4x256xf32>
    %c46_i32 = arith.constant 46 : i32
    %104 = tpu.dynamic_rotate %31 by %c46_i32 dim 1 : vector<4x256xf32>, i32 -> vector<4x256xf32>
    %c46_i32_45 = arith.constant 46 : i32
    %105 = tpu.dynamic_rotate %34 by %c46_i32_45 dim 1 : vector<4x256xf32>, i32 -> vector<4x256xf32>
    %c5 = arith.constant 5 : index
    %c0_46 = arith.constant 0 : index
    %106 = vector.load %arg6[%c5, %c0_46] : memref<49x256xf32, #tpu.memory_space<vmem>>, vector<1x256xf32>
    %c5_47 = arith.constant 5 : index
    %107 = memref.load %arg7[%c5_47] : memref<98xf32, #tpu.memory_space<smem>>
    %108 = vector.broadcast %107 : f32 to vector<4x256xf32>
    %109 = arith.mulf %108, %104 : vector<4x256xf32>
    %c54 = arith.constant 54 : index
    %110 = memref.load %arg7[%c54] : memref<98xf32, #tpu.memory_space<smem>>
    %111 = vector.broadcast %110 : f32 to vector<4x256xf32>
    %112 = arith.mulf %111, %105 : vector<4x256xf32>
    %113 = arith.addf %109, %112 : vector<4x256xf32>
    %114 = vector.broadcast %106 : vector<1x256xf32> to vector<4x256xf32>
    %115 = arith.mulf %113, %114 : vector<4x256xf32>
    %116 = arith.addf %64, %115 : vector<4x256xf32>
    %c45_i32 = arith.constant 45 : i32
    %117 = tpu.dynamic_rotate %31 by %c45_i32 dim 1 : vector<4x256xf32>, i32 -> vector<4x256xf32>
    %c45_i32_48 = arith.constant 45 : i32
    %118 = tpu.dynamic_rotate %34 by %c45_i32_48 dim 1 : vector<4x256xf32>, i32 -> vector<4x256xf32>
    %c6 = arith.constant 6 : index
    %c0_49 = arith.constant 0 : index
    %119 = vector.load %arg6[%c6, %c0_49] : memref<49x256xf32, #tpu.memory_space<vmem>>, vector<1x256xf32>
    %c6_50 = arith.constant 6 : index
    %120 = memref.load %arg7[%c6_50] : memref<98xf32, #tpu.memory_space<smem>>
    %121 = vector.broadcast %120 : f32 to vector<4x256xf32>
    %122 = arith.mulf %121, %117 : vector<4x256xf32>
    %c55 = arith.constant 55 : index
    %123 = memref.load %arg7[%c55] : memref<98xf32, #tpu.memory_space<smem>>
    %124 = vector.broadcast %123 : f32 to vector<4x256xf32>
    %125 = arith.mulf %124, %118 : vector<4x256xf32>
    %126 = arith.addf %122, %125 : vector<4x256xf32>
    %127 = vector.broadcast %119 : vector<1x256xf32> to vector<4x256xf32>
    %128 = arith.mulf %126, %127 : vector<4x256xf32>
    %129 = arith.addf %77, %128 : vector<4x256xf32>
    %c35_i32 = arith.constant 35 : i32
    %130 = tpu.dynamic_rotate %31 by %c35_i32 dim 1 : vector<4x256xf32>, i32 -> vector<4x256xf32>
    %c35_i32_51 = arith.constant 35 : i32
    %131 = tpu.dynamic_rotate %34 by %c35_i32_51 dim 1 : vector<4x256xf32>, i32 -> vector<4x256xf32>
    %c7 = arith.constant 7 : index
    %c0_52 = arith.constant 0 : index
    %132 = vector.load %arg6[%c7, %c0_52] : memref<49x256xf32, #tpu.memory_space<vmem>>, vector<1x256xf32>
    %c7_53 = arith.constant 7 : index
    %133 = memref.load %arg7[%c7_53] : memref<98xf32, #tpu.memory_space<smem>>
    %134 = vector.broadcast %133 : f32 to vector<4x256xf32>
    %135 = arith.mulf %134, %130 : vector<4x256xf32>
    %c56 = arith.constant 56 : index
    %136 = memref.load %arg7[%c56] : memref<98xf32, #tpu.memory_space<smem>>
    %137 = vector.broadcast %136 : f32 to vector<4x256xf32>
    %138 = arith.mulf %137, %131 : vector<4x256xf32>
    %139 = arith.addf %135, %138 : vector<4x256xf32>
    %140 = vector.broadcast %132 : vector<1x256xf32> to vector<4x256xf32>
    %141 = arith.mulf %139, %140 : vector<4x256xf32>
    %142 = arith.addf %90, %141 : vector<4x256xf32>
    %c34_i32 = arith.constant 34 : i32
    %143 = tpu.dynamic_rotate %31 by %c34_i32 dim 1 : vector<4x256xf32>, i32 -> vector<4x256xf32>
    %c34_i32_54 = arith.constant 34 : i32
    %144 = tpu.dynamic_rotate %34 by %c34_i32_54 dim 1 : vector<4x256xf32>, i32 -> vector<4x256xf32>
    %c8 = arith.constant 8 : index
    %c0_55 = arith.constant 0 : index
    %145 = vector.load %arg6[%c8, %c0_55] : memref<49x256xf32, #tpu.memory_space<vmem>>, vector<1x256xf32>
    %c8_56 = arith.constant 8 : index
    %146 = memref.load %arg7[%c8_56] : memref<98xf32, #tpu.memory_space<smem>>
    %147 = vector.broadcast %146 : f32 to vector<4x256xf32>
    %148 = arith.mulf %147, %143 : vector<4x256xf32>
    %c57 = arith.constant 57 : index
    %149 = memref.load %arg7[%c57] : memref<98xf32, #tpu.memory_space<smem>>
    %150 = vector.broadcast %149 : f32 to vector<4x256xf32>
    %151 = arith.mulf %150, %144 : vector<4x256xf32>
    %152 = arith.addf %148, %151 : vector<4x256xf32>
    %153 = vector.broadcast %145 : vector<1x256xf32> to vector<4x256xf32>
    %154 = arith.mulf %152, %153 : vector<4x256xf32>
    %155 = arith.addf %103, %154 : vector<4x256xf32>
    %c33_i32 = arith.constant 33 : i32
    %156 = tpu.dynamic_rotate %31 by %c33_i32 dim 1 : vector<4x256xf32>, i32 -> vector<4x256xf32>
    %c33_i32_57 = arith.constant 33 : i32
    %157 = tpu.dynamic_rotate %34 by %c33_i32_57 dim 1 : vector<4x256xf32>, i32 -> vector<4x256xf32>
    %c9 = arith.constant 9 : index
    %c0_58 = arith.constant 0 : index
    %158 = vector.load %arg6[%c9, %c0_58] : memref<49x256xf32, #tpu.memory_space<vmem>>, vector<1x256xf32>
    %c9_59 = arith.constant 9 : index
    %159 = memref.load %arg7[%c9_59] : memref<98xf32, #tpu.memory_space<smem>>
    %160 = vector.broadcast %159 : f32 to vector<4x256xf32>
    %161 = arith.mulf %160, %156 : vector<4x256xf32>
    %c58 = arith.constant 58 : index
    %162 = memref.load %arg7[%c58] : memref<98xf32, #tpu.memory_space<smem>>
    %163 = vector.broadcast %162 : f32 to vector<4x256xf32>
    %164 = arith.mulf %163, %157 : vector<4x256xf32>
    %165 = arith.addf %161, %164 : vector<4x256xf32>
    %166 = vector.broadcast %158 : vector<1x256xf32> to vector<4x256xf32>
    %167 = arith.mulf %165, %166 : vector<4x256xf32>
    %168 = arith.addf %116, %167 : vector<4x256xf32>
    %c32_i32 = arith.constant 32 : i32
    %169 = tpu.dynamic_rotate %31 by %c32_i32 dim 1 : vector<4x256xf32>, i32 -> vector<4x256xf32>
    %c32_i32_60 = arith.constant 32 : i32
    %170 = tpu.dynamic_rotate %34 by %c32_i32_60 dim 1 : vector<4x256xf32>, i32 -> vector<4x256xf32>
    %c10 = arith.constant 10 : index
    %c0_61 = arith.constant 0 : index
    %171 = vector.load %arg6[%c10, %c0_61] : memref<49x256xf32, #tpu.memory_space<vmem>>, vector<1x256xf32>
    %c10_62 = arith.constant 10 : index
    %172 = memref.load %arg7[%c10_62] : memref<98xf32, #tpu.memory_space<smem>>
    %173 = vector.broadcast %172 : f32 to vector<4x256xf32>
    %174 = arith.mulf %173, %169 : vector<4x256xf32>
    %c59 = arith.constant 59 : index
    %175 = memref.load %arg7[%c59] : memref<98xf32, #tpu.memory_space<smem>>
    %176 = vector.broadcast %175 : f32 to vector<4x256xf32>
    %177 = arith.mulf %176, %170 : vector<4x256xf32>
    %178 = arith.addf %174, %177 : vector<4x256xf32>
    %179 = vector.broadcast %171 : vector<1x256xf32> to vector<4x256xf32>
    %180 = arith.mulf %178, %179 : vector<4x256xf32>
    %181 = arith.addf %129, %180 : vector<4x256xf32>
    %c31_i32 = arith.constant 31 : i32
    %182 = tpu.dynamic_rotate %31 by %c31_i32 dim 1 : vector<4x256xf32>, i32 -> vector<4x256xf32>
    %c31_i32_63 = arith.constant 31 : i32
    %183 = tpu.dynamic_rotate %34 by %c31_i32_63 dim 1 : vector<4x256xf32>, i32 -> vector<4x256xf32>
    %c11 = arith.constant 11 : index
    %c0_64 = arith.constant 0 : index
    %184 = vector.load %arg6[%c11, %c0_64] : memref<49x256xf32, #tpu.memory_space<vmem>>, vector<1x256xf32>
    %c11_65 = arith.constant 11 : index
    %185 = memref.load %arg7[%c11_65] : memref<98xf32, #tpu.memory_space<smem>>
    %186 = vector.broadcast %185 : f32 to vector<4x256xf32>
    %187 = arith.mulf %186, %182 : vector<4x256xf32>
    %c60 = arith.constant 60 : index
    %188 = memref.load %arg7[%c60] : memref<98xf32, #tpu.memory_space<smem>>
    %189 = vector.broadcast %188 : f32 to vector<4x256xf32>
    %190 = arith.mulf %189, %183 : vector<4x256xf32>
    %191 = arith.addf %187, %190 : vector<4x256xf32>
    %192 = vector.broadcast %184 : vector<1x256xf32> to vector<4x256xf32>
    %193 = arith.mulf %191, %192 : vector<4x256xf32>
    %194 = arith.addf %142, %193 : vector<4x256xf32>
    %c30_i32 = arith.constant 30 : i32
    %195 = tpu.dynamic_rotate %31 by %c30_i32 dim 1 : vector<4x256xf32>, i32 -> vector<4x256xf32>
    %c30_i32_66 = arith.constant 30 : i32
    %196 = tpu.dynamic_rotate %34 by %c30_i32_66 dim 1 : vector<4x256xf32>, i32 -> vector<4x256xf32>
    %c12 = arith.constant 12 : index
    %c0_67 = arith.constant 0 : index
    %197 = vector.load %arg6[%c12, %c0_67] : memref<49x256xf32, #tpu.memory_space<vmem>>, vector<1x256xf32>
    %c12_68 = arith.constant 12 : index
    %198 = memref.load %arg7[%c12_68] : memref<98xf32, #tpu.memory_space<smem>>
    %199 = vector.broadcast %198 : f32 to vector<4x256xf32>
    %200 = arith.mulf %199, %195 : vector<4x256xf32>
    %c61 = arith.constant 61 : index
    %201 = memref.load %arg7[%c61] : memref<98xf32, #tpu.memory_space<smem>>
    %202 = vector.broadcast %201 : f32 to vector<4x256xf32>
    %203 = arith.mulf %202, %196 : vector<4x256xf32>
    %204 = arith.addf %200, %203 : vector<4x256xf32>
    %205 = vector.broadcast %197 : vector<1x256xf32> to vector<4x256xf32>
    %206 = arith.mulf %204, %205 : vector<4x256xf32>
    %207 = arith.addf %155, %206 : vector<4x256xf32>
    %c29_i32 = arith.constant 29 : i32
    %208 = tpu.dynamic_rotate %31 by %c29_i32 dim 1 : vector<4x256xf32>, i32 -> vector<4x256xf32>
    %c29_i32_69 = arith.constant 29 : i32
    %209 = tpu.dynamic_rotate %34 by %c29_i32_69 dim 1 : vector<4x256xf32>, i32 -> vector<4x256xf32>
    %c13 = arith.constant 13 : index
    %c0_70 = arith.constant 0 : index
    %210 = vector.load %arg6[%c13, %c0_70] : memref<49x256xf32, #tpu.memory_space<vmem>>, vector<1x256xf32>
    %c13_71 = arith.constant 13 : index
    %211 = memref.load %arg7[%c13_71] : memref<98xf32, #tpu.memory_space<smem>>
    %212 = vector.broadcast %211 : f32 to vector<4x256xf32>
    %213 = arith.mulf %212, %208 : vector<4x256xf32>
    %c62 = arith.constant 62 : index
    %214 = memref.load %arg7[%c62] : memref<98xf32, #tpu.memory_space<smem>>
    %215 = vector.broadcast %214 : f32 to vector<4x256xf32>
    %216 = arith.mulf %215, %209 : vector<4x256xf32>
    %217 = arith.addf %213, %216 : vector<4x256xf32>
    %218 = vector.broadcast %210 : vector<1x256xf32> to vector<4x256xf32>
    %219 = arith.mulf %217, %218 : vector<4x256xf32>
    %220 = arith.addf %168, %219 : vector<4x256xf32>
    %c19_i32 = arith.constant 19 : i32
    %221 = tpu.dynamic_rotate %31 by %c19_i32 dim 1 : vector<4x256xf32>, i32 -> vector<4x256xf32>
    %c19_i32_72 = arith.constant 19 : i32
    %222 = tpu.dynamic_rotate %34 by %c19_i32_72 dim 1 : vector<4x256xf32>, i32 -> vector<4x256xf32>
    %c14 = arith.constant 14 : index
    %c0_73 = arith.constant 0 : index
    %223 = vector.load %arg6[%c14, %c0_73] : memref<49x256xf32, #tpu.memory_space<vmem>>, vector<1x256xf32>
    %c14_74 = arith.constant 14 : index
    %224 = memref.load %arg7[%c14_74] : memref<98xf32, #tpu.memory_space<smem>>
    %225 = vector.broadcast %224 : f32 to vector<4x256xf32>
    %226 = arith.mulf %225, %221 : vector<4x256xf32>
    %c63 = arith.constant 63 : index
    %227 = memref.load %arg7[%c63] : memref<98xf32, #tpu.memory_space<smem>>
    %228 = vector.broadcast %227 : f32 to vector<4x256xf32>
    %229 = arith.mulf %228, %222 : vector<4x256xf32>
    %230 = arith.addf %226, %229 : vector<4x256xf32>
    %231 = vector.broadcast %223 : vector<1x256xf32> to vector<4x256xf32>
    %232 = arith.mulf %230, %231 : vector<4x256xf32>
    %233 = arith.addf %181, %232 : vector<4x256xf32>
    %c18_i32 = arith.constant 18 : i32
    %234 = tpu.dynamic_rotate %31 by %c18_i32 dim 1 : vector<4x256xf32>, i32 -> vector<4x256xf32>
    %c18_i32_75 = arith.constant 18 : i32
    %235 = tpu.dynamic_rotate %34 by %c18_i32_75 dim 1 : vector<4x256xf32>, i32 -> vector<4x256xf32>
    %c15 = arith.constant 15 : index
    %c0_76 = arith.constant 0 : index
    %236 = vector.load %arg6[%c15, %c0_76] : memref<49x256xf32, #tpu.memory_space<vmem>>, vector<1x256xf32>
    %c15_77 = arith.constant 15 : index
    %237 = memref.load %arg7[%c15_77] : memref<98xf32, #tpu.memory_space<smem>>
    %238 = vector.broadcast %237 : f32 to vector<4x256xf32>
    %239 = arith.mulf %238, %234 : vector<4x256xf32>
    %c64 = arith.constant 64 : index
    %240 = memref.load %arg7[%c64] : memref<98xf32, #tpu.memory_space<smem>>
    %241 = vector.broadcast %240 : f32 to vector<4x256xf32>
    %242 = arith.mulf %241, %235 : vector<4x256xf32>
    %243 = arith.addf %239, %242 : vector<4x256xf32>
    %244 = vector.broadcast %236 : vector<1x256xf32> to vector<4x256xf32>
    %245 = arith.mulf %243, %244 : vector<4x256xf32>
    %246 = arith.addf %194, %245 : vector<4x256xf32>
    %c17_i32 = arith.constant 17 : i32
    %247 = tpu.dynamic_rotate %31 by %c17_i32 dim 1 : vector<4x256xf32>, i32 -> vector<4x256xf32>
    %c17_i32_78 = arith.constant 17 : i32
    %248 = tpu.dynamic_rotate %34 by %c17_i32_78 dim 1 : vector<4x256xf32>, i32 -> vector<4x256xf32>
    %c16 = arith.constant 16 : index
    %c0_79 = arith.constant 0 : index
    %249 = vector.load %arg6[%c16, %c0_79] : memref<49x256xf32, #tpu.memory_space<vmem>>, vector<1x256xf32>
    %c16_80 = arith.constant 16 : index
    %250 = memref.load %arg7[%c16_80] : memref<98xf32, #tpu.memory_space<smem>>
    %251 = vector.broadcast %250 : f32 to vector<4x256xf32>
    %252 = arith.mulf %251, %247 : vector<4x256xf32>
    %c65 = arith.constant 65 : index
    %253 = memref.load %arg7[%c65] : memref<98xf32, #tpu.memory_space<smem>>
    %254 = vector.broadcast %253 : f32 to vector<4x256xf32>
    %255 = arith.mulf %254, %248 : vector<4x256xf32>
    %256 = arith.addf %252, %255 : vector<4x256xf32>
    %257 = vector.broadcast %249 : vector<1x256xf32> to vector<4x256xf32>
    %258 = arith.mulf %256, %257 : vector<4x256xf32>
    %259 = arith.addf %207, %258 : vector<4x256xf32>
    %c16_i32 = arith.constant 16 : i32
    %260 = tpu.dynamic_rotate %31 by %c16_i32 dim 1 : vector<4x256xf32>, i32 -> vector<4x256xf32>
    %c16_i32_81 = arith.constant 16 : i32
    %261 = tpu.dynamic_rotate %34 by %c16_i32_81 dim 1 : vector<4x256xf32>, i32 -> vector<4x256xf32>
    %c17 = arith.constant 17 : index
    %c0_82 = arith.constant 0 : index
    %262 = vector.load %arg6[%c17, %c0_82] : memref<49x256xf32, #tpu.memory_space<vmem>>, vector<1x256xf32>
    %c17_83 = arith.constant 17 : index
    %263 = memref.load %arg7[%c17_83] : memref<98xf32, #tpu.memory_space<smem>>
    %264 = vector.broadcast %263 : f32 to vector<4x256xf32>
    %265 = arith.mulf %264, %260 : vector<4x256xf32>
    %c66 = arith.constant 66 : index
    %266 = memref.load %arg7[%c66] : memref<98xf32, #tpu.memory_space<smem>>
    %267 = vector.broadcast %266 : f32 to vector<4x256xf32>
    %268 = arith.mulf %267, %261 : vector<4x256xf32>
    %269 = arith.addf %265, %268 : vector<4x256xf32>
    %270 = vector.broadcast %262 : vector<1x256xf32> to vector<4x256xf32>
    %271 = arith.mulf %269, %270 : vector<4x256xf32>
    %272 = arith.addf %220, %271 : vector<4x256xf32>
    %c15_i32 = arith.constant 15 : i32
    %273 = tpu.dynamic_rotate %31 by %c15_i32 dim 1 : vector<4x256xf32>, i32 -> vector<4x256xf32>
    %c15_i32_84 = arith.constant 15 : i32
    %274 = tpu.dynamic_rotate %34 by %c15_i32_84 dim 1 : vector<4x256xf32>, i32 -> vector<4x256xf32>
    %c18 = arith.constant 18 : index
    %c0_85 = arith.constant 0 : index
    %275 = vector.load %arg6[%c18, %c0_85] : memref<49x256xf32, #tpu.memory_space<vmem>>, vector<1x256xf32>
    %c18_86 = arith.constant 18 : index
    %276 = memref.load %arg7[%c18_86] : memref<98xf32, #tpu.memory_space<smem>>
    %277 = vector.broadcast %276 : f32 to vector<4x256xf32>
    %278 = arith.mulf %277, %273 : vector<4x256xf32>
    %c67 = arith.constant 67 : index
    %279 = memref.load %arg7[%c67] : memref<98xf32, #tpu.memory_space<smem>>
    %280 = vector.broadcast %279 : f32 to vector<4x256xf32>
    %281 = arith.mulf %280, %274 : vector<4x256xf32>
    %282 = arith.addf %278, %281 : vector<4x256xf32>
    %283 = vector.broadcast %275 : vector<1x256xf32> to vector<4x256xf32>
    %284 = arith.mulf %282, %283 : vector<4x256xf32>
    %285 = arith.addf %233, %284 : vector<4x256xf32>
    %c14_i32 = arith.constant 14 : i32
    %286 = tpu.dynamic_rotate %31 by %c14_i32 dim 1 : vector<4x256xf32>, i32 -> vector<4x256xf32>
    %c14_i32_87 = arith.constant 14 : i32
    %287 = tpu.dynamic_rotate %34 by %c14_i32_87 dim 1 : vector<4x256xf32>, i32 -> vector<4x256xf32>
    %c19 = arith.constant 19 : index
    %c0_88 = arith.constant 0 : index
    %288 = vector.load %arg6[%c19, %c0_88] : memref<49x256xf32, #tpu.memory_space<vmem>>, vector<1x256xf32>
    %c19_89 = arith.constant 19 : index
    %289 = memref.load %arg7[%c19_89] : memref<98xf32, #tpu.memory_space<smem>>
    %290 = vector.broadcast %289 : f32 to vector<4x256xf32>
    %291 = arith.mulf %290, %286 : vector<4x256xf32>
    %c68 = arith.constant 68 : index
    %292 = memref.load %arg7[%c68] : memref<98xf32, #tpu.memory_space<smem>>
    %293 = vector.broadcast %292 : f32 to vector<4x256xf32>
    %294 = arith.mulf %293, %287 : vector<4x256xf32>
    %295 = arith.addf %291, %294 : vector<4x256xf32>
    %296 = vector.broadcast %288 : vector<1x256xf32> to vector<4x256xf32>
    %297 = arith.mulf %295, %296 : vector<4x256xf32>
    %298 = arith.addf %246, %297 : vector<4x256xf32>
    %c13_i32 = arith.constant 13 : i32
    %299 = tpu.dynamic_rotate %31 by %c13_i32 dim 1 : vector<4x256xf32>, i32 -> vector<4x256xf32>
    %c13_i32_90 = arith.constant 13 : i32
    %300 = tpu.dynamic_rotate %34 by %c13_i32_90 dim 1 : vector<4x256xf32>, i32 -> vector<4x256xf32>
    %c20 = arith.constant 20 : index
    %c0_91 = arith.constant 0 : index
    %301 = vector.load %arg6[%c20, %c0_91] : memref<49x256xf32, #tpu.memory_space<vmem>>, vector<1x256xf32>
    %c20_92 = arith.constant 20 : index
    %302 = memref.load %arg7[%c20_92] : memref<98xf32, #tpu.memory_space<smem>>
    %303 = vector.broadcast %302 : f32 to vector<4x256xf32>
    %304 = arith.mulf %303, %299 : vector<4x256xf32>
    %c69 = arith.constant 69 : index
    %305 = memref.load %arg7[%c69] : memref<98xf32, #tpu.memory_space<smem>>
    %306 = vector.broadcast %305 : f32 to vector<4x256xf32>
    %307 = arith.mulf %306, %300 : vector<4x256xf32>
    %308 = arith.addf %304, %307 : vector<4x256xf32>
    %309 = vector.broadcast %301 : vector<1x256xf32> to vector<4x256xf32>
    %310 = arith.mulf %308, %309 : vector<4x256xf32>
    %311 = arith.addf %259, %310 : vector<4x256xf32>
    %c3_i32 = arith.constant 3 : i32
    %312 = tpu.dynamic_rotate %31 by %c3_i32 dim 1 : vector<4x256xf32>, i32 -> vector<4x256xf32>
    %c3_i32_93 = arith.constant 3 : i32
    %313 = tpu.dynamic_rotate %34 by %c3_i32_93 dim 1 : vector<4x256xf32>, i32 -> vector<4x256xf32>
    %c21 = arith.constant 21 : index
    %c0_94 = arith.constant 0 : index
    %314 = vector.load %arg6[%c21, %c0_94] : memref<49x256xf32, #tpu.memory_space<vmem>>, vector<1x256xf32>
    %c21_95 = arith.constant 21 : index
    %315 = memref.load %arg7[%c21_95] : memref<98xf32, #tpu.memory_space<smem>>
    %316 = vector.broadcast %315 : f32 to vector<4x256xf32>
    %317 = arith.mulf %316, %312 : vector<4x256xf32>
    %c70 = arith.constant 70 : index
    %318 = memref.load %arg7[%c70] : memref<98xf32, #tpu.memory_space<smem>>
    %319 = vector.broadcast %318 : f32 to vector<4x256xf32>
    %320 = arith.mulf %319, %313 : vector<4x256xf32>
    %321 = arith.addf %317, %320 : vector<4x256xf32>
    %322 = vector.broadcast %314 : vector<1x256xf32> to vector<4x256xf32>
    %323 = arith.mulf %321, %322 : vector<4x256xf32>
    %324 = arith.addf %272, %323 : vector<4x256xf32>
    %c2_i32 = arith.constant 2 : i32
    %325 = tpu.dynamic_rotate %31 by %c2_i32 dim 1 : vector<4x256xf32>, i32 -> vector<4x256xf32>
    %c2_i32_96 = arith.constant 2 : i32
    %326 = tpu.dynamic_rotate %34 by %c2_i32_96 dim 1 : vector<4x256xf32>, i32 -> vector<4x256xf32>
    %c22 = arith.constant 22 : index
    %c0_97 = arith.constant 0 : index
    %327 = vector.load %arg6[%c22, %c0_97] : memref<49x256xf32, #tpu.memory_space<vmem>>, vector<1x256xf32>
    %c22_98 = arith.constant 22 : index
    %328 = memref.load %arg7[%c22_98] : memref<98xf32, #tpu.memory_space<smem>>
    %329 = vector.broadcast %328 : f32 to vector<4x256xf32>
    %330 = arith.mulf %329, %325 : vector<4x256xf32>
    %c71 = arith.constant 71 : index
    %331 = memref.load %arg7[%c71] : memref<98xf32, #tpu.memory_space<smem>>
    %332 = vector.broadcast %331 : f32 to vector<4x256xf32>
    %333 = arith.mulf %332, %326 : vector<4x256xf32>
    %334 = arith.addf %330, %333 : vector<4x256xf32>
    %335 = vector.broadcast %327 : vector<1x256xf32> to vector<4x256xf32>
    %336 = arith.mulf %334, %335 : vector<4x256xf32>
    %337 = arith.addf %285, %336 : vector<4x256xf32>
    %c1_i32 = arith.constant 1 : i32
    %338 = tpu.dynamic_rotate %31 by %c1_i32 dim 1 : vector<4x256xf32>, i32 -> vector<4x256xf32>
    %c1_i32_99 = arith.constant 1 : i32
    %339 = tpu.dynamic_rotate %34 by %c1_i32_99 dim 1 : vector<4x256xf32>, i32 -> vector<4x256xf32>
    %c23 = arith.constant 23 : index
    %c0_100 = arith.constant 0 : index
    %340 = vector.load %arg6[%c23, %c0_100] : memref<49x256xf32, #tpu.memory_space<vmem>>, vector<1x256xf32>
    %c23_101 = arith.constant 23 : index
    %341 = memref.load %arg7[%c23_101] : memref<98xf32, #tpu.memory_space<smem>>
    %342 = vector.broadcast %341 : f32 to vector<4x256xf32>
    %343 = arith.mulf %342, %338 : vector<4x256xf32>
    %c72 = arith.constant 72 : index
    %344 = memref.load %arg7[%c72] : memref<98xf32, #tpu.memory_space<smem>>
    %345 = vector.broadcast %344 : f32 to vector<4x256xf32>
    %346 = arith.mulf %345, %339 : vector<4x256xf32>
    %347 = arith.addf %343, %346 : vector<4x256xf32>
    %348 = vector.broadcast %340 : vector<1x256xf32> to vector<4x256xf32>
    %349 = arith.mulf %347, %348 : vector<4x256xf32>
    %350 = arith.addf %298, %349 : vector<4x256xf32>
    %c24 = arith.constant 24 : index
    %c0_102 = arith.constant 0 : index
    %351 = vector.load %arg6[%c24, %c0_102] : memref<49x256xf32, #tpu.memory_space<vmem>>, vector<1x256xf32>
    %c24_103 = arith.constant 24 : index
    %352 = memref.load %arg7[%c24_103] : memref<98xf32, #tpu.memory_space<smem>>
    %353 = vector.broadcast %352 : f32 to vector<4x256xf32>
    %354 = arith.mulf %353, %31 : vector<4x256xf32>
    %c73 = arith.constant 73 : index
    %355 = memref.load %arg7[%c73] : memref<98xf32, #tpu.memory_space<smem>>
    %356 = vector.broadcast %355 : f32 to vector<4x256xf32>
    %357 = arith.mulf %356, %34 : vector<4x256xf32>
    %358 = arith.addf %354, %357 : vector<4x256xf32>
    %359 = vector.broadcast %351 : vector<1x256xf32> to vector<4x256xf32>
    %360 = arith.mulf %358, %359 : vector<4x256xf32>
    %361 = arith.addf %311, %360 : vector<4x256xf32>
    %c255_i32 = arith.constant 255 : i32
    %362 = tpu.dynamic_rotate %31 by %c255_i32 dim 1 : vector<4x256xf32>, i32 -> vector<4x256xf32>
    %c255_i32_104 = arith.constant 255 : i32
    %363 = tpu.dynamic_rotate %34 by %c255_i32_104 dim 1 : vector<4x256xf32>, i32 -> vector<4x256xf32>
    %c25 = arith.constant 25 : index
    %c0_105 = arith.constant 0 : index
    %364 = vector.load %arg6[%c25, %c0_105] : memref<49x256xf32, #tpu.memory_space<vmem>>, vector<1x256xf32>
    %c25_106 = arith.constant 25 : index
    %365 = memref.load %arg7[%c25_106] : memref<98xf32, #tpu.memory_space<smem>>
    %366 = vector.broadcast %365 : f32 to vector<4x256xf32>
    %367 = arith.mulf %366, %362 : vector<4x256xf32>
    %c74 = arith.constant 74 : index
    %368 = memref.load %arg7[%c74] : memref<98xf32, #tpu.memory_space<smem>>
    %369 = vector.broadcast %368 : f32 to vector<4x256xf32>
    %370 = arith.mulf %369, %363 : vector<4x256xf32>
    %371 = arith.addf %367, %370 : vector<4x256xf32>
    %372 = vector.broadcast %364 : vector<1x256xf32> to vector<4x256xf32>
    %373 = arith.mulf %371, %372 : vector<4x256xf32>
    %374 = arith.addf %324, %373 : vector<4x256xf32>
    %c254_i32 = arith.constant 254 : i32
    %375 = tpu.dynamic_rotate %31 by %c254_i32 dim 1 : vector<4x256xf32>, i32 -> vector<4x256xf32>
    %c254_i32_107 = arith.constant 254 : i32
    %376 = tpu.dynamic_rotate %34 by %c254_i32_107 dim 1 : vector<4x256xf32>, i32 -> vector<4x256xf32>
    %c26 = arith.constant 26 : index
    %c0_108 = arith.constant 0 : index
    %377 = vector.load %arg6[%c26, %c0_108] : memref<49x256xf32, #tpu.memory_space<vmem>>, vector<1x256xf32>
    %c26_109 = arith.constant 26 : index
    %378 = memref.load %arg7[%c26_109] : memref<98xf32, #tpu.memory_space<smem>>
    %379 = vector.broadcast %378 : f32 to vector<4x256xf32>
    %380 = arith.mulf %379, %375 : vector<4x256xf32>
    %c75 = arith.constant 75 : index
    %381 = memref.load %arg7[%c75] : memref<98xf32, #tpu.memory_space<smem>>
    %382 = vector.broadcast %381 : f32 to vector<4x256xf32>
    %383 = arith.mulf %382, %376 : vector<4x256xf32>
    %384 = arith.addf %380, %383 : vector<4x256xf32>
    %385 = vector.broadcast %377 : vector<1x256xf32> to vector<4x256xf32>
    %386 = arith.mulf %384, %385 : vector<4x256xf32>
    %387 = arith.addf %337, %386 : vector<4x256xf32>
    %c253_i32 = arith.constant 253 : i32
    %388 = tpu.dynamic_rotate %31 by %c253_i32 dim 1 : vector<4x256xf32>, i32 -> vector<4x256xf32>
    %c253_i32_110 = arith.constant 253 : i32
    %389 = tpu.dynamic_rotate %34 by %c253_i32_110 dim 1 : vector<4x256xf32>, i32 -> vector<4x256xf32>
    %c27 = arith.constant 27 : index
    %c0_111 = arith.constant 0 : index
    %390 = vector.load %arg6[%c27, %c0_111] : memref<49x256xf32, #tpu.memory_space<vmem>>, vector<1x256xf32>
    %c27_112 = arith.constant 27 : index
    %391 = memref.load %arg7[%c27_112] : memref<98xf32, #tpu.memory_space<smem>>
    %392 = vector.broadcast %391 : f32 to vector<4x256xf32>
    %393 = arith.mulf %392, %388 : vector<4x256xf32>
    %c76 = arith.constant 76 : index
    %394 = memref.load %arg7[%c76] : memref<98xf32, #tpu.memory_space<smem>>
    %395 = vector.broadcast %394 : f32 to vector<4x256xf32>
    %396 = arith.mulf %395, %389 : vector<4x256xf32>
    %397 = arith.addf %393, %396 : vector<4x256xf32>
    %398 = vector.broadcast %390 : vector<1x256xf32> to vector<4x256xf32>
    %399 = arith.mulf %397, %398 : vector<4x256xf32>
    %400 = arith.addf %350, %399 : vector<4x256xf32>
    %c243_i32 = arith.constant 243 : i32
    %401 = tpu.dynamic_rotate %31 by %c243_i32 dim 1 : vector<4x256xf32>, i32 -> vector<4x256xf32>
    %c243_i32_113 = arith.constant 243 : i32
    %402 = tpu.dynamic_rotate %34 by %c243_i32_113 dim 1 : vector<4x256xf32>, i32 -> vector<4x256xf32>
    %c28 = arith.constant 28 : index
    %c0_114 = arith.constant 0 : index
    %403 = vector.load %arg6[%c28, %c0_114] : memref<49x256xf32, #tpu.memory_space<vmem>>, vector<1x256xf32>
    %c28_115 = arith.constant 28 : index
    %404 = memref.load %arg7[%c28_115] : memref<98xf32, #tpu.memory_space<smem>>
    %405 = vector.broadcast %404 : f32 to vector<4x256xf32>
    %406 = arith.mulf %405, %401 : vector<4x256xf32>
    %c77 = arith.constant 77 : index
    %407 = memref.load %arg7[%c77] : memref<98xf32, #tpu.memory_space<smem>>
    %408 = vector.broadcast %407 : f32 to vector<4x256xf32>
    %409 = arith.mulf %408, %402 : vector<4x256xf32>
    %410 = arith.addf %406, %409 : vector<4x256xf32>
    %411 = vector.broadcast %403 : vector<1x256xf32> to vector<4x256xf32>
    %412 = arith.mulf %410, %411 : vector<4x256xf32>
    %413 = arith.addf %361, %412 : vector<4x256xf32>
    %c242_i32 = arith.constant 242 : i32
    %414 = tpu.dynamic_rotate %31 by %c242_i32 dim 1 : vector<4x256xf32>, i32 -> vector<4x256xf32>
    %c242_i32_116 = arith.constant 242 : i32
    %415 = tpu.dynamic_rotate %34 by %c242_i32_116 dim 1 : vector<4x256xf32>, i32 -> vector<4x256xf32>
    %c29 = arith.constant 29 : index
    %c0_117 = arith.constant 0 : index
    %416 = vector.load %arg6[%c29, %c0_117] : memref<49x256xf32, #tpu.memory_space<vmem>>, vector<1x256xf32>
    %c29_118 = arith.constant 29 : index
    %417 = memref.load %arg7[%c29_118] : memref<98xf32, #tpu.memory_space<smem>>
    %418 = vector.broadcast %417 : f32 to vector<4x256xf32>
    %419 = arith.mulf %418, %414 : vector<4x256xf32>
    %c78 = arith.constant 78 : index
    %420 = memref.load %arg7[%c78] : memref<98xf32, #tpu.memory_space<smem>>
    %421 = vector.broadcast %420 : f32 to vector<4x256xf32>
    %422 = arith.mulf %421, %415 : vector<4x256xf32>
    %423 = arith.addf %419, %422 : vector<4x256xf32>
    %424 = vector.broadcast %416 : vector<1x256xf32> to vector<4x256xf32>
    %425 = arith.mulf %423, %424 : vector<4x256xf32>
    %426 = arith.addf %374, %425 : vector<4x256xf32>
    %c241_i32 = arith.constant 241 : i32
    %427 = tpu.dynamic_rotate %31 by %c241_i32 dim 1 : vector<4x256xf32>, i32 -> vector<4x256xf32>
    %c241_i32_119 = arith.constant 241 : i32
    %428 = tpu.dynamic_rotate %34 by %c241_i32_119 dim 1 : vector<4x256xf32>, i32 -> vector<4x256xf32>
    %c30 = arith.constant 30 : index
    %c0_120 = arith.constant 0 : index
    %429 = vector.load %arg6[%c30, %c0_120] : memref<49x256xf32, #tpu.memory_space<vmem>>, vector<1x256xf32>
    %c30_121 = arith.constant 30 : index
    %430 = memref.load %arg7[%c30_121] : memref<98xf32, #tpu.memory_space<smem>>
    %431 = vector.broadcast %430 : f32 to vector<4x256xf32>
    %432 = arith.mulf %431, %427 : vector<4x256xf32>
    %c79 = arith.constant 79 : index
    %433 = memref.load %arg7[%c79] : memref<98xf32, #tpu.memory_space<smem>>
    %434 = vector.broadcast %433 : f32 to vector<4x256xf32>
    %435 = arith.mulf %434, %428 : vector<4x256xf32>
    %436 = arith.addf %432, %435 : vector<4x256xf32>
    %437 = vector.broadcast %429 : vector<1x256xf32> to vector<4x256xf32>
    %438 = arith.mulf %436, %437 : vector<4x256xf32>
    %439 = arith.addf %387, %438 : vector<4x256xf32>
    %c240_i32 = arith.constant 240 : i32
    %440 = tpu.dynamic_rotate %31 by %c240_i32 dim 1 : vector<4x256xf32>, i32 -> vector<4x256xf32>
    %c240_i32_122 = arith.constant 240 : i32
    %441 = tpu.dynamic_rotate %34 by %c240_i32_122 dim 1 : vector<4x256xf32>, i32 -> vector<4x256xf32>
    %c31 = arith.constant 31 : index
    %c0_123 = arith.constant 0 : index
    %442 = vector.load %arg6[%c31, %c0_123] : memref<49x256xf32, #tpu.memory_space<vmem>>, vector<1x256xf32>
    %c31_124 = arith.constant 31 : index
    %443 = memref.load %arg7[%c31_124] : memref<98xf32, #tpu.memory_space<smem>>
    %444 = vector.broadcast %443 : f32 to vector<4x256xf32>
    %445 = arith.mulf %444, %440 : vector<4x256xf32>
    %c80 = arith.constant 80 : index
    %446 = memref.load %arg7[%c80] : memref<98xf32, #tpu.memory_space<smem>>
    %447 = vector.broadcast %446 : f32 to vector<4x256xf32>
    %448 = arith.mulf %447, %441 : vector<4x256xf32>
    %449 = arith.addf %445, %448 : vector<4x256xf32>
    %450 = vector.broadcast %442 : vector<1x256xf32> to vector<4x256xf32>
    %451 = arith.mulf %449, %450 : vector<4x256xf32>
    %452 = arith.addf %400, %451 : vector<4x256xf32>
    %c239_i32 = arith.constant 239 : i32
    %453 = tpu.dynamic_rotate %31 by %c239_i32 dim 1 : vector<4x256xf32>, i32 -> vector<4x256xf32>
    %c239_i32_125 = arith.constant 239 : i32
    %454 = tpu.dynamic_rotate %34 by %c239_i32_125 dim 1 : vector<4x256xf32>, i32 -> vector<4x256xf32>
    %c32 = arith.constant 32 : index
    %c0_126 = arith.constant 0 : index
    %455 = vector.load %arg6[%c32, %c0_126] : memref<49x256xf32, #tpu.memory_space<vmem>>, vector<1x256xf32>
    %c32_127 = arith.constant 32 : index
    %456 = memref.load %arg7[%c32_127] : memref<98xf32, #tpu.memory_space<smem>>
    %457 = vector.broadcast %456 : f32 to vector<4x256xf32>
    %458 = arith.mulf %457, %453 : vector<4x256xf32>
    %c81 = arith.constant 81 : index
    %459 = memref.load %arg7[%c81] : memref<98xf32, #tpu.memory_space<smem>>
    %460 = vector.broadcast %459 : f32 to vector<4x256xf32>
    %461 = arith.mulf %460, %454 : vector<4x256xf32>
    %462 = arith.addf %458, %461 : vector<4x256xf32>
    %463 = vector.broadcast %455 : vector<1x256xf32> to vector<4x256xf32>
    %464 = arith.mulf %462, %463 : vector<4x256xf32>
    %465 = arith.addf %413, %464 : vector<4x256xf32>
    %c238_i32 = arith.constant 238 : i32
    %466 = tpu.dynamic_rotate %31 by %c238_i32 dim 1 : vector<4x256xf32>, i32 -> vector<4x256xf32>
    %c238_i32_128 = arith.constant 238 : i32
    %467 = tpu.dynamic_rotate %34 by %c238_i32_128 dim 1 : vector<4x256xf32>, i32 -> vector<4x256xf32>
    %c33 = arith.constant 33 : index
    %c0_129 = arith.constant 0 : index
    %468 = vector.load %arg6[%c33, %c0_129] : memref<49x256xf32, #tpu.memory_space<vmem>>, vector<1x256xf32>
    %c33_130 = arith.constant 33 : index
    %469 = memref.load %arg7[%c33_130] : memref<98xf32, #tpu.memory_space<smem>>
    %470 = vector.broadcast %469 : f32 to vector<4x256xf32>
    %471 = arith.mulf %470, %466 : vector<4x256xf32>
    %c82 = arith.constant 82 : index
    %472 = memref.load %arg7[%c82] : memref<98xf32, #tpu.memory_space<smem>>
    %473 = vector.broadcast %472 : f32 to vector<4x256xf32>
    %474 = arith.mulf %473, %467 : vector<4x256xf32>
    %475 = arith.addf %471, %474 : vector<4x256xf32>
    %476 = vector.broadcast %468 : vector<1x256xf32> to vector<4x256xf32>
    %477 = arith.mulf %475, %476 : vector<4x256xf32>
    %478 = arith.addf %426, %477 : vector<4x256xf32>
    %c237_i32 = arith.constant 237 : i32
    %479 = tpu.dynamic_rotate %31 by %c237_i32 dim 1 : vector<4x256xf32>, i32 -> vector<4x256xf32>
    %c237_i32_131 = arith.constant 237 : i32
    %480 = tpu.dynamic_rotate %34 by %c237_i32_131 dim 1 : vector<4x256xf32>, i32 -> vector<4x256xf32>
    %c34 = arith.constant 34 : index
    %c0_132 = arith.constant 0 : index
    %481 = vector.load %arg6[%c34, %c0_132] : memref<49x256xf32, #tpu.memory_space<vmem>>, vector<1x256xf32>
    %c34_133 = arith.constant 34 : index
    %482 = memref.load %arg7[%c34_133] : memref<98xf32, #tpu.memory_space<smem>>
    %483 = vector.broadcast %482 : f32 to vector<4x256xf32>
    %484 = arith.mulf %483, %479 : vector<4x256xf32>
    %c83 = arith.constant 83 : index
    %485 = memref.load %arg7[%c83] : memref<98xf32, #tpu.memory_space<smem>>
    %486 = vector.broadcast %485 : f32 to vector<4x256xf32>
    %487 = arith.mulf %486, %480 : vector<4x256xf32>
    %488 = arith.addf %484, %487 : vector<4x256xf32>
    %489 = vector.broadcast %481 : vector<1x256xf32> to vector<4x256xf32>
    %490 = arith.mulf %488, %489 : vector<4x256xf32>
    %491 = arith.addf %439, %490 : vector<4x256xf32>
    %c227_i32 = arith.constant 227 : i32
    %492 = tpu.dynamic_rotate %31 by %c227_i32 dim 1 : vector<4x256xf32>, i32 -> vector<4x256xf32>
    %c227_i32_134 = arith.constant 227 : i32
    %493 = tpu.dynamic_rotate %34 by %c227_i32_134 dim 1 : vector<4x256xf32>, i32 -> vector<4x256xf32>
    %c35 = arith.constant 35 : index
    %c0_135 = arith.constant 0 : index
    %494 = vector.load %arg6[%c35, %c0_135] : memref<49x256xf32, #tpu.memory_space<vmem>>, vector<1x256xf32>
    %c35_136 = arith.constant 35 : index
    %495 = memref.load %arg7[%c35_136] : memref<98xf32, #tpu.memory_space<smem>>
    %496 = vector.broadcast %495 : f32 to vector<4x256xf32>
    %497 = arith.mulf %496, %492 : vector<4x256xf32>
    %c84 = arith.constant 84 : index
    %498 = memref.load %arg7[%c84] : memref<98xf32, #tpu.memory_space<smem>>
    %499 = vector.broadcast %498 : f32 to vector<4x256xf32>
    %500 = arith.mulf %499, %493 : vector<4x256xf32>
    %501 = arith.addf %497, %500 : vector<4x256xf32>
    %502 = vector.broadcast %494 : vector<1x256xf32> to vector<4x256xf32>
    %503 = arith.mulf %501, %502 : vector<4x256xf32>
    %504 = arith.addf %452, %503 : vector<4x256xf32>
    %c226_i32 = arith.constant 226 : i32
    %505 = tpu.dynamic_rotate %31 by %c226_i32 dim 1 : vector<4x256xf32>, i32 -> vector<4x256xf32>
    %c226_i32_137 = arith.constant 226 : i32
    %506 = tpu.dynamic_rotate %34 by %c226_i32_137 dim 1 : vector<4x256xf32>, i32 -> vector<4x256xf32>
    %c36 = arith.constant 36 : index
    %c0_138 = arith.constant 0 : index
    %507 = vector.load %arg6[%c36, %c0_138] : memref<49x256xf32, #tpu.memory_space<vmem>>, vector<1x256xf32>
    %c36_139 = arith.constant 36 : index
    %508 = memref.load %arg7[%c36_139] : memref<98xf32, #tpu.memory_space<smem>>
    %509 = vector.broadcast %508 : f32 to vector<4x256xf32>
    %510 = arith.mulf %509, %505 : vector<4x256xf32>
    %c85 = arith.constant 85 : index
    %511 = memref.load %arg7[%c85] : memref<98xf32, #tpu.memory_space<smem>>
    %512 = vector.broadcast %511 : f32 to vector<4x256xf32>
    %513 = arith.mulf %512, %506 : vector<4x256xf32>
    %514 = arith.addf %510, %513 : vector<4x256xf32>
    %515 = vector.broadcast %507 : vector<1x256xf32> to vector<4x256xf32>
    %516 = arith.mulf %514, %515 : vector<4x256xf32>
    %517 = arith.addf %465, %516 : vector<4x256xf32>
    %c225_i32 = arith.constant 225 : i32
    %518 = tpu.dynamic_rotate %31 by %c225_i32 dim 1 : vector<4x256xf32>, i32 -> vector<4x256xf32>
    %c225_i32_140 = arith.constant 225 : i32
    %519 = tpu.dynamic_rotate %34 by %c225_i32_140 dim 1 : vector<4x256xf32>, i32 -> vector<4x256xf32>
    %c37 = arith.constant 37 : index
    %c0_141 = arith.constant 0 : index
    %520 = vector.load %arg6[%c37, %c0_141] : memref<49x256xf32, #tpu.memory_space<vmem>>, vector<1x256xf32>
    %c37_142 = arith.constant 37 : index
    %521 = memref.load %arg7[%c37_142] : memref<98xf32, #tpu.memory_space<smem>>
    %522 = vector.broadcast %521 : f32 to vector<4x256xf32>
    %523 = arith.mulf %522, %518 : vector<4x256xf32>
    %c86 = arith.constant 86 : index
    %524 = memref.load %arg7[%c86] : memref<98xf32, #tpu.memory_space<smem>>
    %525 = vector.broadcast %524 : f32 to vector<4x256xf32>
    %526 = arith.mulf %525, %519 : vector<4x256xf32>
    %527 = arith.addf %523, %526 : vector<4x256xf32>
    %528 = vector.broadcast %520 : vector<1x256xf32> to vector<4x256xf32>
    %529 = arith.mulf %527, %528 : vector<4x256xf32>
    %530 = arith.addf %478, %529 : vector<4x256xf32>
    %c224_i32 = arith.constant 224 : i32
    %531 = tpu.dynamic_rotate %31 by %c224_i32 dim 1 : vector<4x256xf32>, i32 -> vector<4x256xf32>
    %c224_i32_143 = arith.constant 224 : i32
    %532 = tpu.dynamic_rotate %34 by %c224_i32_143 dim 1 : vector<4x256xf32>, i32 -> vector<4x256xf32>
    %c38 = arith.constant 38 : index
    %c0_144 = arith.constant 0 : index
    %533 = vector.load %arg6[%c38, %c0_144] : memref<49x256xf32, #tpu.memory_space<vmem>>, vector<1x256xf32>
    %c38_145 = arith.constant 38 : index
    %534 = memref.load %arg7[%c38_145] : memref<98xf32, #tpu.memory_space<smem>>
    %535 = vector.broadcast %534 : f32 to vector<4x256xf32>
    %536 = arith.mulf %535, %531 : vector<4x256xf32>
    %c87 = arith.constant 87 : index
    %537 = memref.load %arg7[%c87] : memref<98xf32, #tpu.memory_space<smem>>
    %538 = vector.broadcast %537 : f32 to vector<4x256xf32>
    %539 = arith.mulf %538, %532 : vector<4x256xf32>
    %540 = arith.addf %536, %539 : vector<4x256xf32>
    %541 = vector.broadcast %533 : vector<1x256xf32> to vector<4x256xf32>
    %542 = arith.mulf %540, %541 : vector<4x256xf32>
    %543 = arith.addf %491, %542 : vector<4x256xf32>
    %c223_i32 = arith.constant 223 : i32
    %544 = tpu.dynamic_rotate %31 by %c223_i32 dim 1 : vector<4x256xf32>, i32 -> vector<4x256xf32>
    %c223_i32_146 = arith.constant 223 : i32
    %545 = tpu.dynamic_rotate %34 by %c223_i32_146 dim 1 : vector<4x256xf32>, i32 -> vector<4x256xf32>
    %c39 = arith.constant 39 : index
    %c0_147 = arith.constant 0 : index
    %546 = vector.load %arg6[%c39, %c0_147] : memref<49x256xf32, #tpu.memory_space<vmem>>, vector<1x256xf32>
    %c39_148 = arith.constant 39 : index
    %547 = memref.load %arg7[%c39_148] : memref<98xf32, #tpu.memory_space<smem>>
    %548 = vector.broadcast %547 : f32 to vector<4x256xf32>
    %549 = arith.mulf %548, %544 : vector<4x256xf32>
    %c88 = arith.constant 88 : index
    %550 = memref.load %arg7[%c88] : memref<98xf32, #tpu.memory_space<smem>>
    %551 = vector.broadcast %550 : f32 to vector<4x256xf32>
    %552 = arith.mulf %551, %545 : vector<4x256xf32>
    %553 = arith.addf %549, %552 : vector<4x256xf32>
    %554 = vector.broadcast %546 : vector<1x256xf32> to vector<4x256xf32>
    %555 = arith.mulf %553, %554 : vector<4x256xf32>
    %556 = arith.addf %504, %555 : vector<4x256xf32>
    %c222_i32 = arith.constant 222 : i32
    %557 = tpu.dynamic_rotate %31 by %c222_i32 dim 1 : vector<4x256xf32>, i32 -> vector<4x256xf32>
    %c222_i32_149 = arith.constant 222 : i32
    %558 = tpu.dynamic_rotate %34 by %c222_i32_149 dim 1 : vector<4x256xf32>, i32 -> vector<4x256xf32>
    %c40 = arith.constant 40 : index
    %c0_150 = arith.constant 0 : index
    %559 = vector.load %arg6[%c40, %c0_150] : memref<49x256xf32, #tpu.memory_space<vmem>>, vector<1x256xf32>
    %c40_151 = arith.constant 40 : index
    %560 = memref.load %arg7[%c40_151] : memref<98xf32, #tpu.memory_space<smem>>
    %561 = vector.broadcast %560 : f32 to vector<4x256xf32>
    %562 = arith.mulf %561, %557 : vector<4x256xf32>
    %c89 = arith.constant 89 : index
    %563 = memref.load %arg7[%c89] : memref<98xf32, #tpu.memory_space<smem>>
    %564 = vector.broadcast %563 : f32 to vector<4x256xf32>
    %565 = arith.mulf %564, %558 : vector<4x256xf32>
    %566 = arith.addf %562, %565 : vector<4x256xf32>
    %567 = vector.broadcast %559 : vector<1x256xf32> to vector<4x256xf32>
    %568 = arith.mulf %566, %567 : vector<4x256xf32>
    %569 = arith.addf %517, %568 : vector<4x256xf32>
    %c221_i32 = arith.constant 221 : i32
    %570 = tpu.dynamic_rotate %31 by %c221_i32 dim 1 : vector<4x256xf32>, i32 -> vector<4x256xf32>
    %c221_i32_152 = arith.constant 221 : i32
    %571 = tpu.dynamic_rotate %34 by %c221_i32_152 dim 1 : vector<4x256xf32>, i32 -> vector<4x256xf32>
    %c41 = arith.constant 41 : index
    %c0_153 = arith.constant 0 : index
    %572 = vector.load %arg6[%c41, %c0_153] : memref<49x256xf32, #tpu.memory_space<vmem>>, vector<1x256xf32>
    %c41_154 = arith.constant 41 : index
    %573 = memref.load %arg7[%c41_154] : memref<98xf32, #tpu.memory_space<smem>>
    %574 = vector.broadcast %573 : f32 to vector<4x256xf32>
    %575 = arith.mulf %574, %570 : vector<4x256xf32>
    %c90 = arith.constant 90 : index
    %576 = memref.load %arg7[%c90] : memref<98xf32, #tpu.memory_space<smem>>
    %577 = vector.broadcast %576 : f32 to vector<4x256xf32>
    %578 = arith.mulf %577, %571 : vector<4x256xf32>
    %579 = arith.addf %575, %578 : vector<4x256xf32>
    %580 = vector.broadcast %572 : vector<1x256xf32> to vector<4x256xf32>
    %581 = arith.mulf %579, %580 : vector<4x256xf32>
    %582 = arith.addf %530, %581 : vector<4x256xf32>
    %c211_i32 = arith.constant 211 : i32
    %583 = tpu.dynamic_rotate %31 by %c211_i32 dim 1 : vector<4x256xf32>, i32 -> vector<4x256xf32>
    %c211_i32_155 = arith.constant 211 : i32
    %584 = tpu.dynamic_rotate %34 by %c211_i32_155 dim 1 : vector<4x256xf32>, i32 -> vector<4x256xf32>
    %c42 = arith.constant 42 : index
    %c0_156 = arith.constant 0 : index
    %585 = vector.load %arg6[%c42, %c0_156] : memref<49x256xf32, #tpu.memory_space<vmem>>, vector<1x256xf32>
    %c42_157 = arith.constant 42 : index
    %586 = memref.load %arg7[%c42_157] : memref<98xf32, #tpu.memory_space<smem>>
    %587 = vector.broadcast %586 : f32 to vector<4x256xf32>
    %588 = arith.mulf %587, %583 : vector<4x256xf32>
    %c91 = arith.constant 91 : index
    %589 = memref.load %arg7[%c91] : memref<98xf32, #tpu.memory_space<smem>>
    %590 = vector.broadcast %589 : f32 to vector<4x256xf32>
    %591 = arith.mulf %590, %584 : vector<4x256xf32>
    %592 = arith.addf %588, %591 : vector<4x256xf32>
    %593 = vector.broadcast %585 : vector<1x256xf32> to vector<4x256xf32>
    %594 = arith.mulf %592, %593 : vector<4x256xf32>
    %595 = arith.addf %543, %594 : vector<4x256xf32>
    %c210_i32 = arith.constant 210 : i32
    %596 = tpu.dynamic_rotate %31 by %c210_i32 dim 1 : vector<4x256xf32>, i32 -> vector<4x256xf32>
    %c210_i32_158 = arith.constant 210 : i32
    %597 = tpu.dynamic_rotate %34 by %c210_i32_158 dim 1 : vector<4x256xf32>, i32 -> vector<4x256xf32>
    %c43 = arith.constant 43 : index
    %c0_159 = arith.constant 0 : index
    %598 = vector.load %arg6[%c43, %c0_159] : memref<49x256xf32, #tpu.memory_space<vmem>>, vector<1x256xf32>
    %c43_160 = arith.constant 43 : index
    %599 = memref.load %arg7[%c43_160] : memref<98xf32, #tpu.memory_space<smem>>
    %600 = vector.broadcast %599 : f32 to vector<4x256xf32>
    %601 = arith.mulf %600, %596 : vector<4x256xf32>
    %c92 = arith.constant 92 : index
    %602 = memref.load %arg7[%c92] : memref<98xf32, #tpu.memory_space<smem>>
    %603 = vector.broadcast %602 : f32 to vector<4x256xf32>
    %604 = arith.mulf %603, %597 : vector<4x256xf32>
    %605 = arith.addf %601, %604 : vector<4x256xf32>
    %606 = vector.broadcast %598 : vector<1x256xf32> to vector<4x256xf32>
    %607 = arith.mulf %605, %606 : vector<4x256xf32>
    %608 = arith.addf %556, %607 : vector<4x256xf32>
    %c209_i32 = arith.constant 209 : i32
    %609 = tpu.dynamic_rotate %31 by %c209_i32 dim 1 : vector<4x256xf32>, i32 -> vector<4x256xf32>
    %c209_i32_161 = arith.constant 209 : i32
    %610 = tpu.dynamic_rotate %34 by %c209_i32_161 dim 1 : vector<4x256xf32>, i32 -> vector<4x256xf32>
    %c44 = arith.constant 44 : index
    %c0_162 = arith.constant 0 : index
    %611 = vector.load %arg6[%c44, %c0_162] : memref<49x256xf32, #tpu.memory_space<vmem>>, vector<1x256xf32>
    %c44_163 = arith.constant 44 : index
    %612 = memref.load %arg7[%c44_163] : memref<98xf32, #tpu.memory_space<smem>>
    %613 = vector.broadcast %612 : f32 to vector<4x256xf32>
    %614 = arith.mulf %613, %609 : vector<4x256xf32>
    %c93 = arith.constant 93 : index
    %615 = memref.load %arg7[%c93] : memref<98xf32, #tpu.memory_space<smem>>
    %616 = vector.broadcast %615 : f32 to vector<4x256xf32>
    %617 = arith.mulf %616, %610 : vector<4x256xf32>
    %618 = arith.addf %614, %617 : vector<4x256xf32>
    %619 = vector.broadcast %611 : vector<1x256xf32> to vector<4x256xf32>
    %620 = arith.mulf %618, %619 : vector<4x256xf32>
    %621 = arith.addf %569, %620 : vector<4x256xf32>
    %c208_i32 = arith.constant 208 : i32
    %622 = tpu.dynamic_rotate %31 by %c208_i32 dim 1 : vector<4x256xf32>, i32 -> vector<4x256xf32>
    %c208_i32_164 = arith.constant 208 : i32
    %623 = tpu.dynamic_rotate %34 by %c208_i32_164 dim 1 : vector<4x256xf32>, i32 -> vector<4x256xf32>
    %c45 = arith.constant 45 : index
    %c0_165 = arith.constant 0 : index
    %624 = vector.load %arg6[%c45, %c0_165] : memref<49x256xf32, #tpu.memory_space<vmem>>, vector<1x256xf32>
    %c45_166 = arith.constant 45 : index
    %625 = memref.load %arg7[%c45_166] : memref<98xf32, #tpu.memory_space<smem>>
    %626 = vector.broadcast %625 : f32 to vector<4x256xf32>
    %627 = arith.mulf %626, %622 : vector<4x256xf32>
    %c94 = arith.constant 94 : index
    %628 = memref.load %arg7[%c94] : memref<98xf32, #tpu.memory_space<smem>>
    %629 = vector.broadcast %628 : f32 to vector<4x256xf32>
    %630 = arith.mulf %629, %623 : vector<4x256xf32>
    %631 = arith.addf %627, %630 : vector<4x256xf32>
    %632 = vector.broadcast %624 : vector<1x256xf32> to vector<4x256xf32>
    %633 = arith.mulf %631, %632 : vector<4x256xf32>
    %634 = arith.addf %582, %633 : vector<4x256xf32>
    %c207_i32 = arith.constant 207 : i32
    %635 = tpu.dynamic_rotate %31 by %c207_i32 dim 1 : vector<4x256xf32>, i32 -> vector<4x256xf32>
    %c207_i32_167 = arith.constant 207 : i32
    %636 = tpu.dynamic_rotate %34 by %c207_i32_167 dim 1 : vector<4x256xf32>, i32 -> vector<4x256xf32>
    %c46 = arith.constant 46 : index
    %c0_168 = arith.constant 0 : index
    %637 = vector.load %arg6[%c46, %c0_168] : memref<49x256xf32, #tpu.memory_space<vmem>>, vector<1x256xf32>
    %c46_169 = arith.constant 46 : index
    %638 = memref.load %arg7[%c46_169] : memref<98xf32, #tpu.memory_space<smem>>
    %639 = vector.broadcast %638 : f32 to vector<4x256xf32>
    %640 = arith.mulf %639, %635 : vector<4x256xf32>
    %c95 = arith.constant 95 : index
    %641 = memref.load %arg7[%c95] : memref<98xf32, #tpu.memory_space<smem>>
    %642 = vector.broadcast %641 : f32 to vector<4x256xf32>
    %643 = arith.mulf %642, %636 : vector<4x256xf32>
    %644 = arith.addf %640, %643 : vector<4x256xf32>
    %645 = vector.broadcast %637 : vector<1x256xf32> to vector<4x256xf32>
    %646 = arith.mulf %644, %645 : vector<4x256xf32>
    %647 = arith.addf %595, %646 : vector<4x256xf32>
    %c206_i32 = arith.constant 206 : i32
    %648 = tpu.dynamic_rotate %31 by %c206_i32 dim 1 : vector<4x256xf32>, i32 -> vector<4x256xf32>
    %c206_i32_170 = arith.constant 206 : i32
    %649 = tpu.dynamic_rotate %34 by %c206_i32_170 dim 1 : vector<4x256xf32>, i32 -> vector<4x256xf32>
    %c47 = arith.constant 47 : index
    %c0_171 = arith.constant 0 : index
    %650 = vector.load %arg6[%c47, %c0_171] : memref<49x256xf32, #tpu.memory_space<vmem>>, vector<1x256xf32>
    %c47_172 = arith.constant 47 : index
    %651 = memref.load %arg7[%c47_172] : memref<98xf32, #tpu.memory_space<smem>>
    %652 = vector.broadcast %651 : f32 to vector<4x256xf32>
    %653 = arith.mulf %652, %648 : vector<4x256xf32>
    %c96 = arith.constant 96 : index
    %654 = memref.load %arg7[%c96] : memref<98xf32, #tpu.memory_space<smem>>
    %655 = vector.broadcast %654 : f32 to vector<4x256xf32>
    %656 = arith.mulf %655, %649 : vector<4x256xf32>
    %657 = arith.addf %653, %656 : vector<4x256xf32>
    %658 = vector.broadcast %650 : vector<1x256xf32> to vector<4x256xf32>
    %659 = arith.mulf %657, %658 : vector<4x256xf32>
    %660 = arith.addf %608, %659 : vector<4x256xf32>
    %c205_i32 = arith.constant 205 : i32
    %661 = tpu.dynamic_rotate %31 by %c205_i32 dim 1 : vector<4x256xf32>, i32 -> vector<4x256xf32>
    %c205_i32_173 = arith.constant 205 : i32
    %662 = tpu.dynamic_rotate %34 by %c205_i32_173 dim 1 : vector<4x256xf32>, i32 -> vector<4x256xf32>
    %c48 = arith.constant 48 : index
    %c0_174 = arith.constant 0 : index
    %663 = vector.load %arg6[%c48, %c0_174] : memref<49x256xf32, #tpu.memory_space<vmem>>, vector<1x256xf32>
    %c48_175 = arith.constant 48 : index
    %664 = memref.load %arg7[%c48_175] : memref<98xf32, #tpu.memory_space<smem>>
    %665 = vector.broadcast %664 : f32 to vector<4x256xf32>
    %666 = arith.mulf %665, %661 : vector<4x256xf32>
    %c97 = arith.constant 97 : index
    %667 = memref.load %arg7[%c97] : memref<98xf32, #tpu.memory_space<smem>>
    %668 = vector.broadcast %667 : f32 to vector<4x256xf32>
    %669 = arith.mulf %668, %662 : vector<4x256xf32>
    %670 = arith.addf %666, %669 : vector<4x256xf32>
    %671 = vector.broadcast %663 : vector<1x256xf32> to vector<4x256xf32>
    %672 = arith.mulf %670, %671 : vector<4x256xf32>
    %673 = arith.addf %621, %672 : vector<4x256xf32>
    %674 = arith.addf %673, %634 : vector<4x256xf32>
    %675 = arith.addf %647, %660 : vector<4x256xf32>
    %676 = arith.addf %674, %675 : vector<4x256xf32>
    %c0_176 = arith.constant 0 : index
    %677 = memref.load %arg8[%c0_176] : memref<2xf32, #tpu.memory_space<smem>>
    %678 = vector.broadcast %677 : f32 to vector<4x256xf32>
    %679 = arith.mulf %676, %678 : vector<4x256xf32>
    %c1_177 = arith.constant 1 : index
    %680 = memref.load %arg8[%c1_177] : memref<2xf32, #tpu.memory_space<smem>>
    %681 = vector.broadcast %680 : f32 to vector<4x256xf32>
    %682 = arith.addf %679, %681 : vector<4x256xf32>
    %683 = arith.negf %682 : vector<4x256xf32>
    %684 = math.exp %683 : vector<4x256xf32>
    %cst_178 = arith.constant 1.000000e+00 : f32
    %685 = vector.broadcast %cst_178 : f32 to vector<4x256xf32>
    %686 = arith.addf %685, %684 : vector<4x256xf32>
    %687 = arith.divf %685, %686 : vector<4x256xf32>
    %688 = vector.shape_cast %687 : vector<4x256xf32> to vector<4x1x256xf32>
    %c0_179 = arith.constant 0 : index
    %c0_180 = arith.constant 0 : index
    %c0_181 = arith.constant 0 : index
    %689 = vector.load %arg10[%c0_179, %c0_180, %c0_181] : memref<4x32x256xf32, #tpu.memory_space<vmem>>, vector<4x32x256xf32>
    %690 = vector.broadcast %688 : vector<4x1x256xf32> to vector<4x32x256xf32>
    %691 = arith.mulf %689, %690 : vector<4x32x256xf32>
    %c0_182 = arith.constant 0 : index
    %c0_183 = arith.constant 0 : index
    %c0_184 = arith.constant 0 : index
    %692 = vector.load %arg9[%c0_182, %c0_183, %c0_184] : memref<4x32x256xf32, #tpu.memory_space<vmem>>, vector<4x32x256xf32>
    tpu.vector_store %arg9[%c0_182, %c0_183, %c0_184], %691 {strides = array<i32>} : memref<4x32x256xf32, #tpu.memory_space<vmem>>, vector<4x32x256xf32>,
    return
  }
  func.func @transform_0(%arg0: i32) -> (i32, i32, i32) {
    %c0_i32 = arith.constant 0 : i32
    %c0_i32_0 = arith.constant 0 : i32
    %c0_i32_1 = arith.constant 0 : i32
    return %arg0, %c0_i32, %c0_i32_0 : i32, i32, i32
  }
  func.func @transform_1(%arg0: i32) -> (i32, i32) {
    %c0_i32 = arith.constant 0 : i32
    %c0_i32_0 = arith.constant 0 : i32
    %c0_i32_1 = arith.constant 0 : i32
    return %c0_i32, %c0_i32_0 : i32, i32
  }
  func.func @transform_2(%arg0: i32) -> (i32, i32) {
    %c0_i32 = arith.constant 0 : i32
    %c0_i32_0 = arith.constant 0 : i32
    %c0_i32_1 = arith.constant 0 : i32
    return %c0_i32, %c0_i32_0 : i32, i32
  }
  func.func @transform_3(%arg0: i32) -> (i32, i32) {
    %c0_i32 = arith.constant 0 : i32
    %c0_i32_0 = arith.constant 0 : i32
    %c0_i32_1 = arith.constant 0 : i32
    return %c0_i32, %c0_i32_0 : i32, i32
  }
  func.func @transform_4(%arg0: i32) -> (i32, i32) {
    %c0_i32 = arith.constant 0 : i32
    %c0_i32_0 = arith.constant 0 : i32
    %c0_i32_1 = arith.constant 0 : i32
    return %c0_i32, %c0_i32_0 : i32, i32
  }
  func.func @transform_5(%arg0: i32) -> (i32, i32) {
    %c0_i32 = arith.constant 0 : i32
    %c0_i32_0 = arith.constant 0 : i32
    %c0_i32_1 = arith.constant 0 : i32
    return %c0_i32, %c0_i32_0 : i32, i32
  }
  func.func @transform_6(%arg0: i32) -> i32 {
    %c0_i32 = arith.constant 0 : i32
    %c0_i32_0 = arith.constant 0 : i32
    return %c0_i32 : i32
  }
  func.func @transform_7(%arg0: i32) -> i32 {
    %c0_i32 = arith.constant 0 : i32
    %c0_i32_0 = arith.constant 0 : i32
    return %c0_i32 : i32
  }
  func.func @transform_8(%arg0: i32) -> (i32, i32, i32) {
    %c0_i32 = arith.constant 0 : i32
    %c0_i32_0 = arith.constant 0 : i32
    %c0_i32_1 = arith.constant 0 : i32
    return %arg0, %c0_i32, %c0_i32_0 : i32, i32, i32
  }
}

</mosaic_0001>

<bundles_post_ra>
// kernel: cbam_forward.1
= control target key start
LH: loop header
LB: loop body
LE: loop exit
PB: predicated region body
PF: predicated region fallthrough
CT: control target
= control target key end

     0   :  { %s8334_s0 = inlined_call_operand.vmem [shape: f32[8,32,256], index: 0, kind: input, shape index: {}]   ;;  %s8335_s1 = inlined_call_operand.vmem [shape: f32[32,2], index: 1, kind: input, shape index: {}]   ;;  %s8336_s2 = inlined_call_operand.vmem [shape: f32[1,2], index: 2, kind: input, shape index: {}]   ;;  %s8337_s3 = inlined_call_operand.vmem [shape: f32[2,32], index: 3, kind: input, shape index: {}]   ;;  %s8338_s4 = inlined_call_operand.vmem [shape: f32[1,32], index: 4, kind: input, shape index: {}]   ;;  %s8339_s5 = inlined_call_operand.vmem [shape: f32[49,256], index: 5, kind: input, shape index: {}]   ;;  %s8340_s6 = inlined_call_operand.vmem [shape: f32[98], index: 6, kind: input, shape index: {}]   ;;  %s8341_s7 = inlined_call_operand.vmem [shape: f32[2], index: 7, kind: input, shape index: {}]   ;;  %s8342_s8 = inlined_call_operand.vmem [shape: f32[8,32,256], index: 8, kind: output, shape index: {}]  }
   0x1   :  { %8585 = sst [smem:[#allocation132_spill]] %s8334_s0 }
   0x2   :  { %8586 = sst [smem:[#allocation133_spill]] %s8335_s1 }
   0x3   :  { %8587 = sst [smem:[#allocation134_spill]] %s8336_s2 }
   0x4   :  { %8588 = sst [smem:[#allocation135_spill]] %s8337_s3 }
   0x5   :  { %8589 = sst [smem:[#allocation136_spill]] %s8338_s4 }
   0x6   :  { %8590 = sst [smem:[#allocation137_spill]] %s8339_s5 }
   0x7   :  { %8591 = sst [smem:[#allocation138_spill]] %s8340_s6 }
   0x8   :  { %8592 = sst [smem:[#allocation139_spill]] %s8341_s7 }
   0x9   :  { %8593 = sst [smem:[#allocation140_spill]] %s8342_s8 }
   0xa   :  { %13 = vsyncpa [#allocation4], 0 }
   0xb   :  { %14 = vsyncpa [#allocation6], 0  ;;  %s4805_s27 = smov 0  }
   0xc LB: > { %8594 = sst [smem:[#allocation9_spill]] %s4705_s27  ;;  %s4253_s28 = sadd.s32 4294967295, %s4705_s27   ;;  %s4705_s27 = sphi %s4805_s27, %s20_s27  }
   0xd   : > { %p4255_p0 = scmp.ge.s32.totalorder %s4705_s27, 1  ;;  %p224_p1 = scmp.lt.s32.totalorder %s4705_s27, 3 }
   0xe   : > { %s8595_s6 = sld [smem:[#allocation138_spill]]  ;;  %p4822_p3 = scmp.eq.s32.totalorder %s4253_s28, 0 }
   0xf   : > { %p4816_p2 = pnand %p4255_p0, %p224_p1  ;;  %s8598_s7 = sld [smem:[#allocation139_spill]] }
  0x10   : > { %s8597_s11 = scalar_select %p4822_p3, 1, 0 }
  0x11   : > { %s8596_s10 = scalar_select %p4816_p2, 1, 0 }
  0x12   : > { %p4569_p4 = pneg %p4816_p2 }
  0x14   : > { %s252_s9 = sshll.u32 %s8595_s6, 4  ;;  %p4833_p5 = pnand %p4822_p3, %p4569_p4  ;;  %s253_s9 = int_to_ptr.vmem [resolvable:$true] %s252_s9 }
  0x15   : > { %s263_s14 = sshll.u32 %s8598_s7, 4  ;;  %s4661_s16 = scalar_lea.vmem %s253_s9, 16  ;;  %s264_s14 = int_to_ptr.vmem [resolvable:$true] %s263_s14 }
  0x16   : > { %p4662_p6 = scmp.ne.s32.totalorder %s253_s9, %s4661_s16  ;;  %p4663_p7 = pneg %p4833_p5 }
  0x17   : > { %p4669_p10 = scmp.lt.s32.totalorder %s253_s9, %s253_s9  ;;  %p4670_p11 = scmp.lt.s32.totalorder %s4661_s16, %s4661_s16 }
  0x18   : > { %p4664_p8 = pnand %p4663_p7, %p4662_p6 }
  0x19   : > { %p4671_p12 = por %p4670_p11, %p4669_p10 }
  0x1a   : > { %p4665_p9 = pneg %p4664_p8 }
  0x1c   : > { %p4672_p13 = pnand %p4671_p12, %p4665_p9 }
  0x1e   : > { %4675 = shalt.err (!%p4672_p13)
}
  0x1f   : > { %s4707_s17 = smov [#allocation3]   ;;  %s4676_s18 = scalar_lea.vmem %s264_s14, 16 }
  0x20   : > { %4572 = dma.vmem_to_smem (!%p4833_p5), %s253_s9, 16, %s4707_s17, [#allocation4]  }
  0x21   : > { %p4677_p0 = scmp.ne.s32.totalorder %s264_s14, %s4676_s18  ;;  %p4684_p3 = scmp.lt.s32.totalorder %s264_s14, %s264_s14 }
  0x22   : > { %p4685_p2 = scmp.lt.s32.totalorder %s4676_s18, %s4676_s18 }
  0x23   : > { %p4679_p1 = pnand %p4677_p0, %p4663_p7 }
  0x24   : > { %p4686_p6 = por %p4685_p2, %p4684_p3 }
  0x25   : > { %p4680_p4 = pneg %p4679_p1 }
  0x27   : > { %p4687_p8 = pnand %p4686_p6, %p4680_p4 }
  0x29   : > { %4690 = shalt.err (!%p4687_p8)
}
  0x2a   : > { %s4708_s19 = smov [#allocation5]   ;;  %p8600_p9 = scmp.ne.s32.totalorder %s8596_s10, 0 }
  0x2b   : > { %4575 = dma.vmem_to_smem (!%p4833_p5), %s264_s14, 16, %s4708_s19, [#allocation6]  }
  0x2c   : > { %286 = sbr.rel (%p8600_p9) target bundleno = 1541 (0x605), region = 52 }
  0x31   : > { %p8601_p10 = scmp.ne.s32.totalorder %s8597_s11, 0 }
  0x33   : > { %4696 = dma.done.wait (%p8601_p10), [#allocation4], 16  }
  0x34   : > { %4698 = vsyncadd (%p8601_p10), [#allocation4], 4294967280 }
  0x35   : > { %4700 = dma.done.wait (%p8601_p10), [#allocation6], 16  }
  0x36   : > { %4702 = vsyncadd (%p8601_p10), [#allocation6], 4294967280 }
  0x37   : > { %296 = sfence }
  0x38   : > { %s4262_s20 = sshll.u32 %s4253_s28, 2  ;;  %s8603_s0 = sld [smem:[#allocation132_spill]]  ;;  %vm4710_vm0 = vmmov 0   ;;  %vm513_vm1 = vcmask 130112   ;;  %vm520_vm2 = vcmask 195712   ;;  %vm527_vm3 = vcmask 261312  }
  0x39   : > { %p328_p2 = scmp.lt.s32.totalorder %s4262_s20, 7  ;;  %s8614_s1 = sld [smem:[#allocation133_spill]]  ;;  %vm586_vm4 = vcmask 1041409   ;;  %vm685_vm5 = vcmask 1045509   ;;  %vm588_vm6 = vcmask 1042434   ;;  %vm687_vm7 = vcmask 1046534  }
  0x3a   : > { %vm590_vm8 = vcmask 1043459   ;;  %vm689_vm9 = vcmask 1047559   ;;  %vm692_vm10 = vcmask 1043456   ;;  %vm705_vm11 = vcmask 261120   ;;  %s8622_s3 = sld [smem:[#allocation135_spill]]  ;;  %s4712_s25 = smov 50  }
  0x3b   : > { %s9151_s20 = smov (!%p328_p2, %s4262_s20), 7  ;;  %vm1207_vm12 = vcmask 1041408   ;;  %s8623_s2 = sld [smem:[#allocation134_spill]]  ;;  %vm1203_vm13 = vcmask 15360  }
  0x3c   : > { %8602 = sst [smem:[#allocation10_spill]] %s9151_s20  ;;  %s8381_s21 = sshll.u32 %s9151_s20, 6 }
  0x3d   : > { %s8624_s4 = sld [smem:[#allocation136_spill]]  ;;  %s4713_s26 = smov 49  }
  0x3e   : > { %s4863_s24 = scalar_lea.vmem %s8603_s0, %s8381_s21  ;;  %s4342_s18 = sld [smem:[#allocation3 + $0x18]] }
  0x3f   : > { %v4866_v0 = vld [vmem:[%s4863_s24 + $0x40] sm:$0xff]  ;;  %v4869_v1 = vld [vmem:[%s4863_s24 + $0x48] sm:$0xff]  ;;  %v4880_v5 = vld [vmem:[%s4863_s24 + $0x50] sm:$0xff]  ;;  %s4343_s19 = sld [smem:[#allocation3 + $0x49]]  ;;  %s4714_s28 = smov 48  }
  0x40   : > { %v4872_v2 = vld [vmem:[%s4863_s24] sm:$0xff]  ;;  %v385_v3 = vadd.f32 %v4869_v1, %v4866_v0  ;;  %v4877_v4 = vld [vmem:[%s4863_s24 + $0x8] sm:$0xff]  ;;  %v4883_v6 = vld [vmem:[%s4863_s24 + $0x58] sm:$0xff]  ;;  %v450_v40 = vmax.f32 %v4866_v0, %v4869_v1  ;;  %s8661_s5 = sld [smem:[#allocation137_spill]]  ;;  %s4715_s29 = smov 47  }
  0x41   : > { %v373_v7 = vadd.f32 %v4877_v4, %v4872_v2  ;;  %v4888_v8 = vld [vmem:[%s4863_s24 + $0x10] sm:$0xff]  ;;  %v4891_v9 = vld [vmem:[%s4863_s24 + $0x18] sm:$0xff]  ;;  %v388_v10 = vadd.f32 %v4883_v6, %v4880_v5  ;;  %v4898_v12 = vld [vmem:[%s4863_s24 + $0x60] sm:$0xff]  ;;  %v438_v38 = vmax.f32 %v4872_v2, %v4877_v4  ;;  %v453_v45 = vmax.f32 %v4880_v5, %v4883_v6  ;;  %s4716_s30 = smov 46   ;;  %s4717_s9 = smov 45  }
  0x42   : > { %386 = vadd.xlane.f32.xlu1 %v385_v3  ;;  %v376_v11 = vadd.f32 %v4891_v9, %v4888_v8  ;;  %v4901_v13 = vld [vmem:[%s4863_s24 + $0x68] sm:$0xff]  ;;  %v4904_v14 = vld [vmem:[%s4863_s24 + $0x20] sm:$0xff]  ;;  %v4914_v18 = vld [vmem:[%s4863_s24 + $0x90] sm:$0xff]  ;;  %v441_v41 = vmax.f32 %v4888_v8, %v4891_v9  ;;  %s4718_s10 = smov 35   ;;  %s4719_s11 = smov 34  }
  0x43   : > { %374 = vadd.xlane.f32.xlu0 %v373_v7  ;;  %v4907_v15 = vld [vmem:[%s4863_s24 + $0x28] sm:$0xff]  ;;  %v391_v16 = vadd.f32 %v4901_v13, %v4898_v12  ;;  %8604 = vst [vmem:[#allocation11_spill] sm:$0xff] %v4914_v18  ;;  %v4917_v19 = vld [vmem:[%s4863_s24 + $0x98] sm:$0xff]  ;;  %v4920_v20 = vld [vmem:[%s4863_s24 + $0x80] sm:$0xff]  ;;  %v456_v51 = vmax.f32 %v4898_v12, %v4901_v13  ;;  %s4720_s12 = smov 33   ;;  %s4721_s13 = smov 32  }
  0x44   : > { %v379_v17 = vadd.f32 %v4907_v15, %v4904_v14  ;;  %8605 = vst [vmem:[#allocation12_spill] sm:$0xff] %v4917_v19  ;;  %8606 = vst [vmem:[#allocation13_spill] sm:$0xff] %v4920_v20  ;;  %v4923_v21 = vld [vmem:[%s4863_s24 + $0x88] sm:$0xff]  ;;  %v400_v22 = vadd.f32 %v4917_v19, %v4914_v18  ;;  %v4930_v24 = vld [vmem:[%s4863_s24 + $0x70] sm:$0xff]  ;;  %v444_v48 = vmax.f32 %v4904_v14, %v4907_v15  ;;  %s4722_s14 = smov 31   ;;  %s4723_s15 = smov 30  }
  0x45   : > { %8607 = vst [vmem:[#allocation14_spill] sm:$0xff] %v4923_v21  ;;  %v397_v23 = vadd.f32 %v4923_v21, %v4920_v20  ;;  %8608 = vst [vmem:[#allocation15_spill] sm:$0xff] %v4930_v24  ;;  %v4933_v25 = vld [vmem:[%s4863_s24 + $0x78] sm:$0xff]  ;;  %v4936_v26 = vld [vmem:[%s4863_s24 + $0x30] sm:$0xff]  ;;  %v462_v50 = vmax.f32 %v4920_v20, %v4923_v21  ;;  %v465_v55 = vmax.f32 %v4914_v18, %v4917_v19  ;;  %s4724_s16 = smov 29   ;;  %s4725_s17 = smov 19  }
  0x46   : > { %389 = vadd.xlane.f32.xlu1 %v388_v10  ;;  %8609 = vst [vmem:[#allocation16_spill] sm:$0xff] %v4933_v25  ;;  %v4939_v27 = vld [vmem:[%s4863_s24 + $0x38] sm:$0xff]  ;;  %v394_v28 = vadd.f32 %v4933_v25, %v4930_v24  ;;  %v365_v30 = vld [vmem:[%s4863_s24 + $0xc0] sm:$0xff]  ;;  %v366_v31 = vld [vmem:[%s4863_s24 + $0xc8] sm:$0xff]  ;;  %v459_v56 = vmax.f32 %v4930_v24, %v4933_v25  ;;  %s8384_s22 = smov 16   ;;  %s8386_s23 = smov 15  }
  0x47   : > { %377 = vadd.xlane.f32.xlu0 %v376_v11  ;;  %v382_v29 = vadd.f32 %v4939_v27, %v4936_v26  ;;  %v4948_v32 = vld [vmem:[%s4863_s24 + $0xa0] sm:$0xff]  ;;  %v4951_v33 = vld [vmem:[%s4863_s24 + $0xa8] sm:$0xff]  ;;  %v409_v34 = vadd.f32 %v366_v31, %v365_v30  ;;  %v367_v36 = vld [vmem:[%s4863_s24 + $0xd0] sm:$0xff]  ;;  %v447_v57 = vmax.f32 %v4936_v26, %v4939_v27  ;;  %v474_v58 = vmax.f32 %v365_v30, %v366_v31  ;;  %s8388_s21 = smov 14   ;;  %s6005_s0 = sld [smem:[#allocation3 + $0x13]] }
  0x48   : > { %8610 = vst [vmem:[#allocation17_spill] sm:$0xff] %v4948_v32  ;;  %8611 = vst [vmem:[#allocation18_spill] sm:$0xff] %v4951_v33  ;;  %v403_v35 = vadd.f32 %v4951_v33, %v4948_v32  ;;  %v368_v37 = vld [vmem:[%s4863_s24 + $0xd8] sm:$0xff]  ;;  %v4964_v42 = vld [vmem:[%s4863_s24 + $0xb0] sm:$0xff]  ;;  %v468_v59 = vmax.f32 %v4948_v32, %v4951_v33  ;;  %s8732_s6 = smov 2   ;;  %s6029_s7 = sld [smem:[#allocation3 + $0x1a]] }
  0x49   : > { %v412_v39 = vadd.f32 %v368_v37, %v367_v36  ;;  %8612 = vst [vmem:[#allocation19_spill] sm:$0xff] %v4964_v42  ;;  %v4967_v43 = vld [vmem:[%s4863_s24 + $0xb8] sm:$0xff]  ;;  %v369_v46 = vld [vmem:[%s4863_s24 + $0xe0] sm:$0xff]  ;;  %v370_v47 = vld [vmem:[%s4863_s24 + $0xe8] sm:$0xff]  ;;  %v477_v61 = vmax.f32 %v367_v36, %v368_v37  ;;  %s6035_s27 = sld [smem:[#allocation3 + $0x1b]]  ;;  %s8739_s20 = smov 1  }
  0x4a   : > { %392 = vadd.xlane.f32.xlu1 %v391_v16  ;;  %8613 = vst [vmem:[#allocation20_spill] sm:$0xff] %v4967_v43  ;;  %v406_v44 = vadd.f32 %v4967_v43, %v4964_v42  ;;  %v415_v49 = vadd.f32 %v370_v47, %v369_v46  ;;  %v371_v52 = vld [vmem:[%s4863_s24 + $0xf0] sm:$0xff]  ;;  %v372_v53 = vld [vmem:[%s4863_s24 + $0xf8] sm:$0xff]  ;;  %v471_v60 = vmax.f32 %v4964_v42, %v4967_v43  ;;  %s6037_s8 = sld [smem:[#allocation3 + $0x1c]] }
  0x4b   : > { %380 = vadd.xlane.f32.xlu0 %v379_v17  ;;  %v418_v54 = vadd.f32 %v372_v53, %v371_v52  ;;  %v483_v62 = vmax.f32 %v371_v52, %v372_v53  ;;  %v480_v63 = vmax.f32 %v369_v46, %v370_v47  ;;  %v697_v3 = vld [vmem:[%s8614_s1 + $0x18] sm:$0xff]  ;;  %v696_v10 = vld [vmem:[%s8614_s1 + $0x10] sm:$0xff]  ;;  %v695_v17 = vld [vmem:[%s8614_s1 + $0x8] sm:$0xff] }
  0x4c   : > { %v4996_v7 = vand.u32 4294901760, %v697_v3  ;;  %v5004_v16 = vand.u32 4294901760, %v696_v10 }
  0x4d   : > { %8728 = sst [smem:[#allocation100_spill]] %s6005_s0 }
  0x4e   : > { %401 = vadd.xlane.f32.xlu1 %v400_v22  ;;  %v5002_v11 = vsub.f32 %v697_v3, %v4996_v7  ;;  %8734 = sst [smem:[#allocation104_spill]] %s6029_s7 }
  0x4f   : > { %398 = vadd.xlane.f32.xlu0 %v397_v23  ;;  %v5011_v23 = vsub.f32 %v696_v10, %v5004_v16  ;;  %v502_v10 = vlaneseq  ;;  %8737 = sst [smem:[#allocation107_spill]] %s6035_s27 }
  0x50   : > { %v8349_v22 = vand.u32 4294901760, %v5002_v11  ;;  %8738 = sst [smem:[#allocation108_spill]] %s6037_s8 }
  0x51   : > { %v8348_v31 = vand.u32 4294901760, %v5011_v23  ;;  %s6107_s0 = sld [smem:[#allocation3 + $0x24]] }
  0x52   : > { %395 = vadd.xlane.f32.xlu1 %v394_v28  ;;  %v5013_v28 = vand.u32 4294901760, %v695_v17  ;;  %v816_v30 = vsub.f32 %v5002_v11, %v8349_v22  ;;  %s6135_s8 = sld [smem:[#allocation3 + $0x25]] }
  0x53   : > { %383 = vadd.xlane.f32.xlu0 %v382_v29  ;;  %v694_v29 = vld [vmem:[%s8614_s1] sm:$0xff]  ;;  %v823_v37 = vsub.f32 %v5011_v23, %v8348_v31  ;;  %s8729_s1 = smov 3   ;;  %s6144_s27 = sld [smem:[#allocation3 + $0x26]] }
  0x54   : > { %v817_v36 = vand.u32 4294901760, %v816_v30  ;;  %v5067_v30 = vand.u32 127, %v502_v10 }
  0x56   : > { %410 = vadd.xlane.f32.xlu1 %v409_v34  ;;  %v5023_v34 = vsub.f32 %v695_v17, %v5013_v28  ;;  %8615 = vst [vmem:[#allocation21_spill] sm:$0xff] %v5067_v30 }
  0x57   : > { %404 = vadd.xlane.f32.xlu0 %v403_v35  ;;  %v5025_v35 = vand.u32 4294901760, %v694_v29 }
  0x5a   : > { %439 = vmax.xlane.f32.xlu1 %v438_v38  ;;  %v8347_v38 = vand.u32 4294901760, %v5023_v34 }
  0x5b   : > { %413 = vadd.xlane.f32.xlu0 %v412_v39  ;;  %v8350_v39 = vmov 0.0  }
  0x5c   : > { %4476 = vmatprep.subr.mxu1 %v8350_v39  ;;  %4465 = vmatprep.subr.mxu0 %v8350_v39 }
  0x5d   : > { %4477 = vmatpush3.msra.mxu1 %v817_v36  ;;  %4466 = vmatpush3.msra.mxu0 %v4996_v7 }
  0x5e   : > { %451 = vmax.xlane.f32.xlu1 %v450_v40  ;;  %v5033_v40 = vsub.f32 %v694_v29, %v5025_v35  ;;  %4478 = vmatprep.subr.mxu1 %v8350_v39 }
  0x5f   : > { %442 = vmax.xlane.f32.xlu0 %v441_v41  ;;  %v824_v41 = vand.u32 4294901760, %v823_v37  ;;  %4467 = vmatprep.subr.mxu0 %v8350_v39 }
  0x60   : > { %4468 = vmatpush3.msra.mxu0 %v5004_v16  ;;  %4484 = vmatprep.mubr.msk.f32.mxu1 %vm4710_vm0, %v8350_v39 }
  0x61   : > { %4479 = vmatpush3.msra.mxu1 %v824_v41  ;;  %4469 = vmatprep.subr.mxu0 %v8350_v39  ;;  %v5071_v41 = vshrl.u32 %v502_v10, 7 }
  0x62   : > { %407 = vadd.xlane.f32.xlu1 %v406_v44  ;;  %v830_v44 = vsub.f32 %v5023_v34, %v8347_v38  ;;  %4480 = vmatprep.subr.mxu1 %v8350_v39 }
  0x63   : > { %454 = vmax.xlane.f32.xlu0 %v453_v45  ;;  %v8346_v45 = vand.u32 4294901760, %v5033_v40  ;;  %4470 = vmatpush3.msra.mxu0 %v5013_v28  ;;  %8616 = vst [vmem:[#allocation22_spill] sm:$0xff] %v5071_v41  ;;  %v5082_v38 = vsub.s32 %v5067_v30, %v5071_v41 }
  0x64   : > { %v831_v46 = vand.u32 4294901760, %v830_v44  ;;  %4471 = vmatprep.subr.mxu0 %v8350_v39  ;;  %4473 = vmatprep.mubr.msk.f32.mxu0 %vm4710_vm0, %v8350_v39  ;;  %v508_v44 = vadd.s32 4294967288, %v5067_v30 }
  0x65   : > { %v837_v47 = vsub.f32 %v5033_v40, %v8346_v45  ;;  %4472 = vmatpush3.msra.mxu0 %v5025_v35 }
  0x66   : > { %445 = vmax.xlane.f32.xlu1 %v444_v48  ;;  %4481 = vmatpush3.msra.mxu1 %v831_v46  ;;  %v515_v46 = vadd.s32 4294967280, %v5067_v30  ;;  %v5085_v31 = vsub.s32 %v508_v44, %v5071_v41 }
  0x67   : > { %416 = vadd.xlane.f32.xlu0 %v415_v49  ;;  %4482 = vmatprep.subr.mxu1 %v8350_v39  ;;  %v838_v48 = vand.u32 4294901760, %v837_v47 }
  0x68   : > { %4487 = vmatprep.subr.mxu0 %v8350_v39  ;;  %v5088_v43 = vsub.s32 %v515_v46, %v5071_v41 }
  0x69   : > { %4483 = vmatpush3.msra.mxu1 %v838_v48  ;;  %v522_v48 = vadd.s32 4294967272, %v5067_v30 }
  0x6a   : > { %463 = vmax.xlane.f32.xlu1 %v462_v50  ;;  %4498 = vmatprep.subr.mxu1 %v8350_v39 }
  0x6b   : > { %457 = vmax.xlane.f32.xlu0 %v456_v51  ;;  %v5091_v20 = vsub.s32 %v522_v48, %v5071_v41 }
  0x6e   : > { %419 = vadd.xlane.f32.xlu1 %v418_v54 }
  0x6f   : > { %466 = vmax.xlane.f32.xlu0 %v465_v55 }
  0x72   : > { %460 = vmax.xlane.f32.xlu1 %v459_v56 }
  0x73   : > { %448 = vmax.xlane.f32.xlu0 %v447_v57 }
  0x76   : > { %475 = vmax.xlane.f32.xlu1 %v474_v58 }
  0x77   : > { %469 = vmax.xlane.f32.xlu0 %v468_v59 }
  0x7a   : > { %472 = vmax.xlane.f32.xlu1 %v471_v60 }
  0x7b   : > { %478 = vmax.xlane.f32.xlu0 %v477_v61 }
  0x7e   : > { %484 = vmax.xlane.f32.xlu1 %v483_v62 }
  0x7f   : > { %481 = vmax.xlane.f32.xlu0 %v480_v63 }
  0xcb   : > { %v387_v49 = vpop.xlane.xlu1 %386 }
  0xcc   : > { %v375_v50 = vpop.xlane.xlu0 %374  ;;  %v426_v22 = vmul.f32 0.00390625, %v387_v49 }
  0xcd   : > { %v422_v21 = vmul.f32 0.00390625, %v375_v50 }
  0xce   : > { %v532_v49 = vrot.slane %v426_v22, %v5082_v38 }
  0xcf   : > { %v390_v51 = vpop.xlane.xlu1 %389 }
  0xd0   : > { %v378_v52 = vpop.xlane.xlu0 %377  ;;  %v427_v10 = vmul.f32 0.00390625, %v390_v51 }
  0xd1   : > { %v423_v39 = vmul.f32 0.00390625, %v378_v52 }
  0xd2   : > { %v536_v51 = vrot.slane %v427_v10, %v5085_v31 }
  0xd3   : > { %v393_v53 = vpop.xlane.xlu1 %392  ;;  %v512_v52 = vrot.slane %v423_v39, %v5085_v31 }
  0xd4   : > { %v381_v54 = vpop.xlane.xlu0 %380  ;;  %v428_v42 = vmul.f32 0.00390625, %v393_v53  ;;  %v537_v48 = vsel %vm513_vm1, %v536_v51, %v532_v49 }
  0xd5   : > { %v424_v33 = vmul.f32 0.00390625, %v381_v54 }
  0xd6   : > { %v541_v53 = vrot.slane %v428_v42, %v5088_v43 }
  0xd7   : > { %v402_v55 = vpop.xlane.xlu1 %401  ;;  %v519_v54 = vrot.slane %v424_v33, %v5088_v43 }
  0xd8   : > { %v399_v56 = vpop.xlane.xlu0 %398  ;;  %v431_v32 = vmul.f32 0.00390625, %v402_v55 }
  0xd9   : > { %v430_v19 = vmul.f32 0.00390625, %v399_v56 }
  0xda   : > { %v555_v50 = vrot.slane %v431_v32, %v5085_v31  ;;  %v542_v32 = vsel %vm520_vm2, %v541_v53, %v537_v48 }
  0xdb   : > { %v396_v57 = vpop.xlane.xlu1 %395  ;;  %v551_v55 = vrot.slane %v430_v19, %v5082_v38 }
  0xdc   : > { %v384_v58 = vpop.xlane.xlu0 %383  ;;  %v429_v30 = vmul.f32 0.00390625, %v396_v57  ;;  %v507_v57 = vrot.slane %v422_v21, %v5082_v38 }
  0xdd   : > { %v425_v25 = vmul.f32 0.00390625, %v384_v58  ;;  %v556_v10 = vsel %vm513_vm1, %v555_v50, %v551_v55 }
  0xde   : > { %v546_v58 = vrot.slane %v429_v30, %v5091_v20  ;;  %v514_v42 = vsel %vm513_vm1, %v512_v52, %v507_v57 }
  0xdf   : > { %v411_v59 = vpop.xlane.xlu1 %410  ;;  %v526_v22 = vrot.slane %v425_v25, %v5091_v20  ;;  %v521_v19 = vsel %vm520_vm2, %v519_v54, %v514_v42 }
  0xe0   : > { %v405_v60 = vpop.xlane.xlu0 %404  ;;  %v434_v39 = vmul.f32 0.00390625, %v411_v59  ;;  %v547_v30 = vsel %vm527_vm3, %v546_v58, %v542_v32 }
  0xe1   : > { %v432_v44 = vmul.f32 0.00390625, %v405_v60  ;;  %v528_v25 = vsel %vm527_vm3, %v526_v22, %v521_v19 }
  0xe2   : > { %v570_v51 = vrot.slane %v434_v39, %v5082_v38 }
  0xe3   : > { %v5059_v61 = vpop.xlane.xlu1 %439  ;;  %v560_v60 = vrot.slane %v432_v44, %v5088_v43 }
  0xe4   : > { %v414_v62 = vpop.xlane.xlu0 %413 }
  0xe5   : > { %v435_v33 = vmul.f32 0.00390625, %v414_v62  ;;  %v612_v62 = vrot.slane %v5059_v61, %v5082_v38  ;;  %v561_v22 = vsel %vm520_vm2, %v560_v60, %v556_v10 }
  0xe7   : > { %v5061_v63 = vpop.xlane.xlu1 %451  ;;  %v574_v54 = vrot.slane %v435_v33, %v5085_v31 }
  0xe8   : > { %v5063_v3 = vpop.xlane.xlu0 %442  ;;  %v631_v57 = vrot.slane %v5061_v63, %v5082_v38 }
  0xe9   : > { %v616_v50 = vrot.slane %v5063_v3, %v5085_v31  ;;  %v575_v33 = vsel %vm513_vm1, %v574_v54, %v570_v51 }
  0xeb   : > { %v408_v17 = vpop.xlane.xlu1 %407 }
  0xec   : > { %v5065_v29 = vpop.xlane.xlu0 %454  ;;  %v433_v59 = vmul.f32 0.00390625, %v408_v17 }
  0xed   : > { %v635_v52 = vrot.slane %v5065_v29, %v5085_v31 }
  0xee   : > { %v565_v3 = vrot.slane %v433_v59, %v5091_v20 }
  0xef   : > { %v5069_v36 = vpop.xlane.xlu1 %445  ;;  %v636_v63 = vsel %vm513_vm1, %v635_v52, %v631_v57 }
  0xf0   : > { %v417_v37 = vpop.xlane.xlu0 %416  ;;  %v621_v61 = vrot.slane %v5069_v36, %v5088_v43 }
  0xf1   : > { %v436_v53 = vmul.f32 0.00390625, %v417_v37 }
  0xf3   : > { %v5075_v47 = vpop.xlane.xlu1 %463  ;;  %v579_v39 = vrot.slane %v436_v53, %v5088_v43 }
  0xf4   : > { %v5078_v45 = vpop.xlane.xlu0 %457  ;;  %v650_v36 = vrot.slane %v5075_v47, %v5082_v38 }
  0xf5   : > { %v640_v17 = vrot.slane %v5078_v45, %v5088_v43  ;;  %v580_v51 = vsel %vm520_vm2, %v579_v39, %v575_v33  ;;  %v4268_v33 = vld [vmem:[%s8623_s2] ss:$0 sm:$0xff]  ;;  %s6011_s2 = sld [smem:[#allocation3 + $0x14]] }
  0xf7   : > { %v420_v18 = vpop.xlane.xlu1 %419  ;;  %v641_v48 = vsel %vm520_vm2, %v640_v17, %v636_v63 }
  0xf8   : > { %v5093_v24 = vpop.xlane.xlu0 %466  ;;  %v437_v55 = vmul.f32 0.00390625, %v420_v18 }
  0xf9   : > { %v654_v29 = vrot.slane %v5093_v24, %v5085_v31 }
  0xfa   : > { %v584_v42 = vrot.slane %v437_v55, %v5091_v20 }
  0xfb   : > { %v461_v56 = vpop.xlane.xlu1 %460  ;;  %v655_v19 = vsel %vm513_vm1, %v654_v29, %v650_v36 }
  0xfc   : > { %v449_v46 = vpop.xlane.xlu0 %448  ;;  %v645_v37 = vrot.slane %v461_v56, %v5091_v20  ;;  %v617_v56 = vsel %vm513_vm1, %v616_v50, %v612_v62  ;;  %v585_v50 = vsel %vm527_vm3, %v584_v42, %v580_v51 }
  0xfd   : > { %v626_v44 = vrot.slane %v449_v46, %v5091_v20  ;;  %v622_v32 = vsel %vm520_vm2, %v621_v61, %v617_v56 }
  0xfe   : > { %v646_v10 = vsel %vm527_vm3, %v645_v37, %v641_v48 }
  0xff   : > { %v476_v21 = vpop.xlane.xlu1 %475  ;;  %v627_v47 = vsel %vm527_vm3, %v626_v44, %v622_v32 }
 0x100   : > { %v470_v49 = vpop.xlane.xlu0 %469  ;;  %v669_v59 = vrot.slane %v476_v21, %v5082_v38  ;;  %v587_v38 = vsel %vm586_vm4, %v547_v30, %v528_v25  ;;  %v686_v21 = vsel %vm685_vm5, %v646_v10, %v627_v47  ;;  %v8617_v30 = vmov 0.0  }
 0x101   : > { %v659_v18 = vrot.slane %v470_v49, %v5088_v43 }
 0x103   : > { %v473_v58 = vpop.xlane.xlu1 %472  ;;  %v660_v49 = vsel %vm520_vm2, %v659_v18, %v655_v19 }
 0x104   : > { %v479_v45 = vpop.xlane.xlu0 %478  ;;  %v664_v24 = vrot.slane %v473_v58, %v5091_v20 }
 0x105   : > { %v673_v46 = vrot.slane %v479_v45, %v5085_v31  ;;  %v566_v31 = vsel %vm527_vm3, %v565_v3, %v561_v22 }
 0x106   : > { %v665_v53 = vsel %vm527_vm3, %v664_v24, %v660_v49  ;;  %v589_v55 = vsel %vm588_vm6, %v566_v31, %v587_v38 }
 0x107   : > { %v485_v60 = vpop.xlane.xlu1 %484  ;;  %v674_v17 = vsel %vm513_vm1, %v673_v46, %v669_v59  ;;  %v688_v57 = vsel %vm687_vm7, %v665_v53, %v686_v21 }
 0x108   : > { %v482_v62 = vpop.xlane.xlu0 %481  ;;  %v683_v52 = vrot.slane %v485_v60, %v5091_v20 }
 0x109   : > { %v678_v54 = vrot.slane %v482_v62, %v5088_v43  ;;  %v591_v43 = vsel %vm590_vm8, %v585_v50, %v589_v55 }
 0x10b   : > { %v679_v20 = vsel %vm520_vm2, %v678_v54, %v674_v17 }
 0x10c   : > { %v684_v61 = vsel %vm527_vm3, %v683_v52, %v679_v20 }
 0x10d   : > { %v690_v29 = vsel %vm689_vm9, %v684_v61, %v688_v57 }
 0x10e   : > { %v693_v37 = vsel %vm692_vm10, %v591_v43, %v690_v29 }
 0x10f   : > { %v707_v58 = vsel %vm705_vm11, %v693_v37, 0  ;;  %v4269_v37 = vld [vmem:[%s8624_s4] ss:$0 sm:$0xff]  ;;  %s6021_s4 = sld [smem:[#allocation3 + $0x17]] }
 0x110   : > { %v778_v22 = vand.u32 4294901760, %v707_v58 }
 0x112   : > { %v779_v3 = vsub.f32 %v707_v58, %v778_v22  ;;  %4485 = vmatmul.mubr.f32.vlgmr.msra.gmra.mxu1 %v778_v22 }
 0x113   : > { %4499 = vmatpush3.msra.mxu1 %v4996_v7  ;;  %4506 = vmatprep.mubr.msk.f32.mxu1 %vm4710_vm0, %v8617_v30 }
 0x114   : > { %4500 = vmatprep.subr.mxu1 %v8617_v30  ;;  %v780_v25 = vand.u32 4294901760, %v779_v3 }
 0x115   : > { %4501 = vmatpush3.msra.mxu1 %v5004_v16 }
 0x116   : > { %4502 = vmatprep.subr.mxu1 %v8617_v30  ;;  %v781_v44 = vsub.f32 %v779_v3, %v780_v25 }
 0x117   : > { %4503 = vmatpush3.msra.mxu1 %v5013_v28 }
 0x118   : > { %4504 = vmatprep.subr.mxu1 %v8617_v30  ;;  %v782_v18 = vand.u32 4294901760, %v781_v44 }
 0x119   : > { %4505 = vmatpush3.msra.mxu1 %v5025_v35 }
 0x11a   : > { %4507 = vmatmul.mubr.f32.vlgmr.msra.gmra.mxu1 %v780_v25  ;;  %4520 = vmatprep.subr.mxu1 %v8617_v30 }
 0x11b   : > { %4474 = vmatmul.mubr.f32.vlgmr.msra.gmra.mxu0 %v782_v18  ;;  %4521 = vmatpush3.msra.mxu1 %v4996_v7  ;;  %v8618_v7 = vand.u32 4294901760, %v5002_v11 }
 0x11c   : > { %4488 = vmatpush3.msra.mxu0 %v5002_v11  ;;  %4522 = vmatprep.subr.mxu1 %v8617_v30  ;;  %v8621_v11 = vand.u32 4294901760, %v5033_v40 }
 0x11d   : > { %4489 = vmatprep.subr.mxu0 %v8617_v30  ;;  %4523 = vmatpush3.msra.mxu1 %v5004_v16  ;;  %v8619_v16 = vand.u32 4294901760, %v5011_v23 }
 0x11e   : > { %4490 = vmatpush3.msra.mxu0 %v5011_v23  ;;  %4524 = vmatprep.subr.mxu1 %v8617_v30  ;;  %v1195_v23 = vld [vmem:[%s8622_s3] sm:$0x3]  ;;  %s6019_s3 = sld [smem:[#allocation3 + $0x16]] }
 0x11f   : > { %4491 = vmatprep.subr.mxu0 %v8617_v30  ;;  %4525 = vmatpush3.msra.mxu1 %v5013_v28  ;;  %v8620_v28 = vand.u32 4294901760, %v5023_v34 }
 0x120   : > { %4492 = vmatpush3.msra.mxu0 %v5023_v34  ;;  %4526 = vmatprep.subr.mxu1 %v8617_v30 }
 0x121   : > { %4493 = vmatprep.subr.mxu0 %v8617_v30  ;;  %4495 = vmatprep.mubr.msk.f32.mxu0 %vm4710_vm0, %v8617_v30 }
 0x122   : > { %4494 = vmatpush3.msra.mxu0 %v5033_v40  ;;  %4527 = vmatpush3.msra.mxu1 %v5025_v35  ;;  %v1209_v35 = vsel %vm1207_vm12, %v1195_v23, 0 }
 0x123   : > { %4528 = vmatprep.mubr.msk.f32.mxu1 %vm4710_vm0, %v8617_v30  ;;  %4496 = vmatmul.mubr.f32.vlgmr.msra.gmra.mxu0 %v779_v3  ;;  %v1242_v45 = vand.u32 4294901760, %v1209_v35 }
 0x124   : > { %4509 = vmatprep.subr.mxu0 %v8617_v30  ;;  %4529 = vmatmul.mubr.f32.vlgmr.msra.gmra.mxu1 %v778_v22 }
 0x125   : > { %4510 = vmatpush3.msra.mxu0 %v8618_v7  ;;  %4517 = vmatprep.mubr.msk.f32.mxu0 %vm4710_vm0, %v8617_v30  ;;  %v1319_v34 = vsub.f32 %v1209_v35, %v1242_v45 }
 0x126   : > { %4511 = vmatprep.subr.mxu0 %v8617_v30  ;;  %4536 = vmatprep.subr.mxu1 %v8617_v30 }
 0x127   : > { %4512 = vmatpush3.msra.mxu0 %v8619_v16  ;;  %4538 = vmatprep.mubr.msk.f32.mxu1 %vm4710_vm0, %v8617_v30  ;;  %v1320_v63 = vand.u32 4294901760, %v1319_v34 }
 0x128   : > { %4513 = vmatprep.subr.mxu0 %v8617_v30 }
 0x129   : > { %4514 = vmatpush3.msra.mxu0 %v8620_v28  ;;  %v1321_v40 = vsub.f32 %v1319_v34, %v1320_v63 }
 0x12a   : > { %4515 = vmatprep.subr.mxu0 %v8617_v30 }
 0x12b   : > { %4516 = vmatpush3.msra.mxu0 %v8621_v11  ;;  %v1322_v39 = vand.u32 4294901760, %v1321_v40 }
 0x12c   : > { %4518 = vmatmul.mubr.f32.vlgmr.msra.gmra.mxu0 %v778_v22  ;;  %4531 = vmatprep.subr.mxu0 %v8617_v30 }
 0x12d   : > { %4533 = vmatprep.mubr.msk.f32.mxu0 %vm4710_vm0, %v8617_v30  ;;  %4532 = vmatpush3.msra.mxu0 %v1242_v45 }
 0x12e   : > { %4541 = vmatprep.subr.mxu0 %v8617_v30  ;;  %4537 = vmatpush3.msra.mxu1 %v1322_v39 }
 0x12f   : > { %4546 = vmatprep.subr.mxu1 %v8617_v30 }
 0x1d2   : > { %v875_v36 = vpop.f32.mrf.mxu1 }
 0x1d4   : > { %v4486_v24 = vpop.f32.mrf.mxu1 }
 0x1d5   : > { %v5234_v24 = vsub.s32 0, %v5071_v41 }
 0x1da   : > { %v1032_v56 = vpop.f32.mrf.mxu1 }
 0x1db   : > { %v784_v48 = vpop.f32.mrf.mxu0 }
 0x1dc   : > { %v4508_v42 = vpop.f32.mrf.mxu1  ;;  %v785_v32 = vadd.f32 %v4268_v33, %v784_v48  ;;  %v1707_v33 = vsub.s32 2, %v5071_v41 }
 0x1dd   : > { %v4475_v46 = vpop.f32.mrf.mxu0  ;;  %v5238_v42 = vsub.s32 1, %v5071_v41 }
 0x1de   : > { %v876_v60 = vadd.f32 %v875_v36, %v785_v32 }
 0x1e3   : > { %v955_v19 = vpop.f32.mrf.mxu0 }
 0x1e4   : > { %v1190_v10 = vpop.f32.mrf.mxu1  ;;  %v956_v49 = vadd.f32 %v955_v19, %v876_v60  ;;  %v1726_v19 = vsub.s32 3, %v5071_v41 }
 0x1e5   : > { %v4497_v47 = vpop.f32.mrf.mxu0 }
 0x1e6   : > { %v4530_v59 = vpop.f32.mrf.mxu1  ;;  %v1033_v62 = vadd.f32 %v1032_v56, %v956_v49 }
 0x1ec   : > { %v1115_v52 = vpop.f32.mrf.mxu0 }
 0x1ed   : > { %v1116_v31 = vadd.f32 %v1115_v52, %v1033_v62 }
 0x1ee   : > { %v4519_v51 = vpop.f32.mrf.mxu0 }
 0x1ef   : > { %v1191_v53 = vadd.f32 %v1190_v10, %v1116_v31 }
 0x1f1   : > { %v1194_v54 = vmax.f32 %v1191_v53, 0.0 }
 0x1f3   : > { %v1205_v50 = vsel %vm1203_vm13, %v1194_v54, 0 }
 0x1f4   : > { %v1277_v17 = vand.u32 4294901760, %v1205_v50 }
 0x1f6   : > { %v1278_v38 = vsub.f32 %v1205_v50, %v1277_v17  ;;  %4539 = vmatmul.mubr.f32.vlgmr.msra.gmra.mxu1 %v1277_v17 }
 0x1f7   : > { %4547 = vmatpush3.msra.mxu1 %v1242_v45  ;;  %4548 = vmatprep.mubr.msk.f32.mxu1 %vm4710_vm0, %v8617_v30 }
 0x1f8   : > { %v1279_v21 = vand.u32 4294901760, %v1278_v38  ;;  %4556 = vmatprep.subr.mxu1 %v8617_v30 }
 0x1fa   : > { %4549 = vmatmul.mubr.f32.vlgmr.msra.gmra.mxu1 %v1279_v21  ;;  %v1280_v20 = vsub.f32 %v1278_v38, %v1279_v21 }
 0x1fb   : > { %4557 = vmatpush3.msra.mxu1 %v1242_v45  ;;  %4558 = vmatprep.mubr.msk.f32.mxu1 %vm4710_vm0, %v8617_v30 }
 0x1fc   : > { %v1281_v55 = vand.u32 4294901760, %v1280_v20 }
 0x1fe   : > { %4534 = vmatmul.mubr.f32.vlgmr.msra.gmra.mxu0 %v1281_v55  ;;  %4559 = vmatmul.mubr.f32.vlgmr.msra.gmra.mxu1 %v1277_v17 }
 0x1ff   : > { %4542 = vmatpush3.msra.mxu0 %v1319_v34  ;;  %4543 = vmatprep.mubr.msk.f32.mxu0 %vm4710_vm0, %v8617_v30 }
 0x200   : > { %4551 = vmatprep.subr.mxu0 %v8617_v30 }
 0x202   : > { %4544 = vmatmul.mubr.f32.vlgmr.msra.gmra.mxu0 %v1278_v38 }
 0x203   : > { %4552 = vmatpush3.msra.mxu0 %v1320_v63  ;;  %4553 = vmatprep.mubr.msk.f32.mxu0 %vm4710_vm0, %v8617_v30 }
 0x206   : > { %4554 = vmatmul.mubr.f32.vlgmr.msra.gmra.mxu0 %v1277_v17 }
 0x2b6   : > { %v1359_v57 = vpop.f32.mrf.mxu1 }
 0x2b8   : > { %v4540_v61 = vpop.f32.mrf.mxu1 }
 0x2ba   : > { %v1507_v43 = vpop.f32.mrf.mxu1 }
 0x2bc   : > { %v4550_v29 = vpop.f32.mrf.mxu1 }
 0x2be   : > { %v1283_v58 = vpop.f32.mrf.mxu0  ;;  %v1653_v22 = vpop.f32.mrf.mxu1 }
 0x2bf   : > { %v1284_v3 = vadd.f32 %v4269_v37, %v1283_v58 }
 0x2c0   : > { %v4535_v25 = vpop.f32.mrf.mxu0  ;;  %v4560_v44 = vpop.f32.mrf.mxu1 }
 0x2c1   : > { %v1360_v18 = vadd.f32 %v1359_v57, %v1284_v3 }
 0x2c2   : > { %v1433_v7 = vpop.f32.mrf.mxu0 }
 0x2c3   : > { %v1434_v16 = vadd.f32 %v1433_v7, %v1360_v18 }
 0x2c4   : > { %v4545_v28 = vpop.f32.mrf.mxu0 }
 0x2c5   : > { %v1508_v11 = vadd.f32 %v1507_v43, %v1434_v16 }
 0x2c6   : > { %v1581_v30 = vpop.f32.mrf.mxu0 }
 0x2c7   : > { %v1582_v23 = vadd.f32 %v1581_v30, %v1508_v11 }
 0x2c8   : > { %v4555_v35 = vpop.f32.mrf.mxu0 }
 0x2c9   : > { %v1654_v45 = vadd.f32 %v1653_v22, %v1582_v23  ;;  %v5291_v22 = vstv %s4343_s19  ;;  %s8382_s19 = smov 17  }
 0x2cb   : > { %v1658_v34 = vrot.slane %v1654_v45, 4 }
 0x2cd   : > { %v1660_v63 = vadd.f32 %v1658_v34, %v1654_v45 }
 0x2cf   : > { %v4270_v40 = vmul.f32 -1.442695, %v1660_v63 }
 0x2d1   : > { %4641 = vpow2.f32 %v4270_v40 }
 0x2de   : > { %v4642_v39 = vpop.eup %4641 }
 0x2df   : > { %v1664_v36 = vadd.f32 1.0, %v4642_v39  ;;  %v8639_v39 = vld [vmem:[#allocation15_spill] sm:$0xff] }
 0x2e1   : > { %4643 = vrcp.f32 %v1664_v36 }
 0x2ee   : > { %v4644_v56 = vpop.eup %4643 }
 0x2ef   : > { %v1670_v48 = vrot.slane %v4644_v56, %v5234_v24  ;;  %v1689_v46 = vrot.slane %v4644_v56, %v5238_v42  ;;  %v1708_v32 = vrot.slane %v4644_v56, %v1707_v33  ;;  %v1727_v10 = vrot.slane %v4644_v56, %v1726_v19  ;;  %v8641_v56 = vld [vmem:[#allocation16_spill] sm:$0xff] }
 0x2f1   : > { %1676 = vbcast.lane.b32.xlu1 %v1670_v48, 264  ;;  %1672 = vbcast.lane.b32.xlu0 %v1670_v48, 256 }
 0x2f5   : > { %1680 = vbcast.lane.b32.xlu1 %v1670_v48, 272  ;;  %1691 = vbcast.lane.b32.xlu0 %v1689_v46, 256 }
 0x2f9   : > { %1684 = vbcast.lane.b32.xlu1 %v1670_v48, 280  ;;  %1699 = vbcast.lane.b32.xlu0 %v1689_v46, 272 }
 0x2fd   : > { %1695 = vbcast.lane.b32.xlu1 %v1689_v46, 264  ;;  %1710 = vbcast.lane.b32.xlu0 %v1708_v32, 256 }
 0x301   : > { %1703 = vbcast.lane.b32.xlu1 %v1689_v46, 280  ;;  %1718 = vbcast.lane.b32.xlu0 %v1708_v32, 272 }
 0x305   : > { %1714 = vbcast.lane.b32.xlu1 %v1708_v32, 264  ;;  %1729 = vbcast.lane.b32.xlu0 %v1727_v10, 256 }
 0x309   : > { %1722 = vbcast.lane.b32.xlu1 %v1708_v32, 280  ;;  %1737 = vbcast.lane.b32.xlu0 %v1727_v10, 272 }
 0x30d   : > { %1733 = vbcast.lane.b32.xlu1 %v1727_v10, 264 }
 0x311   : > { %1741 = vbcast.lane.b32.xlu1 %v1727_v10, 280 }
 0x363   : > { %v1677_v60 = vpop.permute.xlu1 %1676  ;;  %v1673_v47 = vpop.permute.xlu0 %1672 }
 0x364   : > { %v5244_v59 = vmul.f32 %v1677_v60, %v4888_v8  ;;  %v5247_v49 = vmul.f32 %v1677_v60, %v4891_v9  ;;  %v5250_v62 = vmul.f32 %v1673_v47, %v4872_v2  ;;  %v5253_v52 = vmul.f32 %v1673_v47, %v4877_v4 }
 0x366   : > { %8625 = vst [vmem:[#allocation23_spill] sm:$0xff] %v5244_v59  ;;  %8626 = vst [vmem:[#allocation24_spill] sm:$0xff] %v5247_v49  ;;  %v1839_v9 = vmax.f32 %v5250_v62, %v5244_v59  ;;  %v1848_v2 = vmax.f32 %v5253_v52, %v5247_v49  ;;  %v1911_v4 = vadd.f32 %v5244_v59, %v5250_v62 }
 0x367   : > { %8627 = vst [vmem:[#allocation25_spill] sm:$0xff] %v5250_v62  ;;  %8628 = vst [vmem:[#allocation26_spill] sm:$0xff] %v5253_v52  ;;  %v1681_v31 = vpop.permute.xlu1 %1680  ;;  %v1692_v8 = vpop.permute.xlu0 %1691  ;;  %v1920_v54 = vadd.f32 %v5247_v49, %v5253_v52 }
 0x368   : > { %v5256_v51 = vmul.f32 %v1681_v31, %v4904_v14  ;;  %v5259_v53 = vmul.f32 %v1681_v31, %v4907_v15  ;;  %v5284_v37 = vmul.f32 %v1692_v8, %v4866_v0  ;;  %v5287_v58 = vmul.f32 %v1692_v8, %v4869_v1 }
 0x36a   : > { %8629 = vst [vmem:[#allocation27_spill] sm:$0xff] %v5256_v51  ;;  %8630 = vst [vmem:[#allocation28_spill] sm:$0xff] %v5259_v53  ;;  %v1840_v50 = vmax.f32 %v1839_v9, %v5256_v51  ;;  %v1849_v14 = vmax.f32 %v1848_v2, %v5259_v53  ;;  %v1912_v15 = vadd.f32 %v1911_v4, %v5256_v51 }
 0x36b   : > { %v1685_v17 = vpop.permute.xlu1 %1684  ;;  %v1921_v38 = vadd.f32 %v1920_v54, %v5259_v53  ;;  %v1700_v29 = vpop.permute.xlu0 %1699  ;;  %8633 = vst [vmem:[#allocation31_spill] sm:$0xff] %v5284_v37  ;;  %8634 = vst [vmem:[#allocation32_spill] sm:$0xff] %v5287_v58 }
 0x36c   : > { %v5274_v21 = vmul.f32 %v1685_v17, %v4936_v26  ;;  %v5277_v20 = vmul.f32 %v1685_v17, %v4939_v27  ;;  %v5289_v26 = vstv %s4342_s18  ;;  %v5294_v7 = vmul.f32 %v1700_v29, %v4898_v12  ;;  %s4726_s18 = smov 18  }
 0x36d   : > { %v5297_v16 = vmul.f32 %v1700_v29, %v4901_v13 }
 0x36e   : > { %8631 = vst [vmem:[#allocation29_spill] sm:$0xff] %v5274_v21  ;;  %8632 = vst [vmem:[#allocation30_spill] sm:$0xff] %v5277_v20  ;;  %v1841_v55 = vmax.f32 %v1840_v50, %v5274_v21  ;;  %v1850_v57 = vmax.f32 %v1849_v14, %v5277_v20  ;;  %v1913_v61 = vadd.f32 %v1912_v15, %v5274_v21 }
 0x36f   : > { %v1922_v43 = vadd.f32 %v1921_v38, %v5277_v20  ;;  %v1696_v27 = vpop.permute.xlu1 %1695  ;;  %8635 = vst [vmem:[#allocation33_spill] sm:$0xff] %v5294_v7  ;;  %8636 = vst [vmem:[#allocation34_spill] sm:$0xff] %v5297_v16  ;;  %v1711_v14 = vpop.permute.xlu0 %1710 }
 0x370   : > { %v1842_v3 = vrot.slane %v1841_v55, 4  ;;  %v1851_v25 = vrot.slane %v1850_v57, 4  ;;  %v1914_v44 = vrot.slane %v1913_v61, 4  ;;  %v5300_v0 = vmul.f32 %v1696_v27, %v4880_v5 }
 0x371   : > { %v1923_v18 = vrot.slane %v1922_v43, 4  ;;  %v5303_v1 = vmul.f32 %v1696_v27, %v4883_v6 }
 0x372   : > { %8637 = vst [vmem:[#allocation35_spill] sm:$0xff] %v5300_v0  ;;  %v1843_v28 = vmax.f32 %v1841_v55, %v1842_v3  ;;  %v1852_v11 = vmax.f32 %v1850_v57, %v1851_v25  ;;  %v1915_v30 = vadd.f32 %v1914_v44, %v1913_v61  ;;  %v1857_v35 = vmax.f32 %v5284_v37, %v5300_v0 }
 0x373   : > { %8638 = vst [vmem:[#allocation36_spill] sm:$0xff] %v5303_v1  ;;  %v1924_v23 = vadd.f32 %v1923_v18, %v1922_v43  ;;  %v1866_v12 = vmax.f32 %v5287_v58, %v5303_v1  ;;  %v1929_v13 = vadd.f32 %v5300_v0, %v5284_v37  ;;  %v1938_v5 = vadd.f32 %v5303_v1, %v5287_v58  ;;  %v1704_v45 = vpop.permute.xlu1 %1703 }
 0x374   : > { %v1844_v34 = vrot.slane %v1843_v28, 2  ;;  %v1853_v6 = vrot.slane %v1852_v11, 2  ;;  %v1916_v63 = vrot.slane %v1915_v30, 2  ;;  %v5314_v36 = vmul.f32 %v1704_v45, %v8639_v39 }
 0x375   : > { %v1925_v40 = vrot.slane %v1924_v23, 2  ;;  %v5317_v48 = vmul.f32 %v1704_v45, %v8641_v56  ;;  %v1858_v46 = vmax.f32 %v1857_v35, %v5294_v7  ;;  %v1867_v33 = vmax.f32 %v1866_v12, %v5297_v16 }
 0x376   : > { %8640 = vst [vmem:[#allocation15_spill] sm:$0xff] %v5314_v36  ;;  %v1845_v32 = vmax.f32 %v1843_v28, %v1844_v34  ;;  %v1854_v19 = vmax.f32 %v1852_v11, %v1853_v6  ;;  %v1917_v10 = vadd.f32 %v1916_v63, %v1915_v30  ;;  %v1930_v8 = vadd.f32 %v1929_v13, %v5294_v7  ;;  %v8643_v11 = vld [vmem:[#allocation13_spill] sm:$0xff] }
 0x377   : > { %8642 = vst [vmem:[#allocation16_spill] sm:$0xff] %v5317_v48  ;;  %v1926_v60 = vadd.f32 %v1925_v40, %v1924_v23  ;;  %v1859_v47 = vmax.f32 %v1858_v46, %v5314_v36  ;;  %v1868_v31 = vmax.f32 %v1867_v33, %v5317_v48  ;;  %v1939_v9 = vadd.f32 %v1938_v5, %v5297_v16  ;;  %v8645_v23 = vld [vmem:[#allocation14_spill] sm:$0xff]  ;;  %v1715_v12 = vpop.permute.xlu1 %1714 }
 0x378   : > { %v1846_v2 = vrot.slane %v1845_v32, 1  ;;  %v1855_v4 = vrot.slane %v1854_v19, 1  ;;  %v1918_v54 = vrot.slane %v1917_v10, 1  ;;  %v1931_v38 = vadd.f32 %v1930_v8, %v5314_v36  ;;  %v8649_v8 = vld [vmem:[#allocation12_spill] sm:$0xff] }
 0x379   : > { %v1927_v50 = vrot.slane %v1926_v60, 1  ;;  %v1860_v17 = vrot.slane %v1859_v47, 4  ;;  %v1869_v15 = vrot.slane %v1868_v31, 4  ;;  %v1940_v55 = vadd.f32 %v1939_v9, %v5317_v48 }
 0x37a   : > { %v5327_v57 = vmax.f32 %v1845_v32, %v1846_v2  ;;  %v5329_v61 = vmax.f32 %v1854_v19, %v1855_v4  ;;  %v1919_v43 = vadd.f32 %v1918_v54, %v1917_v10  ;;  %v1932_v25 = vrot.slane %v1931_v38, 4  ;;  %v1719_v19 = vpop.permute.xlu0 %1718 }
 0x37b   : > { %v1928_v29 = vadd.f32 %v1927_v50, %v1926_v60  ;;  %v1861_v27 = vmax.f32 %v1859_v47, %v1860_v17  ;;  %v1870_v3 = vmax.f32 %v1868_v31, %v1869_v15  ;;  %v1941_v44 = vrot.slane %v1940_v55, 4  ;;  %v8647_v47 = vld [vmem:[#allocation11_spill] sm:$0xff] }
 0x37c   : > { %v5331_v18 = vmul.f32 0.03125, %v1919_v43  ;;  %v5336_v30 = vmul.f32 %v1711_v14, %v8643_v11  ;;  %v5339_v35 = vmul.f32 %v1711_v14, %v8645_v23  ;;  %v1933_v45 = vadd.f32 %v1932_v25, %v1931_v38  ;;  %v1723_v14 = vpop.permute.xlu1 %1722  ;;  %v8651_v43 = vld [vmem:[#allocation17_spill] sm:$0xff] }
 0x37d   : > { %v5333_v28 = vmul.f32 0.03125, %v1928_v29  ;;  %v1862_v13 = vrot.slane %v1861_v27, 2  ;;  %v1871_v5 = vrot.slane %v1870_v3, 2  ;;  %v1942_v34 = vadd.f32 %v1941_v44, %v1940_v55 }
 0x37e   : > { %8644 = vst [vmem:[#allocation13_spill] sm:$0xff] %v5336_v30  ;;  %8646 = vst [vmem:[#allocation14_spill] sm:$0xff] %v5339_v35  ;;  %v2987_v6 = vmul.f32 %v5289_v26, %v5327_v57  ;;  %v2988_v63 = vmul.f32 %v5289_v26, %v5329_v61  ;;  %v2997_v40 = vmul.f32 %v5291_v22, %v5331_v18  ;;  %v1934_v33 = vrot.slane %v1933_v45, 2 }
 0x37f   : > { %v2998_v39 = vmul.f32 %v5291_v22, %v5333_v28  ;;  %v1863_v56 = vmax.f32 %v1861_v27, %v1862_v13  ;;  %v1872_v46 = vmax.f32 %v1870_v3, %v1871_v5  ;;  %v1943_v32 = vrot.slane %v1942_v34, 2  ;;  %v8653_v27 = vld [vmem:[#allocation18_spill] sm:$0xff]  ;;  %v1730_v5 = vpop.permute.xlu0 %1729 }
 0x380   : > { %v5349_v10 = vadd.f32 %v2997_v40, %v2987_v6  ;;  %v5354_v31 = vmul.f32 %v1715_v12, %v8647_v47  ;;  %v5357_v9 = vmul.f32 %v1715_v12, %v8649_v8  ;;  %v1935_v54 = vadd.f32 %v1934_v33, %v1933_v45  ;;  %v8655_v45 = vld [vmem:[#allocation19_spill] sm:$0xff]  ;;  %v8657_v6 = vld [vmem:[#allocation20_spill] sm:$0xff] }
 0x381   : > { %v5351_v60 = vadd.f32 %v2998_v39, %v2988_v63  ;;  %v1864_v2 = vrot.slane %v1863_v56, 1  ;;  %v1873_v4 = vrot.slane %v1872_v46, 1  ;;  %v1944_v50 = vadd.f32 %v1943_v32, %v1942_v34  ;;  %v4653_v32 = vld [vmem:[%s4863_s24 + $0xc0] sm:$0xff] }
 0x382   : > { %8648 = vst [vmem:[#allocation11_spill] sm:$0xff] %v5354_v31  ;;  %8650 = vst [vmem:[#allocation12_spill] sm:$0xff] %v5357_v9  ;;  %v1936_v17 = vrot.slane %v1935_v54, 1  ;;  %v1875_v38 = vmax.f32 %v5336_v30, %v5354_v31  ;;  %v1884_v55 = vmax.f32 %v5339_v35, %v5357_v9  ;;  %v5364_v29 = vmul.f32 %v1719_v19, %v8651_v43 }
 0x383   : > { %v1945_v15 = vrot.slane %v1944_v50, 1  ;;  %v5367_v3 = vmul.f32 %v1719_v19, %v8653_v27  ;;  %v1947_v25 = vadd.f32 %v5354_v31, %v5336_v30  ;;  %v1956_v44 = vadd.f32 %v5357_v9, %v5339_v35  ;;  %v4654_v19 = vld [vmem:[%s4863_s24 + $0xc8] sm:$0xff] }
 0x384   : > { %8652 = vst [vmem:[#allocation17_spill] sm:$0xff] %v5364_v29  ;;  %v5373_v11 = vmax.f32 %v1863_v56, %v1864_v2  ;;  %v5375_v23 = vmax.f32 %v1872_v46, %v1873_v4  ;;  %v1937_v12 = vadd.f32 %v1936_v17, %v1935_v54  ;;  %v5378_v34 = vmul.f32 %v1723_v14, %v8655_v45  ;;  %v1734_v4 = vpop.permute.xlu1 %1733 }
 0x385   : > { %8654 = vst [vmem:[#allocation18_spill] sm:$0xff] %v5367_v3  ;;  %v1946_v13 = vadd.f32 %v1945_v15, %v1944_v50  ;;  %v5381_v63 = vmul.f32 %v1723_v14, %v8657_v6  ;;  %v1876_v33 = vmax.f32 %v1875_v38, %v5364_v29  ;;  %v1885_v56 = vmax.f32 %v1884_v55, %v5367_v3  ;;  %v4341_v15 = vld [vmem:[%s8661_s5 + $0x30] ss:$8 sm:$0x3]  ;;  %s6050_s5 = sld [smem:[#allocation3 + $0x1e]] }
 0x386   : > { %8656 = vst [vmem:[#allocation19_spill] sm:$0xff] %v5378_v34  ;;  %v5383_v40 = vmul.f32 0.03125, %v1937_v12  ;;  %v5390_v46 = vmul.f32 %v4653_v32, %v1730_v5  ;;  %v5393_v47 = vmul.f32 %v4654_v19, %v1730_v5  ;;  %v1948_v8 = vadd.f32 %v1947_v25, %v5364_v29  ;;  %v4655_v12 = vld [vmem:[%s4863_s24 + $0xd0] sm:$0xff]  ;;  %v4656_v5 = vld [vmem:[%s4863_s24 + $0xd8] sm:$0xff] }
 0x387   : > { %8658 = vst [vmem:[#allocation20_spill] sm:$0xff] %v5381_v63  ;;  %v5385_v39 = vmul.f32 0.03125, %v1946_v13  ;;  %v1957_v2 = vadd.f32 %v1956_v44, %v5367_v3  ;;  %v2989_v54 = vmul.f32 %v5289_v26, %v5373_v11  ;;  %v2990_v50 = vmul.f32 %v5289_v26, %v5375_v23  ;;  %v4658_v3 = vld [vmem:[%s4863_s24 + $0xe8] sm:$0xff] }
 0x388   : > { %8659 = vst [vmem:[#allocation37_spill] sm:$0xff] %v5390_v46  ;;  %8660 = vst [vmem:[#allocation38_spill] sm:$0xff] %v5393_v47  ;;  %v2999_v14 = vmul.f32 %v5291_v22, %v5383_v40  ;;  %v1877_v38 = vmax.f32 %v1876_v33, %v5378_v34  ;;  %v1886_v55 = vmax.f32 %v1885_v56, %v5381_v63  ;;  %v1738_v56 = vpop.permute.xlu0 %1737 }
 0x389   : > { %v3000_v17 = vmul.f32 %v5291_v22, %v5385_v39  ;;  %v1949_v43 = vadd.f32 %v1948_v8, %v5378_v34  ;;  %v1958_v27 = vadd.f32 %v1957_v2, %v5381_v63  ;;  %v5415_v13 = vmul.f32 %v4655_v12, %v1734_v4  ;;  %v4657_v63 = vld [vmem:[%s4863_s24 + $0xe0] sm:$0xff] }
 0x38a   : > { %v3007_v25 = vadd.f32 %v2999_v14, %v2989_v54  ;;  %v5418_v45 = vmul.f32 %v4656_v5, %v1734_v4  ;;  %v1878_v6 = vrot.slane %v1877_v38, 4  ;;  %v1887_v32 = vrot.slane %v1886_v55, 4  ;;  %v1742_v5 = vpop.permute.xlu1 %1741 }
 0x38b   : > { %v5412_v44 = vadd.f32 %v3000_v17, %v2990_v50  ;;  %8662 = vst [vmem:[#allocation39_spill] sm:$0xff] %v5415_v13  ;;  %v1950_v33 = vrot.slane %v1949_v43, 4  ;;  %v1959_v19 = vrot.slane %v1958_v27, 4  ;;  %v5421_v8 = vrot.slane %v4341_v15, %v5234_v24 }
 0x38c   : > { %8663 = vst [vmem:[#allocation40_spill] sm:$0xff] %v5418_v45  ;;  %v5424_v2 = vrot.slane %v4341_v15, %v5238_v42  ;;  %v1893_v54 = vmax.f32 %v5390_v46, %v5415_v13  ;;  %v1902_v50 = vmax.f32 %v5393_v47, %v5418_v45  ;;  %v1879_v4 = vmax.f32 %v1877_v38, %v1878_v6  ;;  %v4659_v6 = vld [vmem:[%s4863_s24 + $0xf0] sm:$0xff] }
 0x38d   : > { %v1888_v14 = vmax.f32 %v1886_v55, %v1887_v32  ;;  %v1951_v17 = vadd.f32 %v1950_v33, %v1949_v43  ;;  %v1960_v12 = vadd.f32 %v1959_v19, %v1958_v27  ;;  %v5431_v34 = vmul.f32 %v4657_v63, %v1738_v56  ;;  %v4660_v27 = vld [vmem:[%s4863_s24 + $0xf8] sm:$0xff]  ;;  %s4711_s24 = smov 51  }
 0x38e   : > { %v5434_v29 = vmul.f32 %v4658_v3, %v1738_v56  ;;  %v1965_v15 = vadd.f32 %v5415_v13, %v5390_v46  ;;  %v1974_v9 = vadd.f32 %v5418_v45, %v5393_v47  ;;  %v1880_v31 = vrot.slane %v1879_v4, 2 }
 0x38f   : > { %8664 = vst [vmem:[#allocation41_spill] sm:$0xff] %v5431_v34  ;;  %v1889_v35 = vrot.slane %v1888_v14, 2  ;;  %v1952_v38 = vrot.slane %v1951_v17, 2  ;;  %v1961_v55 = vrot.slane %v1960_v12, 2  ;;  %v5441_v43 = vmul.f32 %v4659_v6, %v1742_v5 }
 0x390   : > { %8665 = vst [vmem:[#allocation42_spill] sm:$0xff] %v5434_v29  ;;  %v5444_v32 = vmul.f32 %v4660_v27, %v1742_v5  ;;  %v1894_v63 = vmax.f32 %v1893_v54, %v5431_v34  ;;  %v1903_v3 = vmax.f32 %v1902_v50, %v5434_v29  ;;  %v1881_v33 = vmax.f32 %v1879_v4, %v1880_v31 }
 0x391   : > { %8666 = vst [vmem:[#allocation43_spill] sm:$0xff] %v5441_v43  ;;  %v1890_v19 = vmax.f32 %v1888_v14, %v1889_v35  ;;  %v1953_v56 = vadd.f32 %v1952_v38, %v1951_v17  ;;  %v1962_v13 = vadd.f32 %v1961_v55, %v1960_v12  ;;  %v1966_v46 = vadd.f32 %v1965_v15, %v5431_v34 }
 0x392   : > { %8667 = vst [vmem:[#allocation44_spill] sm:$0xff] %v5444_v32  ;;  %v1895_v45 = vmax.f32 %v1894_v63, %v5441_v43  ;;  %v1904_v47 = vmax.f32 %v1903_v3, %v5444_v32  ;;  %v1975_v6 = vadd.f32 %v1974_v9, %v5434_v29  ;;  %v1882_v30 = vrot.slane %v1881_v33, 1 }
 0x393   : > { %v1891_v48 = vrot.slane %v1890_v19, 1  ;;  %v1954_v5 = vrot.slane %v1953_v56, 1  ;;  %v1963_v27 = vrot.slane %v1962_v13, 1  ;;  %v1967_v50 = vadd.f32 %v1966_v46, %v5441_v43 }
 0x394   : > { %v1896_v36 = vrot.slane %v1895_v45, 4  ;;  %v1905_v54 = vrot.slane %v1904_v47, 4  ;;  %v1976_v35 = vadd.f32 %v1975_v6, %v5444_v32  ;;  %v1883_v31 = vmax.f32 %v1881_v33, %v1882_v30 }
 0x395   : > { %v1892_v4 = vmax.f32 %v1890_v19, %v1891_v48  ;;  %v1955_v14 = vadd.f32 %v1954_v5, %v1953_v56  ;;  %v1964_v17 = vadd.f32 %v1963_v27, %v1962_v13  ;;  %v1968_v55 = vrot.slane %v1967_v50, 4 }
 0x396   : > { %v1897_v12 = vmax.f32 %v1895_v45, %v1896_v36  ;;  %v1906_v38 = vmax.f32 %v1904_v47, %v1905_v54  ;;  %v1977_v15 = vrot.slane %v1976_v35, 4  ;;  %v3024_v9 = vmul.f32 %v5421_v8, %v5349_v10 }
 0x397   : > { %v3026_v63 = vmul.f32 %v5421_v8, %v3007_v25  ;;  %v5457_v3 = vmul.f32 0.03125, %v1955_v14  ;;  %v5459_v29 = vmul.f32 0.03125, %v1964_v17  ;;  %v3025_v46 = vmul.f32 %v5424_v2, %v5351_v60 }
 0x398   : > { %v3027_v48 = vmul.f32 %v5424_v2, %v5412_v44  ;;  %v1898_v30 = vrot.slane %v1897_v12, 2  ;;  %v1907_v36 = vrot.slane %v1906_v38, 2  ;;  %v2991_v47 = vmul.f32 %v5289_v26, %v1883_v31 }
 0x399   : > { %v2992_v13 = vmul.f32 %v5289_v26, %v1892_v4  ;;  %v3001_v10 = vmul.f32 %v5291_v22, %v5457_v3  ;;  %v3002_v25 = vmul.f32 %v5291_v22, %v5459_v29  ;;  %v1969_v19 = vadd.f32 %v1968_v55, %v1967_v50 }
 0x39a   : > { %v1899_v45 = vmax.f32 %v1897_v12, %v1898_v30  ;;  %v1908_v33 = vmax.f32 %v1906_v38, %v1907_v36  ;;  %v1978_v56 = vadd.f32 %v1977_v15, %v1976_v35  ;;  %v2000_v60 = vsel %vm586_vm4, %v5373_v11, %v5327_v57 }
 0x39b   : > { %v3040_v44 = vrot.slane %v3026_v63, 7  ;;  %v3009_v6 = vadd.f32 %v3001_v10, %v2991_v47  ;;  %v3010_v5 = vadd.f32 %v3002_v25, %v2992_v13  ;;  %v1970_v14 = vrot.slane %v1969_v19, 2 }
 0x39c   : > { %v1900_v27 = vrot.slane %v1899_v45, 1  ;;  %v1909_v54 = vrot.slane %v1908_v33, 1  ;;  %v1979_v17 = vrot.slane %v1978_v56, 2  ;;  %v2003_v32 = vsel %vm586_vm4, %v5375_v23, %v5329_v61 }
 0x39d   : > { %v3046_v43 = vrot.slane %v3027_v48, 7  ;;  %v2001_v12 = vsel %vm588_vm6, %v1883_v31, %v2000_v60  ;;  %v3028_v50 = vmul.f32 %v5421_v8, %v3009_v6  ;;  %v1971_v55 = vadd.f32 %v1970_v14, %v1969_v19 }
 0x39e   : > { %v1901_v35 = vmax.f32 %v1899_v45, %v1900_v27  ;;  %v1910_v38 = vmax.f32 %v1908_v33, %v1909_v54  ;;  %v1980_v57 = vadd.f32 %v1979_v17, %v1978_v56  ;;  %v2004_v11 = vsel %vm588_vm6, %v1892_v4, %v2003_v32 }
 0x39f   : > { %v3029_v15 = vmul.f32 %v5424_v2, %v3010_v5  ;;  %v3041_v63 = vsel %vm586_vm4, %v3040_v44, %v3024_v9  ;;  %v3042_v30 = vrot.slane %v3028_v50, 6  ;;  %v1972_v36 = vrot.slane %v1971_v55, 1 }
 0x3a0   : > { %v1981_v47 = vrot.slane %v1980_v57, 1  ;;  %v5483_v61 = vsel %vm590_vm8, %v1901_v35, %v2001_v12  ;;  %v5486_v23 = vsel %vm590_vm8, %v1910_v38, %v2004_v11  ;;  %v3047_v9 = vsel %vm586_vm4, %v3046_v43, %v3025_v46 }
 0x3a1   : > { %2010 = vrot.lane.b32.xlu1 %v5486_v23, %s4711_s24  ;;  %2008 = vrot.lane.b32.xlu0 %v5483_v61, %s4711_s24  ;;  %v3043_v32 = vsel %vm588_vm6, %v3042_v30, %v3041_v63  ;;  %v1973_v31 = vadd.f32 %v1972_v36, %v1971_v55  ;;  %v3048_v48 = vrot.slane %v3029_v15, 6  ;;  %v2993_v45 = vmul.f32 %v5289_v26, %v1901_v35 }
 0x3a2   : > { %v1982_v4 = vadd.f32 %v1981_v47, %v1980_v57  ;;  %v2994_v33 = vmul.f32 %v5289_v26, %v1910_v38  ;;  %v2023_v0 = vsel %vm586_vm4, %v5383_v40, %v5331_v18  ;;  %v2026_v58 = vsel %vm586_vm4, %v5385_v39, %v5333_v28 }
 0x3a3   : > { %v5494_v13 = vmul.f32 0.03125, %v1973_v31  ;;  %v3049_v25 = vsel %vm588_vm6, %v3048_v48, %v3047_v9  ;;  %v2024_v37 = vsel %vm588_vm6, %v5457_v3, %v2023_v0  ;;  %v2027_v20 = vsel %vm588_vm6, %v5459_v29, %v2026_v58 }
 0x3a4   : > { %v5496_v10 = vmul.f32 0.03125, %v1982_v4 }
 0x3a5   : > { %2065 = vrot.lane.b32.xlu1 %v5486_v23, %s4712_s25  ;;  %2063 = vrot.lane.b32.xlu0 %v5483_v61, %s4712_s25  ;;  %v3003_v43 = vmul.f32 %v5291_v22, %v5494_v13 }
 0x3a6   : > { %v3004_v46 = vmul.f32 %v5291_v22, %v5496_v10  ;;  %v5797_v18 = vsel %vm590_vm8, %v5496_v10, %v2027_v20 }
 0x3a7   : > { %v3011_v19 = vadd.f32 %v3003_v43, %v2993_v45 }
 0x3a8   : > { %v3012_v56 = vadd.f32 %v3004_v46, %v2994_v33 }
 0x3a9   : > { %2105 = vrot.lane.b32.xlu1 %v5486_v23, %s4713_s26  ;;  %2103 = vrot.lane.b32.xlu0 %v5483_v61, %s4713_s26  ;;  %v3030_v60 = vmul.f32 %v5421_v8, %v3011_v19 }
 0x3aa   : > { %v3031_v44 = vmul.f32 %v5424_v2, %v3012_v56 }
 0x3ab   : > { %v3044_v26 = vrot.slane %v3030_v60, 5 }
 0x3ac   : > { %v3050_v6 = vrot.slane %v3031_v44, 5 }
 0x3ad   : > { %2145 = vrot.lane.b32.xlu1 %v5486_v23, %s4714_s28  ;;  %2143 = vrot.lane.b32.xlu0 %v5483_v61, %s4714_s28  ;;  %v5520_v22 = vsel %vm590_vm8, %v3044_v26, %v3043_v32 }
 0x3ae   : > { %8668 = vst [vmem:[#allocation45_spill] sm:$0xff] %v5520_v22  ;;  %v5523_v5 = vsel %vm590_vm8, %v3050_v6, %v3049_v25 }
 0x3af   : > { %8669 = vst [vmem:[#allocation46_spill] sm:$0xff] %v5523_v5 }
 0x3b1   : > { %2185 = vrot.lane.b32.xlu1 %v5486_v23, %s4715_s29  ;;  %2183 = vrot.lane.b32.xlu0 %v5483_v61, %s4715_s29 }
 0x3b5   : > { %2225 = vrot.lane.b32.xlu1 %v5486_v23, %s4716_s30  ;;  %2223 = vrot.lane.b32.xlu0 %v5483_v61, %s4716_s30 }
 0x3b9   : > { %2265 = vrot.lane.b32.xlu1 %v5486_v23, %s4717_s9  ;;  %2263 = vrot.lane.b32.xlu0 %v5483_v61, %s4717_s9 }
 0x3bd   : > { %2305 = vrot.lane.b32.xlu1 %v5486_v23, %s4718_s10  ;;  %2303 = vrot.lane.b32.xlu0 %v5483_v61, %s4718_s10 }
 0x3c1   : > { %2345 = vrot.lane.b32.xlu1 %v5486_v23, %s4719_s11  ;;  %2343 = vrot.lane.b32.xlu0 %v5483_v61, %s4719_s11 }
 0x3c5   : > { %2385 = vrot.lane.b32.xlu1 %v5486_v23, %s4720_s12  ;;  %2383 = vrot.lane.b32.xlu0 %v5483_v61, %s4720_s12 }
 0x3c9   : > { %2425 = vrot.lane.b32.xlu1 %v5486_v23, %s4721_s13  ;;  %2423 = vrot.lane.b32.xlu0 %v5483_v61, %s4721_s13 }
 0x3cd   : > { %2465 = vrot.lane.b32.xlu1 %v5486_v23, %s4722_s14  ;;  %2463 = vrot.lane.b32.xlu0 %v5483_v61, %s4722_s14 }
 0x3d1   : > { %2505 = vrot.lane.b32.xlu1 %v5486_v23, %s4723_s15  ;;  %2503 = vrot.lane.b32.xlu0 %v5483_v61, %s4723_s15 }
 0x3d5   : > { %2545 = vrot.lane.b32.xlu1 %v5486_v23, %s4724_s16  ;;  %2543 = vrot.lane.b32.xlu0 %v5483_v61, %s4724_s16 }
 0x3d9   : > { %2585 = vrot.lane.b32.xlu1 %v5486_v23, %s4725_s17  ;;  %2583 = vrot.lane.b32.xlu0 %v5483_v61, %s4725_s17 }
 0x3dd   : > { %2625 = vrot.lane.b32.xlu1 %v5486_v23, %s4726_s18  ;;  %2623 = vrot.lane.b32.xlu0 %v5483_v61, %s4726_s18 }
 0x3e1   : > { %2665 = vrot.lane.b32.xlu1 %v5486_v23, %s8382_s19  ;;  %2663 = vrot.lane.b32.xlu0 %v5483_v61, %s8382_s19  ;;  %s8390_s19 = smov 13  }
 0x3e5   : > { %2705 = vrot.lane.b32.xlu1 %v5486_v23, %s8384_s22  ;;  %2703 = vrot.lane.b32.xlu0 %v5483_v61, %s8384_s22  ;;  %s8392_s22 = smov 3  }
 0x3e9   : > { %2745 = vrot.lane.b32.xlu1 %v5486_v23, %s8386_s23  ;;  %2743 = vrot.lane.b32.xlu0 %v5483_v61, %s8386_s23  ;;  %s8394_s23 = smov 2  }
 0x3ed   : > { %2785 = vrot.lane.b32.xlu1 %v5486_v23, %s8388_s21  ;;  %2783 = vrot.lane.b32.xlu0 %v5483_v61, %s8388_s21  ;;  %s8396_s21 = smov 1  }
 0x3f1   : > { %2825 = vrot.lane.b32.xlu1 %v5486_v23, %s8390_s19  ;;  %2823 = vrot.lane.b32.xlu0 %v5483_v61, %s8390_s19  ;;  %s8398_s19 = smov 127  }
 0x3f5   : > { %2865 = vrot.lane.b32.xlu1 %v5486_v23, %s8392_s22  ;;  %2863 = vrot.lane.b32.xlu0 %v5483_v61, %s8392_s22  ;;  %s8400_s22 = smov 126  }
 0x3f9   : > { %2905 = vrot.lane.b32.xlu1 %v5486_v23, %s8394_s23  ;;  %2903 = vrot.lane.b32.xlu0 %v5483_v61, %s8394_s23  ;;  %s8483_s23 = smov 125  }
 0x3fd   : > { %2945 = vrot.lane.b32.xlu1 %v5486_v23, %s8396_s21  ;;  %2943 = vrot.lane.b32.xlu0 %v5483_v61, %s8396_s21  ;;  %s8402_s21 = smov 115  }
 0x401   : > { %3058 = vrot.lane.b32.xlu1 %v5486_v23, %s8398_s19  ;;  %3056 = vrot.lane.b32.xlu0 %v5483_v61, %s8398_s19  ;;  %s8404_s19 = smov 114  }
 0x405   : > { %3098 = vrot.lane.b32.xlu1 %v5486_v23, %s8400_s22  ;;  %3096 = vrot.lane.b32.xlu0 %v5483_v61, %s8400_s22  ;;  %s8406_s22 = smov 113  }
 0x409   : > { %3138 = vrot.lane.b32.xlu1 %v5486_v23, %s8483_s23  ;;  %3136 = vrot.lane.b32.xlu0 %v5483_v61, %s8483_s23  ;;  %s6003_s23 = sld [smem:[#allocation3 + $0x12]] }
 0x40d   : > { %3178 = vrot.lane.b32.xlu1 %v5486_v23, %s8402_s21  ;;  %3176 = vrot.lane.b32.xlu0 %v5483_v61, %s8402_s21  ;;  %s8408_s21 = smov 112  }
 0x411   : > { %3218 = vrot.lane.b32.xlu1 %v5486_v23, %s8404_s19  ;;  %3216 = vrot.lane.b32.xlu0 %v5483_v61, %s8404_s19  ;;  %s8410_s19 = smov 111  }
 0x413   : > { %v5625_v8 = vpop.permute.xlu1 %2010  ;;  %v5627_v2 = vpop.permute.xlu0 %2008 }
 0x415   : > { %3258 = vrot.lane.b32.xlu1 %v5486_v23, %s8406_s22  ;;  %3256 = vrot.lane.b32.xlu0 %v5483_v61, %s8406_s22  ;;  %s8412_s22 = smov 110  }
 0x417   : > { %v5633_v27 = vpop.permute.xlu1 %2065  ;;  %v5635_v54 = vpop.permute.xlu0 %2063 }
 0x419   : > { %3298 = vrot.lane.b32.xlu1 %v5486_v23, %s8408_s21  ;;  %3296 = vrot.lane.b32.xlu0 %v5483_v61, %s8408_s21  ;;  %s8414_s21 = smov 109  }
 0x41b   : > { %v5641_v14 = vpop.permute.xlu1 %2105  ;;  %v5643_v17 = vpop.permute.xlu0 %2103 }
 0x41d   : > { %3338 = vrot.lane.b32.xlu1 %v5486_v23, %s8410_s19  ;;  %3336 = vrot.lane.b32.xlu0 %v5483_v61, %s8410_s19  ;;  %s8416_s19 = smov 99  }
 0x41f   : > { %v5649_v12 = vpop.permute.xlu1 %2145  ;;  %v5651_v50 = vpop.permute.xlu0 %2143 }
 0x421   : > { %3378 = vrot.lane.b32.xlu1 %v5486_v23, %s8412_s22  ;;  %3376 = vrot.lane.b32.xlu0 %v5483_v61, %s8412_s22  ;;  %s8418_s22 = smov 98  }
 0x423   : > { %v5657_v35 = vpop.permute.xlu1 %2185  ;;  %v5659_v38 = vpop.permute.xlu0 %2183 }
 0x425   : > { %3418 = vrot.lane.b32.xlu1 %v5486_v23, %s8414_s21  ;;  %3416 = vrot.lane.b32.xlu0 %v5483_v61, %s8414_s21  ;;  %s8420_s21 = smov 97  }
 0x427   : > { %v5665_v55 = vpop.permute.xlu1 %2225  ;;  %v5667_v57 = vpop.permute.xlu0 %2223 }
 0x429   : > { %3458 = vrot.lane.b32.xlu1 %v5486_v23, %s8416_s19  ;;  %3456 = vrot.lane.b32.xlu0 %v5483_v61, %s8416_s19  ;;  %s8422_s19 = smov 96  }
 0x42b   : > { %v5673_v11 = vpop.permute.xlu1 %2265  ;;  %v5675_v15 = vpop.permute.xlu0 %2263 }
 0x42d   : > { %3498 = vrot.lane.b32.xlu1 %v5486_v23, %s8418_s22  ;;  %3496 = vrot.lane.b32.xlu0 %v5483_v61, %s8418_s22  ;;  %s8424_s22 = smov 95  }
 0x42f   : > { %v5681_v63 = vpop.permute.xlu1 %2305  ;;  %v5683_v30 = vpop.permute.xlu0 %2303 }
 0x431   : > { %3538 = vrot.lane.b32.xlu1 %v5486_v23, %s8420_s21  ;;  %3536 = vrot.lane.b32.xlu0 %v5483_v61, %s8420_s21  ;;  %s8426_s21 = smov 94  }
 0x433   : > { %v5689_v36 = vpop.permute.xlu1 %2345  ;;  %v5691_v47 = vpop.permute.xlu0 %2343 }
 0x435   : > { %3578 = vrot.lane.b32.xlu1 %v5486_v23, %s8422_s19  ;;  %3576 = vrot.lane.b32.xlu0 %v5483_v61, %s8422_s19  ;;  %s8428_s19 = smov 93  }
 0x437   : > { %v5697_v32 = vpop.permute.xlu1 %2385  ;;  %v5699_v31 = vpop.permute.xlu0 %2383 }
 0x439   : > { %3618 = vrot.lane.b32.xlu1 %v5486_v23, %s8424_s22  ;;  %3616 = vrot.lane.b32.xlu0 %v5483_v61, %s8424_s22  ;;  %s8430_s22 = smov 83  }
 0x43b   : > { %v5705_v4 = vpop.permute.xlu1 %2425  ;;  %v5707_v9 = vpop.permute.xlu0 %2423 }
 0x43d   : > { %3658 = vrot.lane.b32.xlu1 %v5486_v23, %s8426_s21  ;;  %3656 = vrot.lane.b32.xlu0 %v5483_v61, %s8426_s21  ;;  %s8432_s21 = smov 82  }
 0x43f   : > { %v5713_v48 = vpop.permute.xlu1 %2465  ;;  %v5715_v25 = vpop.permute.xlu0 %2463 }
 0x441   : > { %3698 = vrot.lane.b32.xlu1 %v5486_v23, %s8428_s19  ;;  %3696 = vrot.lane.b32.xlu0 %v5483_v61, %s8428_s19  ;;  %s8436_s19 = smov 81  }
 0x443   : > { %v5721_v45 = vpop.permute.xlu1 %2505  ;;  %v5723_v33 = vpop.permute.xlu0 %2503 }
 0x445   : > { %3738 = vrot.lane.b32.xlu1 %v5486_v23, %s8430_s22  ;;  %3736 = vrot.lane.b32.xlu0 %v5483_v61, %s8430_s22  ;;  %s8440_s22 = smov 80  }
 0x447   : > { %v5729_v43 = vpop.permute.xlu1 %2545  ;;  %v5731_v46 = vpop.permute.xlu0 %2543 }
 0x449   : > { %3778 = vrot.lane.b32.xlu1 %v5486_v23, %s8432_s21  ;;  %3776 = vrot.lane.b32.xlu0 %v5483_v61, %s8432_s21  ;;  %s8479_s21 = smov 79  }
 0x44b   : > { %v5737_v19 = vpop.permute.xlu1 %2585  ;;  %v5739_v56 = vpop.permute.xlu0 %2583 }
 0x44d   : > { %3818 = vrot.lane.b32.xlu1 %v5486_v23, %s8436_s19  ;;  %3816 = vrot.lane.b32.xlu0 %v5483_v61, %s8436_s19  ;;  %s8477_s19 = smov 78  }
 0x44f   : > { %v5745_v60 = vpop.permute.xlu1 %2625  ;;  %v5747_v44 = vpop.permute.xlu0 %2623 }
 0x451   : > { %3858 = vrot.lane.b32.xlu1 %v5486_v23, %s8440_s22  ;;  %3856 = vrot.lane.b32.xlu0 %v5483_v61, %s8440_s22  ;;  %s8475_s22 = smov 77  }
 0x453   : > { %v5753_v26 = vpop.permute.xlu1 %2665  ;;  %v5755_v6 = vpop.permute.xlu0 %2663 }
 0x455   : > { %3898 = vrot.lane.b32.xlu1 %v5486_v23, %s8479_s21  ;;  %3896 = vrot.lane.b32.xlu0 %v5483_v61, %s8479_s21  ;;  %s5995_s21 = sld [smem:[#allocation3 + $0x10]] }
 0x457   : > { %v5761_v34 = vpop.permute.xlu1 %2705  ;;  %v5763_v16 = vpop.permute.xlu0 %2703 }
 0x458   : > { %8670 = vst [vmem:[#allocation47_spill] sm:$0xff] %v5761_v34  ;;  %8671 = vst [vmem:[#allocation48_spill] sm:$0xff] %v5763_v16 }
 0x459   : > { %3938 = vrot.lane.b32.xlu1 %v5486_v23, %s8477_s19  ;;  %3936 = vrot.lane.b32.xlu0 %v5483_v61, %s8477_s19  ;;  %s8725_s19 = smov 13  }
 0x45b   : > { %v5769_v7 = vpop.permute.xlu1 %2745  ;;  %v5771_v1 = vpop.permute.xlu0 %2743 }
 0x45c   : > { %8672 = vst [vmem:[#allocation49_spill] sm:$0xff] %v5769_v7  ;;  %8673 = vst [vmem:[#allocation50_spill] sm:$0xff] %v5771_v1 }
 0x45d   : > { %3978 = vrot.lane.b32.xlu1 %v5486_v23, %s8475_s22  ;;  %3976 = vrot.lane.b32.xlu0 %v5483_v61, %s8475_s22  ;;  %v5793_v61 = vsel %vm590_vm8, %v5494_v13, %v2024_v37  ;;  %s5989_s22 = sld [smem:[#allocation3 + $0xf]] }
 0x45f   : > { %v5787_v21 = vpop.permute.xlu1 %2785  ;;  %v5789_v23 = vpop.permute.xlu0 %2783 }
 0x460   : > { %8674 = vst [vmem:[#allocation51_spill] sm:$0xff] %v5787_v21  ;;  %8675 = vst [vmem:[#allocation52_spill] sm:$0xff] %v5789_v23 }
 0x461   : > { %2033 = vrot.lane.b32.xlu1 %v5797_v18, %s4711_s24  ;;  %2031 = vrot.lane.b32.xlu0 %v5793_v61, %s4711_s24  ;;  %s8708_s24 = smov 17  }
 0x463   : > { %v5803_v0 = vpop.permute.xlu1 %2825  ;;  %v5805_v58 = vpop.permute.xlu0 %2823  ;;  %8724 = sst [smem:[#allocation97_spill]] %s5989_s22 }
 0x464   : > { %8676 = vst [vmem:[#allocation53_spill] sm:$0xff] %v5803_v0  ;;  %8677 = vst [vmem:[#allocation54_spill] sm:$0xff] %v5805_v58  ;;  %s6097_s22 = sld [smem:[#allocation3 + $0x23]] }
 0x465   : > { %2072 = vrot.lane.b32.xlu1 %v5797_v18, %s4712_s25  ;;  %2070 = vrot.lane.b32.xlu0 %v5793_v61, %s4712_s25  ;;  %s5931_s25 = sld [smem:[#allocation3]] }
 0x467   : > { %v5811_v37 = vpop.permute.xlu1 %2865  ;;  %v5813_v20 = vpop.permute.xlu0 %2863 }
 0x468   : > { %8678 = vst [vmem:[#allocation55_spill] sm:$0xff] %v5811_v37  ;;  %8679 = vst [vmem:[#allocation56_spill] sm:$0xff] %v5813_v20 }
 0x469   : > { %2112 = vrot.lane.b32.xlu1 %v5797_v18, %s4713_s26  ;;  %2110 = vrot.lane.b32.xlu0 %v5793_v61, %s4713_s26  ;;  %s5933_s26 = sld [smem:[#allocation3 + $0x1]] }
 0x46b   : > { %v5819_v28 = vpop.permute.xlu1 %2905  ;;  %v5821_v29 = vpop.permute.xlu0 %2903  ;;  %8709 = sst [smem:[#allocation85_spill]] %s5931_s25  ;;  %s8743_s25 = smov 127  }
 0x46c   : > { %8680 = vst [vmem:[#allocation57_spill] sm:$0xff] %v5819_v28  ;;  %8681 = vst [vmem:[#allocation58_spill] sm:$0xff] %v5821_v29 }
 0x46d   : > { %2152 = vrot.lane.b32.xlu1 %v5797_v18, %s4714_s28  ;;  %2150 = vrot.lane.b32.xlu0 %v5793_v61, %s4714_s28  ;;  %s5939_s28 = sld [smem:[#allocation3 + $0x2]] }
 0x46f   : > { %v5827_v40 = vpop.permute.xlu1 %2945  ;;  %v5829_v39 = vpop.permute.xlu0 %2943  ;;  %8710 = sst [smem:[#allocation86_spill]] %s5933_s26 }
 0x470   : > { %8682 = vst [vmem:[#allocation59_spill] sm:$0xff] %v5827_v40  ;;  %8683 = vst [vmem:[#allocation60_spill] sm:$0xff] %v5829_v39  ;;  %s6066_s26 = sld [smem:[#allocation3 + $0x20]] }
 0x471   : > { %2192 = vrot.lane.b32.xlu1 %v5797_v18, %s4715_s29  ;;  %2190 = vrot.lane.b32.xlu0 %v5793_v61, %s4715_s29  ;;  %s5941_s29 = sld [smem:[#allocation3 + $0x3]] }
 0x472   : > { %s8751_s7 = sld [smem:[#allocation86_spill]] }
 0x473   : > { %v5835_v3 = vpop.permute.xlu1 %3058  ;;  %v5837_v13 = vpop.permute.xlu0 %3056 }
 0x474   : > { %8684 = vst [vmem:[#allocation61_spill] sm:$0xff] %v5835_v3  ;;  %8685 = vst [vmem:[#allocation62_spill] sm:$0xff] %v5837_v13 }
 0x475   : > { %2232 = vrot.lane.b32.xlu1 %v5797_v18, %s4716_s30  ;;  %2230 = vrot.lane.b32.xlu0 %v5793_v61, %s4716_s30  ;;  %s8713_s30 = smov 16  }
 0x477   : > { %v5843_v10 = vpop.permute.xlu1 %3098  ;;  %v5845_v53 = vpop.permute.xlu0 %3096 }
 0x478   : > { %8686 = vst [vmem:[#allocation63_spill] sm:$0xff] %v5843_v10  ;;  %8687 = vst [vmem:[#allocation64_spill] sm:$0xff] %v5845_v53 }
 0x479   : > { %2272 = vrot.lane.b32.xlu1 %v5797_v18, %s4717_s9  ;;  %2270 = vrot.lane.b32.xlu0 %v5793_v61, %s4717_s9  ;;  %s5947_s9 = sld [smem:[#allocation3 + $0x4]] }
 0x47b   : > { %v5851_v51 = vpop.permute.xlu1 %3138  ;;  %v5853_v49 = vpop.permute.xlu0 %3136 }
 0x47c   : > { %8688 = vst [vmem:[#allocation65_spill] sm:$0xff] %v5851_v51  ;;  %8689 = vst [vmem:[#allocation66_spill] sm:$0xff] %v5853_v49 }
 0x47d   : > { %2312 = vrot.lane.b32.xlu1 %v5797_v18, %s4718_s10  ;;  %2310 = vrot.lane.b32.xlu0 %v5793_v61, %s4718_s10  ;;  %s5949_s10 = sld [smem:[#allocation3 + $0x5]] }
 0x47f   : > { %v5859_v59 = vpop.permute.xlu1 %3178  ;;  %v5861_v52 = vpop.permute.xlu0 %3176 }
 0x480   : > { %8690 = vst [vmem:[#allocation67_spill] sm:$0xff] %v5859_v59  ;;  %8691 = vst [vmem:[#allocation68_spill] sm:$0xff] %v5861_v52 }
 0x481   : > { %2352 = vrot.lane.b32.xlu1 %v5797_v18, %s4719_s11  ;;  %2350 = vrot.lane.b32.xlu0 %v5793_v61, %s4719_s11  ;;  %s5955_s11 = sld [smem:[#allocation3 + $0x6]] }
 0x483   : > { %v5867_v62 = vpop.permute.xlu1 %3218  ;;  %v5869_v41 = vpop.permute.xlu0 %3216 }
 0x484   : > { %8692 = vst [vmem:[#allocation69_spill] sm:$0xff] %v5867_v62  ;;  %8693 = vst [vmem:[#allocation70_spill] sm:$0xff] %v5869_v41 }
 0x485   : > { %2392 = vrot.lane.b32.xlu1 %v5797_v18, %s4720_s12  ;;  %2390 = vrot.lane.b32.xlu0 %v5793_v61, %s4720_s12  ;;  %s5957_s12 = sld [smem:[#allocation3 + $0x7]] }
 0x487   : > { %v5875_v5 = vpop.permute.xlu1 %3258  ;;  %v5877_v59 = vpop.permute.xlu0 %3256 }
 0x488   : > { %8694 = vst [vmem:[#allocation71_spill] sm:$0xff] %v5875_v5  ;;  %8695 = vst [vmem:[#allocation72_spill] sm:$0xff] %v5877_v59 }
 0x489   : > { %2432 = vrot.lane.b32.xlu1 %v5797_v18, %s4721_s13  ;;  %2430 = vrot.lane.b32.xlu0 %v5793_v61, %s4721_s13  ;;  %s8717_s13 = smov 15  }
 0x48b   : > { %v5883_v52 = vpop.permute.xlu1 %3298  ;;  %v5885_v62 = vpop.permute.xlu0 %3296  ;;  %8716 = sst [smem:[#allocation91_spill]] %s5957_s12 }
 0x48c   : > { %8696 = vst [vmem:[#allocation73_spill] sm:$0xff] %v5883_v52  ;;  %8697 = vst [vmem:[#allocation74_spill] sm:$0xff] %v5885_v62  ;;  %s6081_s12 = sld [smem:[#allocation3 + $0x21]] }
 0x48d   : > { %2472 = vrot.lane.b32.xlu1 %v5797_v18, %s4722_s14  ;;  %2470 = vrot.lane.b32.xlu0 %v5793_v61, %s4722_s14  ;;  %s5963_s14 = sld [smem:[#allocation3 + $0x8]] }
 0x48f   : > { %v5891_v41 = vpop.permute.xlu1 %3338  ;;  %v5893_v5 = vpop.permute.xlu0 %3336 }
 0x490   : > { %8698 = vst [vmem:[#allocation75_spill] sm:$0xff] %v5891_v41  ;;  %8699 = vst [vmem:[#allocation76_spill] sm:$0xff] %v5893_v5 }
 0x491   : > { %2512 = vrot.lane.b32.xlu1 %v5797_v18, %s4723_s15  ;;  %2510 = vrot.lane.b32.xlu0 %v5793_v61, %s4723_s15  ;;  %s5965_s15 = sld [smem:[#allocation3 + $0x9]] }
 0x492   : > { %8744 = sst [smem:[#allocation110_spill]] %s6081_s12  ;;  %s8765_s12 = smov 115  }
 0x493   : > { %v5899_v59 = vpop.permute.xlu1 %3378  ;;  %v5901_v52 = vpop.permute.xlu0 %3376 }
 0x494   : > { %8700 = vst [vmem:[#allocation77_spill] sm:$0xff] %v5899_v59  ;;  %8701 = vst [vmem:[#allocation78_spill] sm:$0xff] %v5901_v52 }
 0x495   : > { %2552 = vrot.lane.b32.xlu1 %v5797_v18, %s4724_s16  ;;  %2550 = vrot.lane.b32.xlu0 %v5793_v61, %s4724_s16  ;;  %s5971_s16 = sld [smem:[#allocation3 + $0xa]] }
 0x497   : > { %v5907_v62 = vpop.permute.xlu1 %3418  ;;  %v5909_v41 = vpop.permute.xlu0 %3416  ;;  %v8785_v39 = vstv %s5965_s15  ;;  %s6394_s15 = sld [smem:[#allocation3 + $0x33]] }
 0x498   : > { %8702 = vst [vmem:[#allocation79_spill] sm:$0xff] %v5907_v62  ;;  %8703 = vst [vmem:[#allocation80_spill] sm:$0xff] %v5909_v41 }
 0x499   : > { %2592 = vrot.lane.b32.xlu1 %v5797_v18, %s4725_s17  ;;  %2590 = vrot.lane.b32.xlu0 %v5793_v61, %s4725_s17  ;;  %s5973_s17 = sld [smem:[#allocation3 + $0xb]] }
 0x49b   : > { %v5915_v5 = vpop.permute.xlu1 %3458  ;;  %v5917_v59 = vpop.permute.xlu0 %3456 }
 0x49c   : > { %8704 = vst [vmem:[#allocation81_spill] sm:$0xff] %v5915_v5  ;;  %8705 = vst [vmem:[#allocation82_spill] sm:$0xff] %v5917_v59 }
 0x49d   : > { %2632 = vrot.lane.b32.xlu1 %v5797_v18, %s4726_s18  ;;  %2630 = vrot.lane.b32.xlu0 %v5793_v61, %s4726_s18  ;;  %s8720_s18 = smov 14  }
 0x49f   : > { %v5923_v52 = vpop.permute.xlu1 %3498  ;;  %v5925_v62 = vpop.permute.xlu0 %3496 }
 0x4a0   : > { %8706 = vst [vmem:[#allocation83_spill] sm:$0xff] %v5923_v52  ;;  %8707 = vst [vmem:[#allocation84_spill] sm:$0xff] %v5925_v62 }
 0x4a1   : > { %2672 = vrot.lane.b32.xlu1 %v5797_v18, %s8708_s24  ;;  %2670 = vrot.lane.b32.xlu0 %v5793_v61, %s8708_s24  ;;  %s5979_s24 = sld [smem:[#allocation3 + $0xc]] }
 0x4a3   : > { %v5935_v59 = vpop.permute.xlu1 %3538  ;;  %v5937_v5 = vpop.permute.xlu0 %3536 }
 0x4a4   : > { %8711 = vst [vmem:[#allocation87_spill] sm:$0xff] %v5935_v59  ;;  %8712 = vst [vmem:[#allocation88_spill] sm:$0xff] %v5937_v5 }
 0x4a5   : > { %2712 = vrot.lane.b32.xlu1 %v5797_v18, %s8713_s30  ;;  %2710 = vrot.lane.b32.xlu0 %v5793_v61, %s8713_s30  ;;  %s5981_s30 = sld [smem:[#allocation3 + $0xd]] }
 0x4a7   : > { %v5951_v62 = vpop.permute.xlu1 %3578  ;;  %v5953_v52 = vpop.permute.xlu0 %3576 }
 0x4a8   : > { %8714 = vst [vmem:[#allocation89_spill] sm:$0xff] %v5951_v62  ;;  %8715 = vst [vmem:[#allocation90_spill] sm:$0xff] %v5953_v52 }
 0x4a9   : > { %2752 = vrot.lane.b32.xlu1 %v5797_v18, %s8717_s13  ;;  %2750 = vrot.lane.b32.xlu0 %v5793_v61, %s8717_s13  ;;  %s5987_s13 = sld [smem:[#allocation3 + $0xe]] }
 0x4ab   : > { %v5967_v5 = vpop.permute.xlu1 %3618  ;;  %v5969_v59 = vpop.permute.xlu0 %3616 }
 0x4ac   : > { %8718 = vst [vmem:[#allocation92_spill] sm:$0xff] %v5967_v5  ;;  %8719 = vst [vmem:[#allocation93_spill] sm:$0xff] %v5969_v59 }
 0x4ad   : > { %2792 = vrot.lane.b32.xlu1 %v5797_v18, %s8720_s18  ;;  %2790 = vrot.lane.b32.xlu0 %v5793_v61, %s8720_s18  ;;  %s5997_s18 = sld [smem:[#allocation3 + $0x11]] }
 0x4af   : > { %v5983_v52 = vpop.permute.xlu1 %3658  ;;  %v5985_v62 = vpop.permute.xlu0 %3656  ;;  %8723 = sst [smem:[#allocation96_spill]] %s5987_s13  ;;  %s8747_s13 = smov 126  }
 0x4b0   : > { %8721 = vst [vmem:[#allocation94_spill] sm:$0xff] %v5983_v52  ;;  %8722 = vst [vmem:[#allocation95_spill] sm:$0xff] %v5985_v62 }
 0x4b1   : > { %2832 = vrot.lane.b32.xlu1 %v5797_v18, %s8725_s19  ;;  %2830 = vrot.lane.b32.xlu0 %v5793_v61, %s8725_s19  ;;  %s6013_s19 = sld [smem:[#allocation3 + $0x15]] }
 0x4b3   : > { %v5999_v59 = vpop.permute.xlu1 %3698  ;;  %v6001_v5 = vpop.permute.xlu0 %3696 }
 0x4b4   : > { %8726 = vst [vmem:[#allocation98_spill] sm:$0xff] %v5999_v59  ;;  %8727 = vst [vmem:[#allocation99_spill] sm:$0xff] %v6001_v5  ;;  %v8740_v5 = vld [vmem:[#allocation21_spill] sm:$0xff] }
 0x4b5   : > { %2872 = vrot.lane.b32.xlu1 %v5797_v18, %s8729_s1  ;;  %2870 = vrot.lane.b32.xlu0 %v5793_v61, %s8729_s1  ;;  %s6027_s1 = sld [smem:[#allocation3 + $0x19]]  ;;  %vm2012_vm14 = vcmp.lt.s32.totalorder %v8740_v5, 51  ;;  %vm2067_vm15 = vcmp.lt.s32.totalorder %v8740_v5, 50  ;;  %vm2107_vm0 = vcmp.lt.s32.totalorder %v8740_v5, 49  ;;  %vm2147_vm1 = vcmp.lt.s32.totalorder %v8740_v5, 48 }
 0x4b6   : > { %vm2187_vm2 = vcmp.lt.s32.totalorder %v8740_v5, 47  ;;  %vm2227_vm3 = vcmp.lt.s32.totalorder %v8740_v5, 46  ;;  %vm2267_vm4 = vcmp.lt.s32.totalorder %v8740_v5, 45  ;;  %vm2307_vm5 = vcmp.lt.s32.totalorder %v8740_v5, 35 }
 0x4b7   : > { %v6015_v62 = vpop.permute.xlu1 %3738  ;;  %v6017_v59 = vpop.permute.xlu0 %3736  ;;  %v2014_v53 = vsel %vm2012_vm14, %v5625_v8, %v5627_v2  ;;  %vm2347_vm6 = vcmp.lt.s32.totalorder %v8740_v5, 34  ;;  %vm2387_vm7 = vcmp.lt.s32.totalorder %v8740_v5, 33  ;;  %vm2427_vm8 = vcmp.lt.s32.totalorder %v8740_v5, 32 }
 0x4b8   : > { %8730 = vst [vmem:[#allocation101_spill] sm:$0xff] %v6015_v62  ;;  %8731 = vst [vmem:[#allocation102_spill] sm:$0xff] %v6017_v59  ;;  %vm2467_vm9 = vcmp.lt.s32.totalorder %v8740_v5, 31  ;;  %vm2507_vm10 = vcmp.lt.s32.totalorder %v8740_v5, 30  ;;  %vm2547_vm11 = vcmp.lt.s32.totalorder %v8740_v5, 29  ;;  %vm8533_vm12 = vcmp.lt.s32.totalorder %v8740_v5, 77 }
 0x4b9   : > { %2912 = vrot.lane.b32.xlu1 %v5797_v18, %s8732_s6  ;;  %2910 = vrot.lane.b32.xlu0 %v5793_v61, %s8732_s6  ;;  %s6044_s6 = sld [smem:[#allocation3 + $0x1d]]  ;;  %vm2587_vm13 = vcmp.lt.s32.totalorder %v8740_v5, 19 }
 0x4bb   : > { %8733 = sst [smem:[#allocation103_spill]] %s6027_s1  ;;  %v6031_v62 = vpop.permute.xlu1 %3778  ;;  %v6033_v59 = vpop.permute.xlu0 %3776  ;;  %s8752_s1 = smov 125  }
 0x4bc   : > { %8735 = vst [vmem:[#allocation105_spill] sm:$0xff] %v6031_v62  ;;  %8736 = vst [vmem:[#allocation106_spill] sm:$0xff] %v6033_v59  ;;  %v2068_v59 = vsel %vm2067_vm15, %v5635_v54, %v5633_v27  ;;  %v2109_v62 = vsel %vm2107_vm0, %v5641_v14, %v5643_v17 }
 0x4bd   : > { %2952 = vrot.lane.b32.xlu1 %v5797_v18, %s8739_s20  ;;  %2950 = vrot.lane.b32.xlu0 %v5793_v61, %s8739_s20  ;;  %s6060_s20 = sld [smem:[#allocation3 + $0x1f]] }
 0x4bf   : > { %v6052_v52 = vpop.permute.xlu1 %3818  ;;  %v6054_v41 = vpop.permute.xlu0 %3816 }
 0x4c0   : > { %8741 = vst [vmem:[#allocation21_spill] sm:$0xff] %v6052_v52  ;;  %8742 = vst [vmem:[#allocation109_spill] sm:$0xff] %v6054_v41  ;;  %v2013_v41 = vsel %vm2012_vm14, %v5627_v2, %v5625_v8  ;;  %v2069_v8 = vsel %vm2067_vm15, %v5633_v27, %v5635_v54  ;;  %v2149_v52 = vsel %vm2147_vm1, %v5649_v12, %v5651_v50 }
 0x4c1   : > { %3065 = vrot.lane.b32.xlu1 %v5797_v18, %s8743_s25  ;;  %3063 = vrot.lane.b32.xlu0 %v5793_v61, %s8743_s25  ;;  %s6091_s25 = sld [smem:[#allocation3 + $0x22]] }
 0x4c3   : > { %v6083_v10 = vpop.permute.xlu1 %3858  ;;  %v6085_v13 = vpop.permute.xlu0 %3856 }
 0x4c4   : > { %8745 = vst [vmem:[#allocation111_spill] sm:$0xff] %v6083_v10  ;;  %8746 = vst [vmem:[#allocation112_spill] sm:$0xff] %v6085_v13 }
 0x4c5   : > { %3105 = vrot.lane.b32.xlu1 %v5797_v18, %s8747_s13  ;;  %3103 = vrot.lane.b32.xlu0 %v5793_v61, %s8747_s13  ;;  %s8748_s13 = sld [smem:[#allocation85_spill]] }
 0x4c7   : > { %v6120_v49 = vpop.permute.xlu1 %3898  ;;  %v6122_v22 = vpop.permute.xlu0 %3896 }
 0x4c8   : > { %8749 = vst [vmem:[#allocation113_spill] sm:$0xff] %v6120_v49  ;;  %8750 = vst [vmem:[#allocation114_spill] sm:$0xff] %v6122_v22  ;;  %v2108_v22 = vsel %vm2107_vm0, %v5643_v17, %v5641_v14  ;;  %v8755_v49 = vstv %s8751_s7  ;;  %s6200_s7 = sld [smem:[#allocation3 + $0x28]] }
 0x4c9   : > { %3145 = vrot.lane.b32.xlu1 %v5797_v18, %s8752_s1  ;;  %3143 = vrot.lane.b32.xlu0 %v5793_v61, %s8752_s1  ;;  %v6168_v13 = vmul.f32 %v8755_v49, %v2069_v8  ;;  %s6180_s1 = sld [smem:[#allocation3 + $0x27]] }
 0x4cb   : > { %v8753_v27 = vstv %s8748_s13  ;;  %v6182_v14 = vpop.permute.xlu1 %3938  ;;  %v6184_v17 = vpop.permute.xlu0 %3936  ;;  %s6212_s13 = sld [smem:[#allocation3 + $0x29]] }
 0x4cc   : > { %v6152_v54 = vmul.f32 %v8753_v27, %v2014_v53  ;;  %v8754_v51 = vmov %v8753_v27  ;;  %v8756_v53 = vmov %v8755_v49  ;;  %8758 = vst [vmem:[#allocation115_spill] sm:$0xff] %v6182_v14  ;;  %8759 = vst [vmem:[#allocation116_spill] sm:$0xff] %v6184_v17  ;;  %v8760_v49 = vstv %s5939_s28  ;;  %s6249_s28 = sld [smem:[#allocation3 + $0x2a]] }
 0x4cd   : > { %v6156_v2 = vmul.f32 %v8754_v51, %v2013_v41  ;;  %v6172_v27 = vmul.f32 %v8756_v53, %v2068_v59  ;;  %v2148_v41 = vsel %vm2147_vm1, %v5651_v50, %v5649_v12  ;;  %v6188_v8 = vmul.f32 %v8760_v49, %v2109_v62  ;;  %3185 = vrot.lane.b32.xlu1 %v5797_v18, %s8765_s12 }
 0x4ce   : > { %v2188_v59 = vsel %vm2187_vm2, %v5659_v38, %v5657_v35  ;;  %v2189_v12 = vsel %vm2187_vm2, %v5657_v35, %v5659_v38  ;;  %8761 = sst [smem:[#allocation86_spill]] %s6200_s7  ;;  %v8762_v62 = vmov %v8760_v49  ;;  %v8763_v49 = vstv %s5941_s29  ;;  %3183 = vrot.lane.b32.xlu0 %v5793_v61, %s8765_s12  ;;  %s8776_s12 = smov 114  }
 0x4cf   : > { %8757 = sst [smem:[#allocation85_spill]] %s6180_s1  ;;  %v6204_v53 = vmul.f32 %v8762_v62, %v2108_v22  ;;  %v6208_v51 = vmul.f32 %v8763_v49, %v2149_v52  ;;  %v8766_v35 = vmov %v8763_v49  ;;  %v2228_v52 = vsel %vm2227_vm3, %v5667_v57, %v5665_v55  ;;  %s8784_s1 = smov 113  }
 0x4d0   : > { %v6221_v22 = vmul.f32 %v8766_v35, %v2148_v41  ;;  %v2229_v38 = vsel %vm2227_vm3, %v5665_v55, %v5667_v57  ;;  %v8767_v49 = vstv %s5947_s9  ;;  %v2268_v35 = vsel %vm2267_vm4, %v5675_v15, %v5673_v11  ;;  %v3979_v55 = vpop.permute.xlu1 %3978  ;;  %v3977_v57 = vpop.permute.xlu0 %3976  ;;  %s8770_s29 = sld [smem:[#allocation91_spill]] }
 0x4d1   : > { %8764 = sst [smem:[#allocation117_spill]] %s6212_s13  ;;  %v6234_v17 = vmul.f32 %v8767_v49, %v2189_v12  ;;  %v8768_v50 = vmov %v8767_v49  ;;  %v2269_v14 = vsel %vm2267_vm4, %v5673_v11, %v5675_v15  ;;  %v6262_v11 = vsel %vm8533_vm12, %v3979_v55, %v3977_v57  ;;  %3225 = vrot.lane.b32.xlu1 %v5797_v18, %s8776_s12 }
 0x4d2   : > { %v6238_v41 = vmul.f32 %v8768_v50, %v2188_v59  ;;  %8769 = sst [smem:[#allocation118_spill]] %s6249_s28  ;;  %v2309_v59 = vsel %vm2307_vm5, %v5681_v63, %v5683_v30  ;;  %v6258_v50 = vsel %vm8533_vm12, %v3977_v57, %v3979_v55  ;;  %8772 = vst [vmem:[#allocation120_spill] sm:$0xff] %v6262_v11  ;;  %v8773_v15 = vstv %s5949_s10  ;;  %3223 = vrot.lane.b32.xlu0 %v5793_v61, %s8776_s12 }
 0x4d3   : > { %8771 = vst [vmem:[#allocation119_spill] sm:$0xff] %v6258_v50  ;;  %v6266_v49 = vmul.f32 %v8773_v15, %v2229_v38  ;;  %v8774_v62 = vmov %v8773_v15  ;;  %v2308_v12 = vsel %vm2307_vm5, %v5683_v30, %v5681_v63  ;;  %s6277_s9 = sld [smem:[#allocation3 + $0x2b]]  ;;  %v8777_v38 = vstv %s5955_s11 }
 0x4d4   : > { %v6270_v10 = vmul.f32 %v8774_v62, %v2228_v52  ;;  %v6285_v55 = vmul.f32 %v8777_v38, %v2269_v14  ;;  %v8778_v52 = vmov %v8777_v38  ;;  %v2348_v63 = vsel %vm2347_vm6, %v5691_v47, %v5689_v36  ;;  %s6300_s10 = sld [smem:[#allocation3 + $0x2c]]  ;;  %v2034_v15 = vpop.permute.xlu1 %2033  ;;  %v2032_v38 = vpop.permute.xlu0 %2031 }
 0x4d5   : > { %v6289_v62 = vmul.f32 %v8778_v52, %v2268_v35  ;;  %v2349_v30 = vsel %vm2347_vm6, %v5689_v36, %v5691_v47  ;;  %vm2627_vm12 = vcmp.lt.s32.totalorder %v8740_v5, 18  ;;  %v2388_v57 = vsel %vm2387_vm7, %v5699_v31, %v5697_v32  ;;  %s6315_s11 = sld [smem:[#allocation3 + $0x2d]]  ;;  %3265 = vrot.lane.b32.xlu1 %v5797_v18, %s8784_s1 }
 0x4d6   : > { %v8780_v14 = vstv %s8770_s29  ;;  %v2389_v36 = vsel %vm2387_vm7, %v5697_v32, %v5699_v31  ;;  %s6325_s12 = sld [smem:[#allocation3 + $0x2e]]  ;;  %v6329_v32 = vsel %vm2012_vm14, %v2032_v38, %v2034_v15  ;;  %v6333_v31 = vsel %vm2012_vm14, %v2034_v15, %v2032_v38  ;;  %3263 = vrot.lane.b32.xlu0 %v5793_v61, %s8784_s1  ;;  %s8792_s1 = smov 112  }
 0x4d7   : > { %v6304_v35 = vmul.f32 %v8780_v14, %v2309_v59  ;;  %v8781_v52 = vmov %v8780_v14  ;;  %v2429_v14 = vsel %vm2427_vm8, %v5705_v4, %v5707_v9  ;;  %v8782_v47 = vstv %s5963_s14  ;;  %s6345_s29 = sld [smem:[#allocation3 + $0x31]] }
 0x4d8   : > { %v6319_v59 = vmul.f32 %v8781_v52, %v2308_v12  ;;  %v6337_v12 = vmul.f32 %v8782_v47, %v2349_v30  ;;  %v8783_v52 = vmov %v8782_v47  ;;  %v6353_v40 = vmul.f32 %v8785_v39, %v2389_v36  ;;  %s6380_s14 = sld [smem:[#allocation3 + $0x32]]  ;;  %v2071_v36 = vpop.permute.xlu0 %2070 }
 0x4d9   : > { %8775 = sst [smem:[#allocation91_spill]] %s6277_s9  ;;  %v6341_v3 = vmul.f32 %v8783_v52, %v2348_v63  ;;  %v8786_v15 = vmov %v8785_v39  ;;  %v2428_v63 = vsel %vm2427_vm8, %v5707_v9, %v5705_v4  ;;  %v2469_v47 = vsel %vm2467_vm9, %v5713_v48, %v5715_v25  ;;  %v2073_v9 = vpop.permute.xlu1 %2072  ;;  %3305 = vrot.lane.b32.xlu1 %v5797_v18, %s8792_s1 }
 0x4da   : > { %8779 = sst [smem:[#allocation121_spill]] %s6300_s10  ;;  %v6357_v30 = vmul.f32 %v8786_v15, %v2388_v57  ;;  %v8787_v38 = vstv %s5971_s16  ;;  %v2468_v39 = vsel %vm2467_vm9, %v5715_v25, %v5713_v48  ;;  %v2508_v57 = vsel %vm2507_vm10, %v5723_v33, %v5721_v45  ;;  %3303 = vrot.lane.b32.xlu0 %v5793_v61, %s8792_s1 }
 0x4db   : > { %v6369_v52 = vmul.f32 %v8787_v38, %v2429_v14  ;;  %v2509_v14 = vsel %vm2507_vm10, %v5721_v45, %v5723_v33  ;;  %v2549_v48 = vsel %vm2547_vm11, %v5729_v43, %v5731_v46  ;;  %v2074_v25 = vsel %vm2067_vm15, %v2071_v36, %v2073_v9  ;;  %s6411_s28 = sld [smem:[#allocation3 + $0x34]] }
 0x4dc   : > { %v2075_v15 = vsel %vm2067_vm15, %v2073_v9, %v2071_v36  ;;  %v6398_v4 = vmul.f32 %v8787_v38, %v2428_v63  ;;  %v8790_v45 = vstv %s5973_s17  ;;  %v2548_v50 = vsel %vm2547_vm11, %v5731_v46, %v5729_v43  ;;  %s8795_s13 = sld [smem:[#allocation137_spill]]  ;;  %v2111_v29 = vpop.permute.xlu0 %2110 }
 0x4dd   : > { %8788 = vst [vmem:[#allocation122_spill] sm:$0xff] %v6369_v52  ;;  %v6402_v33 = vmul.f32 %v8790_v45, %v2469_v47  ;;  %v8793_v9 = vmov %v8790_v45  ;;  %v2588_v63 = vsel %vm2587_vm13, %v5739_v56, %v5737_v19  ;;  %v2589_v43 = vsel %vm2587_vm13, %v5737_v19, %v5739_v56  ;;  %s8796_s17 = sld [smem:[#allocation96_spill]]  ;;  %v2113_v28 = vpop.permute.xlu1 %2112 }
 0x4de   : > { %8789 = vst [vmem:[#allocation123_spill] sm:$0xff] %v6398_v4  ;;  %v6415_v36 = vmul.f32 %v8793_v9, %v2468_v39  ;;  %s6433_s7 = sld [smem:[#allocation3 + $0x35]]  ;;  %v8797_v39 = vstv %s5979_s24  ;;  %v8801_v19 = vstv %s5981_s30  ;;  %s8809_s30 = smov 111   ;;  %vm2667_vm14 = vcmp.lt.s32.totalorder %v8740_v5, 17 }
 0x4df   : > { %8791 = vst [vmem:[#allocation124_spill] sm:$0xff] %v6402_v33  ;;  %v6437_v38 = vmul.f32 %v8797_v39, %v2509_v14  ;;  %v8799_v45 = vmov %v8797_v39  ;;  %v6445_v56 = vmul.f32 %v8801_v19, %v2549_v48  ;;  %s6453_s1 = sld [smem:[#allocation3 + $0x36]]  ;;  %v8803_v37 = vmov %v8801_v19  ;;  %3345 = vrot.lane.b32.xlu1 %v5797_v18, %s8809_s30 }
 0x4e0   : > { %8794 = vst [vmem:[#allocation125_spill] sm:$0xff] %v6415_v36  ;;  %v6441_v9 = vmul.f32 %v8799_v45, %v2508_v57  ;;  %v6457_v14 = vmul.f32 %v8803_v37, %v2548_v50  ;;  %v2114_v48 = vsel %vm2107_vm0, %v2111_v29, %v2113_v28  ;;  %v2115_v45 = vsel %vm2107_vm0, %v2113_v28, %v2111_v29  ;;  %s6486_s10 = sld [smem:[#allocation3 + $0x37]] }
 0x4e1   : > { %8798 = vst [vmem:[#allocation126_spill] sm:$0xff] %v6437_v38  ;;  %8802 = vst [vmem:[#allocation128_spill] sm:$0xff] %v6445_v56  ;;  %v6481_v37 = vsel %vm2627_vm12, %v5747_v44, %v5745_v60  ;;  %v2043_v50 = vstv %s6345_s29  ;;  %v6492_v28 = vsel %vm2627_vm12, %v5745_v60, %v5747_v44  ;;  %3343 = vrot.lane.b32.xlu0 %v5793_v61, %s8809_s30  ;;  %v2083_v60 = vstv %s6380_s14  ;;  %v2153_v39 = vpop.permute.xlu1 %2152  ;;  %s6517_s24 = sld [smem:[#allocation3 + $0x38]]  ;;  %s8810_s29 = smov 110  }
 0x4e2   : > { %v6429_v47 = vld [vmem:[%s8795_s13] ss:$8 sm:$0x3]  ;;  %8800 = vst [vmem:[#allocation127_spill] sm:$0xff] %v6441_v9  ;;  %8804 = vst [vmem:[#allocation129_spill] sm:$0xff] %v6457_v14  ;;  %v2045_v0 = vmul.f32 %v2043_v50, %v6329_v32  ;;  %v2123_v56 = vstv %s6394_s15  ;;  %v2163_v9 = vstv %s6411_s28  ;;  %s6622_s14 = sld [smem:[#allocation3 + $0x3a]] }
 0x4e3   : > { %v6451_v11 = vld [vmem:[%s8795_s13 + $0x1] ss:$8 sm:$0x3]  ;;  %v6463_v57 = vld [vmem:[%s8795_s13 + $0x2] ss:$8 sm:$0x3]  ;;  %v8805_v19 = vstv %s8796_s17  ;;  %v2056_v29 = vrot.slane %v6429_v47, %v5238_v42  ;;  %3385 = vrot.lane.b32.xlu1 %v5797_v18, %s8810_s29 }
 0x4e4   : > { %v6471_v46 = vmul.f32 %v8805_v19, %v2589_v43  ;;  %v8807_v20 = vmov %v8805_v19  ;;  %v6505_v43 = vld [vmem:[%s8795_s13 + $0x3] ss:$8 sm:$0x3]  ;;  %v2096_v44 = vrot.slane %v6451_v11, %v5238_v42  ;;  %v6549_v21 = vld [vmem:[%s8795_s13 + $0x6] ss:$8 sm:$0x3]  ;;  %v2047_v33 = vadd.f32 %v2045_v0, %v6156_v2 }
 0x4e5   : > { %v6475_v58 = vmul.f32 %v8807_v20, %v2588_v63  ;;  %v2052_v20 = vrot.slane %v6429_v47, %v5234_v24  ;;  %v2151_v63 = vpop.permute.xlu0 %2150  ;;  %v6532_v47 = vld [vmem:[%s8795_s13 + $0x5] ss:$8 sm:$0x3]  ;;  %3383 = vrot.lane.b32.xlu0 %v5793_v61, %s8810_s29  ;;  %v2243_v36 = vstv %s6453_s1  ;;  %v2124_v2 = vmul.f32 %v2123_v56, %v2115_v45  ;;  %s6581_s1 = sld [smem:[#allocation3 + $0x2f]]  ;;  %s8818_s28 = smov 97  }
 0x4e6   : > { %8806 = vst [vmem:[#allocation130_spill] sm:$0xff] %v6471_v46  ;;  %v2044_v46 = vmul.f32 %v2043_v50, %v6333_v31  ;;  %v6523_v14 = vsel %vm2147_vm1, %v2151_v63, %v2153_v39  ;;  %v6527_v19 = vsel %vm2147_vm1, %v2153_v39, %v2151_v63  ;;  %v2084_v50 = vmul.f32 %v2083_v60, %v2075_v15  ;;  %v2193_v31 = vpop.permute.xlu1 %2192  ;;  %s6592_s17 = sld [smem:[#allocation3 + $0x39]] }
 0x4e7   : > { %8808 = vst [vmem:[#allocation131_spill] sm:$0xff] %v6475_v58  ;;  %v4281_v58 = vld [vmem:[%s8795_s13 + $0x4] ss:$8 sm:$0x3]  ;;  %v2085_v39 = vmul.f32 %v2083_v60, %v2074_v25  ;;  %v2203_v63 = vstv %s6433_s7  ;;  %v2252_v25 = vrot.slane %v6532_v47, %v5234_v24  ;;  %v2256_v15 = vrot.slane %v6532_v47, %v5238_v42  ;;  %s8811_s7 = smov 109   ;;  %s6639_s15 = sld [smem:[#allocation3 + $0x30]] }
 0x4e8   : > { %v2212_v38 = vrot.slane %v4281_v58, %v5234_v24  ;;  %v2216_v32 = vrot.slane %v4281_v58, %v5238_v42  ;;  %v2046_v60 = vadd.f32 %v2044_v46, %v6152_v54  ;;  %3425 = vrot.lane.b32.xlu1 %v5797_v18, %s8811_s7  ;;  %v2283_v52 = vstv %s6486_s10  ;;  %s8812_s10 = smov 99   ;;  %s6762_s9 = sld [smem:[#allocation3 + $0x3e]] }
 0x4e9   : > { %v2191_v23 = vpop.permute.xlu0 %2190  ;;  %v2086_v54 = vadd.f32 %v2084_v50, %v6168_v13  ;;  %v2087_v0 = vadd.f32 %v2085_v39, %v6172_v27  ;;  %v2125_v46 = vmul.f32 %v2123_v56, %v2114_v48  ;;  %3423 = vrot.lane.b32.xlu0 %v5793_v61, %s8811_s7  ;;  %v2323_v16 = vstv %s6517_s24  ;;  %s8814_s24 = smov 98   ;;  %s6652_s7 = sld [smem:[#allocation3 + $0x3b]] }
 0x4ea   : > { %v2194_v7 = vsel %vm2187_vm2, %v2191_v23, %v2193_v31  ;;  %v2195_v1 = vsel %vm2187_vm2, %v2193_v31, %v2191_v23  ;;  %v2059_v47 = vmul.f32 %v2052_v20, %v2046_v60  ;;  %v2060_v34 = vmul.f32 %v2056_v29, %v2047_v33  ;;  %s7019_s16 = sld [smem:[#allocation3 + $0x45]] }
 0x4eb   : > { %v2204_v58 = vmul.f32 %v2203_v63, %v2195_v1  ;;  %v2205_v4 = vmul.f32 %v2203_v63, %v2194_v7  ;;  %v2233_v1 = vpop.permute.xlu1 %2232  ;;  %v2296_v63 = vrot.slane %v6549_v21, %v5238_v42  ;;  %v2100_v33 = vmul.f32 %v2096_v44, %v2087_v0  ;;  %s7088_s29 = sld [smem:[#allocation3 + $0x47]] }
 0x4ec   : > { %3465 = vrot.lane.b32.xlu1 %v5797_v18, %s8812_s10  ;;  %v2126_v20 = vadd.f32 %v2124_v2, %v6188_v8  ;;  %v2127_v29 = vadd.f32 %v2125_v46, %v6204_v53  ;;  %v4290_v8 = vld [vmem:[%s8795_s13 + $0x7] ss:$8 sm:$0x3]  ;;  %v2164_v53 = vmul.f32 %v2163_v9, %v6527_v19  ;;  %v2165_v39 = vmul.f32 %v2163_v9, %v6523_v14  ;;  %s7621_s30 = sld [smem:[#allocation3 + $0x55]] }
 0x4ed   : > { %v2206_v23 = vadd.f32 %v2204_v58, %v6234_v17  ;;  %v2207_v7 = vadd.f32 %v2205_v4, %v6238_v41  ;;  %v2231_v31 = vpop.permute.xlu0 %2230  ;;  %v8813_v4 = vrot.slane %v6451_v11, %v5234_v24  ;;  %3463 = vrot.lane.b32.xlu0 %v5793_v61, %s8812_s10  ;;  %v8816_v9 = vrot.slane %v6463_v57, %v5238_v42  ;;  %s8819_s10 = sld [smem:[#allocation97_spill]] }
 0x4ee   : > { %v2234_v13 = vsel %vm2227_vm3, %v2231_v31, %v2233_v1  ;;  %v2235_v27 = vsel %vm2227_vm3, %v2233_v1, %v2231_v31  ;;  %v2332_v19 = vrot.slane %v4290_v8, %v5234_v24  ;;  %v2166_v1 = vadd.f32 %v2164_v53, %v6208_v51 }
 0x4ef   : > { %v2219_v56 = vmul.f32 %v2212_v38, %v2206_v23  ;;  %v2220_v17 = vmul.f32 %v2216_v32, %v2207_v7  ;;  %v2244_v48 = vmul.f32 %v2243_v36, %v2235_v27  ;;  %v2245_v41 = vmul.f32 %v2243_v36, %v2234_v13  ;;  %v2273_v44 = vpop.permute.xlu1 %2272  ;;  %v4293_v7 = vld [vmem:[%s8795_s13 + $0x10] ss:$8 sm:$0x3] }
 0x4f0   : > { %v2099_v45 = vmul.f32 %v8813_v4, %v2086_v54  ;;  %3505 = vrot.lane.b32.xlu1 %v5797_v18, %s8814_s24  ;;  %v8815_v54 = vrot.slane %v6463_v57, %v5234_v24  ;;  %v2140_v14 = vmul.f32 %v8816_v9, %v2127_v29  ;;  %v2167_v31 = vadd.f32 %v2165_v39, %v6221_v22 }
 0x4f1   : > { %v6595_v36 = vadd.f32 %v2219_v56, %v2059_v47  ;;  %v6597_v38 = vadd.f32 %v2220_v17, %v2060_v34  ;;  %v2246_v32 = vadd.f32 %v2244_v48, %v6266_v49  ;;  %v2247_v11 = vadd.f32 %v2245_v41, %v6270_v10  ;;  %v2271_v50 = vpop.permute.xlu0 %2270  ;;  %3503 = vrot.lane.b32.xlu0 %v5793_v61, %s8814_s24  ;;  %s6693_s24 = sld [smem:[#allocation3 + $0x3c]] }
 0x4f2   : > { %v2274_v60 = vsel %vm2267_vm4, %v2271_v50, %v2273_v44  ;;  %v2275_v34 = vsel %vm2267_vm4, %v2273_v44, %v2271_v50  ;;  %v2139_v0 = vmul.f32 %v8815_v54, %v2126_v20  ;;  %v2363_v22 = vstv %s6592_s17  ;;  %s8822_s17 = smov 96  }
 0x4f3   : > { %v2259_v58 = vmul.f32 %v2252_v25, %v2246_v32  ;;  %v2260_v49 = vmul.f32 %v2256_v15, %v2247_v11  ;;  %v2284_v47 = vmul.f32 %v2283_v52, %v2275_v34  ;;  %v2285_v10 = vmul.f32 %v2283_v52, %v2274_v60  ;;  %v2313_v57 = vpop.permute.xlu1 %2312  ;;  %v4296_v60 = vld [vmem:[%s8795_s13 + $0x11] ss:$8 sm:$0x3] }
 0x4f4   : > { %v2336_v25 = vrot.slane %v4290_v8, %v5238_v42  ;;  %3545 = vrot.lane.b32.xlu1 %v5797_v18, %s8818_s28  ;;  %v2372_v41 = vrot.slane %v4293_v7, %v5234_v24  ;;  %v2376_v4 = vrot.slane %v4293_v7, %v5238_v42  ;;  %vm2707_vm15 = vcmp.lt.s32.totalorder %v8740_v5, 16 }
 0x4f5   : > { %v6624_v52 = vadd.f32 %v2259_v58, %v2099_v45  ;;  %v6626_v15 = vadd.f32 %v2260_v49, %v2100_v33  ;;  %v2286_v2 = vadd.f32 %v2284_v47, %v6285_v55  ;;  %v2287_v46 = vadd.f32 %v2285_v10, %v6289_v62  ;;  %v2311_v23 = vpop.permute.xlu0 %2310  ;;  %3543 = vrot.lane.b32.xlu0 %v5793_v61, %s8818_s28  ;;  %s6725_s28 = sld [smem:[#allocation3 + $0x3d]] }
 0x4f6   : > { %v2314_v13 = vsel %vm2307_vm5, %v2311_v23, %v2313_v57  ;;  %v2315_v27 = vsel %vm2307_vm5, %v2313_v57, %v2311_v23  ;;  %v8817_v55 = vrot.slane %v6549_v21, %v5234_v24  ;;  %v8820_v29 = vrot.slane %v6505_v43, %v5234_v24 }
 0x4f7   : > { %v2300_v56 = vmul.f32 %v2296_v63, %v2287_v46  ;;  %v2324_v17 = vmul.f32 %v2323_v16, %v2315_v27  ;;  %v2325_v48 = vmul.f32 %v2323_v16, %v2314_v13  ;;  %v2353_v33 = vpop.permute.xlu1 %2352  ;;  %v8821_v11 = vrot.slane %v6505_v43, %v5238_v42  ;;  %v7665_v27 = vld [vmem:[%s8795_s13 + $0x40] ss:$8 sm:$0x3] }
 0x4f8   : > { %v2299_v62 = vmul.f32 %v8817_v55, %v2286_v2  ;;  %v2179_v32 = vmul.f32 %v8820_v29, %v2166_v1  ;;  %3585 = vrot.lane.b32.xlu1 %v5797_v18, %s8822_s17  ;;  %v8823_v43 = vstv %s8819_s10  ;;  %v2669_v47 = vsel %vm2667_vm14, %v5753_v26, %v5755_v6  ;;  %v8829_v29 = vld [vmem:[#allocation47_spill] sm:$0xff]  ;;  %s8847_s10 = smov 82  }
 0x4f9   : > { %v6657_v16 = vadd.f32 %v2300_v56, %v2140_v14  ;;  %v2326_v63 = vadd.f32 %v2324_v17, %v6304_v35  ;;  %v2327_v45 = vadd.f32 %v2325_v48, %v6319_v59  ;;  %v2351_v20 = vpop.permute.xlu0 %2350  ;;  %v2180_v44 = vmul.f32 %v8821_v11, %v2167_v31  ;;  %3583 = vrot.lane.b32.xlu0 %v5793_v61, %s8822_s17  ;;  %s6982_s17 = sld [smem:[#allocation3 + $0x44]] }
 0x4fa   : > { %v6655_v21 = vadd.f32 %v2299_v62, %v2139_v0  ;;  %v2354_v50 = vsel %vm2347_vm6, %v2351_v20, %v2353_v33  ;;  %v2355_v8 = vsel %vm2347_vm6, %v2353_v33, %v2351_v20  ;;  %v6679_v34 = vmul.f32 %v8823_v43, %v6492_v28 }
 0x4fb   : > { %v2339_v35 = vmul.f32 %v2332_v19, %v2326_v63  ;;  %v2340_v53 = vmul.f32 %v2336_v25, %v2327_v45  ;;  %v2364_v59 = vmul.f32 %v2363_v22, %v2355_v8  ;;  %v2365_v39 = vmul.f32 %v2363_v22, %v2354_v50  ;;  %v2393_v9 = vpop.permute.xlu1 %2392 }
 0x4fc   : > { %v8824_v58 = vmov %v8823_v43  ;;  %v2403_v10 = vstv %s6622_s14  ;;  %vm2747_vm0 = vcmp.lt.s32.totalorder %v8740_v5, 15  ;;  %v2412_v19 = vrot.slane %v4296_v60, %v5234_v24  ;;  %s8825_s14 = smov 95  }
 0x4fd   : > { %v6684_v49 = vmul.f32 %v8824_v58, %v6481_v37  ;;  %v6696_v54 = vadd.f32 %v2339_v35, %v2179_v32  ;;  %v6698_v28 = vadd.f32 %v2340_v53, %v2180_v44  ;;  %v2366_v37 = vadd.f32 %v2364_v59, %v6337_v12  ;;  %v2391_v14 = vpop.permute.xlu0 %2390  ;;  %3625 = vrot.lane.b32.xlu1 %v5797_v18, %s8825_s14  ;;  %v8830_v32 = vld [vmem:[#allocation48_spill] sm:$0xff] }
 0x4fe   : > { %v2367_v0 = vadd.f32 %v2365_v39, %v6341_v3  ;;  %v2416_v25 = vrot.slane %v4296_v60, %v5238_v42  ;;  %v2394_v2 = vsel %vm2387_vm7, %v2391_v14, %v2393_v9  ;;  %v2395_v46 = vsel %vm2387_vm7, %v2393_v9, %v2391_v14  ;;  %v4299_v3 = vld [vmem:[%s8795_s13 + $0x12] ss:$8 sm:$0x3]  ;;  %3623 = vrot.lane.b32.xlu0 %v5793_v61, %s8825_s14  ;;  %v8831_v53 = vld [vmem:[#allocation122_spill] sm:$0xff]  ;;  %s6798_s14 = sld [smem:[#allocation3 + $0x3f]] }
 0x4ff   : > { %v2379_v57 = vmul.f32 %v2372_v41, %v2366_v37  ;;  %v2404_v7 = vmul.f32 %v2403_v10, %v2395_v46  ;;  %v2405_v12 = vmul.f32 %v2403_v10, %v2394_v2  ;;  %v2668_v1 = vsel %vm2667_vm14, %v5755_v6, %v5753_v26  ;;  %v2433_v17 = vpop.permute.xlu1 %2432  ;;  %v8832_v39 = vld [vmem:[#allocation123_spill] sm:$0xff] }
 0x500   : > { %v2380_v23 = vmul.f32 %v2376_v4, %v2367_v0  ;;  %v8826_v31 = vstv %s5995_s21  ;;  %v2443_v55 = vstv %s6652_s7  ;;  %vm2787_vm1 = vcmp.lt.s32.totalorder %v8740_v5, 14  ;;  %s8827_s7 = smov 94   ;;  %s8833_s21 = smov 93  }
 0x501   : > { %v6719_v13 = vmul.f32 %v8826_v31, %v2669_v47  ;;  %v6729_v62 = vadd.f32 %v2379_v57, %v6595_v36  ;;  %v2406_v26 = vadd.f32 %v2404_v7, %v6353_v40  ;;  %v2407_v6 = vadd.f32 %v2405_v12, %v6357_v30  ;;  %v2431_v48 = vpop.permute.xlu0 %2430  ;;  %3665 = vrot.lane.b32.xlu1 %v5797_v18, %s8827_s7  ;;  %v4302_v40 = vld [vmem:[%s8795_s13 + $0x13] ss:$8 sm:$0x3] }
 0x502   : > { %v6732_v56 = vadd.f32 %v2380_v23, %v6597_v38  ;;  %v2452_v22 = vrot.slane %v4299_v3, %v5234_v24  ;;  %v2456_v41 = vrot.slane %v4299_v3, %v5238_v42  ;;  %v2434_v4 = vsel %vm2427_vm8, %v2431_v48, %v2433_v17  ;;  %3663 = vrot.lane.b32.xlu0 %v5793_v61, %s8827_s7  ;;  %v8836_v23 = vld [vmem:[#allocation50_spill] sm:$0xff]  ;;  %v8837_v7 = vld [vmem:[#allocation49_spill] sm:$0xff]  ;;  %s8846_s7 = sld [smem:[#allocation100_spill]] }
 0x503   : > { %v2435_v36 = vsel %vm2427_vm8, %v2433_v17, %v2431_v48  ;;  %v2419_v63 = vmul.f32 %v2412_v19, %v2406_v26  ;;  %v2420_v38 = vmul.f32 %v2416_v25, %v2407_v6  ;;  %v2445_v33 = vmul.f32 %v2443_v55, %v2434_v4  ;;  %v2473_v43 = vpop.permute.xlu1 %2472  ;;  %v4305_v19 = vld [vmem:[%s8795_s13 + $0x14] ss:$8 sm:$0x3]  ;;  %v8839_v6 = vld [vmem:[#allocation125_spill] sm:$0xff] }
 0x504   : > { %v2444_v45 = vmul.f32 %v2443_v55, %v2435_v36  ;;  %v8828_v30 = vmov %v8826_v31  ;;  %v2708_v11 = vsel %vm2707_vm15, %v8830_v32, %v8829_v29  ;;  %v2709_v44 = vsel %vm2707_vm15, %v8829_v29, %v8830_v32  ;;  %v8838_v55 = vld [vmem:[#allocation124_spill] sm:$0xff]  ;;  %v8842_v32 = vld [vmem:[#allocation52_spill] sm:$0xff] }
 0x505   : > { %v6749_v20 = vmul.f32 %v8828_v30, %v2668_v1  ;;  %v2483_v50 = vstv %s6693_s24  ;;  %v6765_v8 = vadd.f32 %v2419_v63, %v6624_v52  ;;  %v6768_v35 = vadd.f32 %v2420_v38, %v6626_v15  ;;  %v2471_v58 = vpop.permute.xlu0 %2470  ;;  %3705 = vrot.lane.b32.xlu1 %v5797_v18, %s8833_s21  ;;  %s8889_s24 = sld [smem:[#allocation107_spill]] }
 0x506   : > { %v2446_v59 = vadd.f32 %v2444_v45, %v8831_v53  ;;  %v2447_v60 = vadd.f32 %v2445_v33, %v8832_v39  ;;  %v2492_v47 = vrot.slane %v4302_v40, %v5234_v24  ;;  %v2496_v10 = vrot.slane %v4302_v40, %v5238_v42  ;;  %3703 = vrot.lane.b32.xlu0 %v5793_v61, %s8833_s21  ;;  %v4308_v33 = vld [vmem:[%s8795_s13 + $0x15] ss:$8 sm:$0x3]  ;;  %v8844_v39 = vld [vmem:[#allocation126_spill] sm:$0xff]  ;;  %s6872_s21 = sld [smem:[#allocation3 + $0x41]] }
 0x507   : > { %v2474_v52 = vsel %vm2467_vm9, %v2471_v58, %v2473_v43  ;;  %v2475_v37 = vsel %vm2467_vm9, %v2473_v43, %v2471_v58  ;;  %v8834_v25 = vstv %s5997_s18  ;;  %v2749_v12 = vsel %vm2747_vm0, %v8837_v7, %v8836_v23  ;;  %v2513_v48 = vpop.permute.xlu1 %2512  ;;  %s8840_s18 = smov 83   ;;  %v8845_v43 = vld [vmem:[#allocation127_spill] sm:$0xff] }
 0x508   : > { %v2459_v15 = vmul.f32 %v2452_v22, %v2446_v59  ;;  %v2460_v0 = vmul.f32 %v2456_v41, %v2447_v60  ;;  %v2484_v9 = vmul.f32 %v2483_v50, %v2475_v37  ;;  %v2485_v14 = vmul.f32 %v2483_v50, %v2474_v52 }
 0x509   : > { %v6785_v2 = vmul.f32 %v8834_v25, %v2709_v44  ;;  %v8835_v46 = vmov %v8834_v25  ;;  %v2523_v3 = vstv %s6725_s28  ;;  %vm2827_vm2 = vcmp.lt.s32.totalorder %v8740_v5, 13  ;;  %v2511_v22 = vpop.permute.xlu0 %2510  ;;  %3745 = vrot.lane.b32.xlu1 %v5797_v18, %s8840_s18  ;;  %s6835_s28 = sld [smem:[#allocation3 + $0x40]] }
 0x50a   : > { %v6789_v57 = vmul.f32 %v8835_v46, %v2708_v11  ;;  %v6802_v1 = vadd.f32 %v2459_v15, %v6655_v21  ;;  %v6805_v31 = vadd.f32 %v2460_v0, %v6657_v16  ;;  %v2486_v26 = vadd.f32 %v2484_v9, %v8838_v55  ;;  %v8843_v11 = vld [vmem:[#allocation51_spill] sm:$0xff]  ;;  %3743 = vrot.lane.b32.xlu0 %v5793_v61, %s8840_s18  ;;  %s8858_s18 = smov 80  }
 0x50b   : > { %v2487_v17 = vadd.f32 %v2485_v14, %v8839_v6  ;;  %v2532_v41 = vrot.slane %v4305_v19, %v5234_v24  ;;  %v2536_v4 = vrot.slane %v4305_v19, %v5238_v42  ;;  %v2514_v36 = vsel %vm2507_vm10, %v2511_v22, %v2513_v48  ;;  %v4311_v19 = vld [vmem:[%s8795_s13 + $0x16] ss:$8 sm:$0x3] }
 0x50c   : > { %v2515_v21 = vsel %vm2507_vm10, %v2513_v48, %v2511_v22  ;;  %v2499_v16 = vmul.f32 %v2492_v47, %v2486_v26  ;;  %v2525_v45 = vmul.f32 %v2523_v3, %v2514_v36  ;;  %v2748_v40 = vsel %vm2747_vm0, %v8836_v23, %v8837_v7  ;;  %v2553_v47 = vpop.permute.xlu1 %2552  ;;  %v8850_v6 = vld [vmem:[#allocation128_spill] sm:$0xff]  ;;  %v8851_v48 = vld [vmem:[#allocation129_spill] sm:$0xff] }
 0x50d   : > { %v2500_v63 = vmul.f32 %v2496_v10, %v2487_v17  ;;  %v2524_v38 = vmul.f32 %v2523_v3, %v2515_v21  ;;  %v8841_v30 = vstv %s6003_s23  ;;  %v2789_v44 = vsel %vm2787_vm1, %v8843_v11, %v8842_v32  ;;  %v2551_v10 = vpop.permute.xlu0 %2550  ;;  %3785 = vrot.lane.b32.xlu1 %v5797_v18, %s8847_s10  ;;  %s8852_s23 = smov 81  }
 0x50e   : > { %v6826_v29 = vmul.f32 %v8841_v30, %v2749_v12  ;;  %v2563_v50 = vstv %s6762_s9  ;;  %vm2867_vm3 = vcmp.lt.s32.totalorder %v8740_v5, 3  ;;  %v6839_v53 = vadd.f32 %v2499_v16, %v6696_v54  ;;  %3783 = vrot.lane.b32.xlu0 %v5793_v61, %s8847_s10  ;;  %s8867_s9 = smov 78   ;;  %s8882_s10 = sld [smem:[#allocation104_spill]] }
 0x50f   : > { %v6842_v59 = vadd.f32 %v2500_v63, %v6698_v28  ;;  %v2526_v60 = vadd.f32 %v2524_v38, %v8844_v39  ;;  %v2527_v58 = vadd.f32 %v2525_v45, %v8845_v43  ;;  %v2572_v52 = vrot.slane %v4308_v33, %v5234_v24 }
 0x510   : > { %v2576_v37 = vrot.slane %v4308_v33, %v5238_v42  ;;  %v2554_v54 = vsel %vm2547_vm11, %v2551_v10, %v2553_v47  ;;  %v2555_v15 = vsel %vm2547_vm11, %v2553_v47, %v2551_v10  ;;  %v8848_v25 = vmov %v8841_v30  ;;  %v4314_v33 = vld [vmem:[%s8795_s13 + $0x17] ss:$8 sm:$0x3] }
 0x511   : > { %v2539_v28 = vmul.f32 %v2532_v41, %v2526_v60  ;;  %v2540_v0 = vmul.f32 %v2536_v4, %v2527_v58  ;;  %v2564_v9 = vmul.f32 %v2563_v50, %v2555_v15  ;;  %v2565_v14 = vmul.f32 %v2563_v50, %v2554_v54  ;;  %v2593_v41 = vpop.permute.xlu1 %2592  ;;  %v2591_v4 = vpop.permute.xlu0 %2590  ;;  %3825 = vrot.lane.b32.xlu1 %v5797_v18, %s8852_s23  ;;  %v8856_v58 = vld [vmem:[#allocation130_spill] sm:$0xff]  ;;  %v8857_v10 = vld [vmem:[#allocation131_spill] sm:$0xff] }
 0x512   : > { %v6859_v46 = vmul.f32 %v8848_v25, %v2748_v40  ;;  %v2788_v23 = vsel %vm2787_vm1, %v8842_v32, %v8843_v11  ;;  %v8849_v7 = vstv %s8846_s7  ;;  %v2603_v3 = vstv %s6798_s14  ;;  %v8854_v32 = vld [vmem:[#allocation53_spill] sm:$0xff]  ;;  %v8855_v11 = vld [vmem:[#allocation54_spill] sm:$0xff]  ;;  %3823 = vrot.lane.b32.xlu0 %v5793_v61, %s8852_s23  ;;  %s6909_s14 = sld [smem:[#allocation3 + $0x42]]  ;;  %v4317_v25 = vld [vmem:[%s8795_s13 + $0x20] ss:$8 sm:$0x3] }
 0x513   : > { %v6867_v12 = vmul.f32 %v8849_v7, %v2789_v44  ;;  %vm2907_vm4 = vcmp.lt.s32.totalorder %v8740_v5, 2  ;;  %v6876_v55 = vadd.f32 %v2539_v28, %v6729_v62  ;;  %v6879_v26 = vadd.f32 %v2540_v0, %v6732_v56  ;;  %s7121_s7 = sld [smem:[#allocation3 + $0x48]] }
 0x514   : > { %v2566_v17 = vadd.f32 %v2564_v9, %v8850_v6  ;;  %v2567_v22 = vadd.f32 %v2565_v14, %v8851_v48  ;;  %v2612_v36 = vrot.slane %v4311_v19, %v5234_v24  ;;  %v2616_v21 = vrot.slane %v4311_v19, %v5238_v42  ;;  %v8862_v48 = vld [vmem:[#allocation55_spill] sm:$0xff]  ;;  %s7716_s23 = sld [smem:[#allocation3 + $0x59]] }
 0x515   : > { %v2594_v16 = vsel %vm2587_vm13, %v2591_v4, %v2593_v41  ;;  %v2595_v62 = vsel %vm2587_vm13, %v2593_v41, %v2591_v4  ;;  %v8853_v40 = vmov %v8849_v7  ;;  %v2828_v44 = vsel %vm2827_vm2, %v8855_v11, %v8854_v32  ;;  %v2631_v54 = vpop.permute.xlu0 %2630  ;;  %3865 = vrot.lane.b32.xlu1 %v5797_v18, %s8858_s18 }
 0x516   : > { %v2579_v63 = vmul.f32 %v2572_v52, %v2566_v17  ;;  %v2580_v56 = vmul.f32 %v2576_v37, %v2567_v22  ;;  %v2604_v38 = vmul.f32 %v2603_v3, %v2595_v62  ;;  %v2605_v45 = vmul.f32 %v2603_v3, %v2594_v16  ;;  %v2633_v37 = vpop.permute.xlu1 %2632  ;;  %v8861_v17 = vld [vmem:[#allocation56_spill] sm:$0xff]  ;;  %3863 = vrot.lane.b32.xlu0 %v5793_v61, %s8858_s18  ;;  %s7056_s18 = sld [smem:[#allocation3 + $0x46]] }
 0x517   : > { %v6896_v30 = vmul.f32 %v8853_v40, %v2788_v23  ;;  %v2829_v50 = vsel %vm2827_vm2, %v8854_v32, %v8855_v11  ;;  %v2643_v39 = vstv %s6835_s28  ;;  %v2652_v15 = vrot.slane %v4314_v33, %v5234_v24  ;;  %s6945_s28 = sld [smem:[#allocation3 + $0x43]] }
 0x518   : > { %v6912_v60 = vadd.f32 %v2579_v63, %v6765_v8  ;;  %v6915_v43 = vadd.f32 %v2580_v56, %v6768_v35  ;;  %v2606_v47 = vadd.f32 %v2604_v38, %v8856_v58  ;;  %v2607_v52 = vadd.f32 %v2605_v45, %v8857_v10 }
 0x519   : > { %v2656_v28 = vrot.slane %v4314_v33, %v5238_v42  ;;  %v2634_v8 = vsel %vm2627_vm12, %v2631_v54, %v2633_v37  ;;  %v2635_v0 = vsel %vm2627_vm12, %v2633_v37, %v2631_v54  ;;  %v8859_v23 = vstv %s6011_s2  ;;  %v2671_v63 = vpop.permute.xlu0 %2670  ;;  %s8863_s2 = smov 79  }
 0x51a   : > { %v2619_v35 = vmul.f32 %v2612_v36, %v2606_v47  ;;  %v2620_v9 = vmul.f32 %v2616_v21, %v2607_v52  ;;  %v2644_v14 = vmul.f32 %v2643_v39, %v2635_v0  ;;  %v2645_v19 = vmul.f32 %v2643_v39, %v2634_v8  ;;  %v2673_v62 = vpop.permute.xlu1 %2672  ;;  %3905 = vrot.lane.b32.xlu1 %v5797_v18, %s8863_s2  ;;  %v8866_v39 = vld [vmem:[#allocation57_spill] sm:$0xff] }
 0x51b   : > { %v6932_v7 = vmul.f32 %v8859_v23, %v2829_v50  ;;  %v8860_v3 = vmov %v8859_v23  ;;  %v2869_v22 = vsel %vm2867_vm3, %v8862_v48, %v8861_v17  ;;  %v2683_v41 = vstv %s6872_s21  ;;  %v8865_v50 = vld [vmem:[#allocation58_spill] sm:$0xff]  ;;  %3903 = vrot.lane.b32.xlu0 %v5793_v61, %s8863_s2  ;;  %s7153_s21 = sld [smem:[#allocation3 + $0x4a]] }
 0x51c   : > { %v6936_v6 = vmul.f32 %v8860_v3, %v2828_v44  ;;  %vm2947_vm5 = vcmp.lt.s32.totalorder %v8740_v5, 1  ;;  %v6949_v4 = vadd.f32 %v2619_v35, %v6802_v1  ;;  %v6952_v36 = vadd.f32 %v2620_v9, %v6805_v31  ;;  %s7795_s2 = sld [smem:[#allocation3 + $0x5d]] }
 0x51d   : > { %v2646_v21 = vadd.f32 %v2644_v14, %v6679_v34  ;;  %v2647_v16 = vadd.f32 %v2645_v19, %v6684_v49  ;;  %v2692_v56 = vrot.slane %v4317_v25, %v5234_v24  ;;  %v2696_v38 = vrot.slane %v4317_v25, %v5238_v42  ;;  %v4320_v34 = vld [vmem:[%s8795_s13 + $0x21] ss:$8 sm:$0x3] }
 0x51e   : > { %v2674_v45 = vsel %vm2667_vm14, %v2671_v63, %v2673_v62  ;;  %v2675_v1 = vsel %vm2667_vm14, %v2673_v62, %v2671_v63  ;;  %v2868_v49 = vsel %vm2867_vm3, %v8861_v17, %v8862_v48  ;;  %v8864_v11 = vstv %s6013_s19  ;;  %3945 = vrot.lane.b32.xlu1 %v5797_v18, %s8867_s9  ;;  %s8870_s19 = smov 77  }
 0x51f   : > { %v2659_v31 = vmul.f32 %v2652_v15, %v2646_v21  ;;  %v2660_v33 = vmul.f32 %v2656_v28, %v2647_v16  ;;  %v2684_v40 = vmul.f32 %v2683_v41, %v2675_v1  ;;  %v2685_v32 = vmul.f32 %v2683_v41, %v2674_v45  ;;  %v2713_v15 = vpop.permute.xlu1 %2712  ;;  %v2711_v28 = vpop.permute.xlu0 %2710  ;;  %3943 = vrot.lane.b32.xlu0 %v5793_v61, %s8867_s9  ;;  %s7813_s9 = sld [smem:[#allocation3 + $0x5e]] }
 0x520   : > { %v6973_v44 = vmul.f32 %v8864_v11, %v2869_v22  ;;  %v2909_v58 = vsel %vm2907_vm4, %v8866_v39, %v8865_v50  ;;  %v2723_v47 = vstv %s6909_s14  ;;  %vm3060_vm6 = vcmp.lt.s32.totalorder %v8740_v5, 127  ;;  %s8965_s14 = sld [smem:[#allocation91_spill]] }
 0x521   : > { %v6986_v10 = vadd.f32 %v2659_v31, %v6839_v53  ;;  %v6989_v52 = vadd.f32 %v2660_v33, %v6842_v59  ;;  %v2686_v37 = vadd.f32 %v2684_v40, %v6719_v13  ;;  %v2687_v54 = vadd.f32 %v2685_v32, %v6749_v20  ;;  %v4323_v20 = vld [vmem:[%s8795_s13 + $0x22] ss:$8 sm:$0x3] }
 0x522   : > { %v2732_v8 = vrot.slane %v4320_v34, %v5234_v24  ;;  %v2736_v0 = vrot.slane %v4320_v34, %v5238_v42  ;;  %v2714_v53 = vsel %vm2707_vm15, %v2711_v28, %v2713_v15  ;;  %v2715_v35 = vsel %vm2707_vm15, %v2713_v15, %v2711_v28  ;;  %3985 = vrot.lane.b32.xlu1 %v5797_v18, %s8870_s19  ;;  %v8872_v32 = vld [vmem:[#allocation59_spill] sm:$0xff]  ;;  %v8873_v34 = vld [vmem:[#allocation60_spill] sm:$0xff] }
 0x523   : > { %v2699_v59 = vmul.f32 %v2692_v56, %v2686_v37  ;;  %v2700_v9 = vmul.f32 %v2696_v38, %v2687_v54  ;;  %v2724_v14 = vmul.f32 %v2723_v47, %v2715_v35  ;;  %v2725_v13 = vmul.f32 %v2723_v47, %v2714_v53  ;;  %v2753_v62 = vpop.permute.xlu1 %2752  ;;  %v2751_v63 = vpop.permute.xlu0 %2750  ;;  %3983 = vrot.lane.b32.xlu0 %v5793_v61, %s8870_s19  ;;  %s7174_s19 = sld [smem:[#allocation3 + $0x4b]] }
 0x524   : > { %v8868_v19 = vmov %v8864_v11  ;;  %v2908_v23 = vsel %vm2907_vm4, %v8865_v50, %v8866_v39  ;;  %v8869_v3 = vstv %s6019_s3  ;;  %v2763_v48 = vstv %s6945_s28  ;;  %s8878_s28 = sld [smem:[#allocation103_spill]] }
 0x525   : > { %v7006_v25 = vmul.f32 %v8868_v19, %v2868_v49  ;;  %v7014_v17 = vmul.f32 %v8869_v3, %v2909_v58  ;;  %vm3100_vm7 = vcmp.lt.s32.totalorder %v8740_v5, 126  ;;  %v7023_v22 = vadd.f32 %v2699_v59, %v6876_v55  ;;  %s7207_s3 = sld [smem:[#allocation3 + $0x4c]] }
 0x526   : > { %v7026_v41 = vadd.f32 %v2700_v9, %v6879_v26  ;;  %v2726_v21 = vadd.f32 %v2724_v14, %v6785_v2  ;;  %v2727_v16 = vadd.f32 %v2725_v13, %v6789_v57  ;;  %v2772_v56 = vrot.slane %v4323_v20, %v5234_v24  ;;  %v4326_v2 = vld [vmem:[%s8795_s13 + $0x23] ss:$8 sm:$0x3]  ;;  %v8876_v14 = vld [vmem:[#allocation61_spill] sm:$0xff]  ;;  %v8877_v13 = vld [vmem:[#allocation62_spill] sm:$0xff] }
 0x527   : > { %v2776_v38 = vrot.slane %v4323_v20, %v5238_v42  ;;  %v2754_v45 = vsel %vm2747_vm0, %v2751_v63, %v2753_v62  ;;  %v2755_v55 = vsel %vm2747_vm0, %v2753_v62, %v2751_v63  ;;  %v8871_v57 = vmov %v8869_v3  ;;  %v2793_v37 = vpop.permute.xlu1 %2792  ;;  %v2791_v54 = vpop.permute.xlu0 %2790 }
 0x528   : > { %v2739_v1 = vmul.f32 %v2732_v8, %v2726_v21  ;;  %v2740_v26 = vmul.f32 %v2736_v0, %v2727_v16  ;;  %v2764_v31 = vmul.f32 %v2763_v48, %v2755_v55  ;;  %v2765_v33 = vmul.f32 %v2763_v48, %v2754_v45 }
 0x529   : > { %v7043_v40 = vmul.f32 %v8871_v57, %v2908_v23  ;;  %v2948_v49 = vsel %vm2947_vm5, %v8873_v34, %v8872_v32  ;;  %v2949_v11 = vsel %vm2947_vm5, %v8872_v32, %v8873_v34  ;;  %v2803_v18 = vstv %s6982_s17 }
 0x52a   : > { %v7059_v50 = vadd.f32 %v2739_v1, %v6912_v60  ;;  %v7062_v39 = vadd.f32 %v2740_v26, %v6915_v43  ;;  %v2766_v58 = vadd.f32 %v2764_v31, %v6826_v29  ;;  %v2767_v47 = vadd.f32 %v2765_v33, %v6859_v46  ;;  %v4329_v29 = vld [vmem:[%s8795_s13 + $0x24] ss:$8 sm:$0x3] }
 0x52b   : > { %v2812_v61 = vrot.slane %v4326_v2, %v5234_v24  ;;  %v2816_v15 = vrot.slane %v4326_v2, %v5238_v42  ;;  %v2794_v28 = vsel %vm2787_vm1, %v2791_v54, %v2793_v37  ;;  %v2795_v60 = vsel %vm2787_vm1, %v2793_v37, %v2791_v54  ;;  %v2833_v16 = vpop.permute.xlu1 %2832  ;;  %v2831_v62 = vpop.permute.xlu0 %2830  ;;  %v8880_v33 = vld [vmem:[#allocation63_spill] sm:$0xff]  ;;  %v8881_v2 = vld [vmem:[#allocation64_spill] sm:$0xff] }
 0x52c   : > { %v2779_v8 = vmul.f32 %v2772_v56, %v2766_v58  ;;  %v2780_v43 = vmul.f32 %v2776_v38, %v2767_v47  ;;  %v2804_v0 = vmul.f32 %v2803_v18, %v2795_v60  ;;  %v2805_v53 = vmul.f32 %v2803_v18, %v2794_v28 }
 0x52d   : > { %v8874_v46 = vstv %s6021_s4  ;;  %v3061_v20 = vsel %vm3060_vm6, %v8877_v13, %v8876_v14  ;;  %v2843_v19 = vstv %s7019_s16  ;;  %vm3140_vm8 = vcmp.lt.s32.totalorder %v8740_v5, 125  ;;  %s8895_s4 = sld [smem:[#allocation108_spill]] }
 0x52e   : > { %v7077_v35 = vmul.f32 %v8874_v46, %v2949_v11  ;;  %v8875_v59 = vmov %v8874_v46  ;;  %v7092_v23 = vadd.f32 %v2779_v8, %v6949_v4  ;;  %v7095_v3 = vadd.f32 %v2780_v43, %v6952_v36 }
 0x52f   : > { %v7081_v9 = vmul.f32 %v8875_v59, %v2948_v49  ;;  %v2806_v48 = vadd.f32 %v2804_v0, %v6867_v12  ;;  %v2807_v21 = vadd.f32 %v2805_v53, %v6896_v30  ;;  %v2852_v63 = vrot.slane %v4329_v29, %v5234_v24  ;;  %v4332_v12 = vld [vmem:[%s8795_s13 + $0x25] ss:$8 sm:$0x3]  ;;  %v2873_v58 = vpop.permute.xlu1 %2872  ;;  %v2871_v47 = vpop.permute.xlu0 %2870 }
 0x530   : > { %v2856_v56 = vrot.slane %v4329_v29, %v5238_v42  ;;  %v2834_v38 = vsel %vm2827_vm2, %v2831_v62, %v2833_v16  ;;  %v2835_v4 = vsel %vm2827_vm2, %v2833_v16, %v2831_v62  ;;  %v3062_v30 = vsel %vm3060_vm6, %v8876_v14, %v8877_v13 }
 0x531   : > { %v2819_v45 = vmul.f32 %v2812_v61, %v2806_v48  ;;  %v2820_v36 = vmul.f32 %v2816_v15, %v2807_v21  ;;  %v2844_v55 = vmul.f32 %v2843_v19, %v2835_v4  ;;  %v2845_v1 = vmul.f32 %v2843_v19, %v2834_v38  ;;  %v8886_v38 = vld [vmem:[#allocation66_spill] sm:$0xff] }
 0x532   : > { %v8879_v26 = vstv %s8878_s28  ;;  %v3101_v57 = vsel %vm3100_vm7, %v8881_v2, %v8880_v33  ;;  %v2883_v32 = vstv %s7056_s18  ;;  %v2892_v37 = vrot.slane %v4332_v12, %v5234_v24  ;;  %s7238_s28 = sld [smem:[#allocation3 + $0x4d]] }
 0x533   : > { %v7114_v31 = vmul.f32 %v8879_v26, %v3061_v20  ;;  %v7124_v34 = vadd.f32 %v2819_v45, %v6986_v10  ;;  %v7127_v49 = vadd.f32 %v2820_v36, %v6989_v52  ;;  %v2846_v11 = vadd.f32 %v2844_v55, %v6932_v7  ;;  %v4335_v7 = vld [vmem:[%s8795_s13 + $0x26] ss:$8 sm:$0x3]  ;;  %v2913_v20 = vpop.permute.xlu1 %2912  ;;  %v2911_v19 = vpop.permute.xlu0 %2910  ;;  %v8887_v36 = vld [vmem:[#allocation45_spill] sm:$0xff]  ;;  %s8966_s18 = sld [smem:[#allocation121_spill]] }
 0x534   : > { %v2847_v18 = vadd.f32 %v2845_v1, %v6936_v6  ;;  %v2896_v54 = vrot.slane %v4332_v12, %v5238_v42  ;;  %v2874_v61 = vsel %vm2867_vm3, %v2871_v47, %v2873_v58  ;;  %v2875_v10 = vsel %vm2867_vm3, %v2873_v58, %v2871_v47  ;;  %v8888_v1 = vld [vmem:[#allocation46_spill] sm:$0xff] }
 0x535   : > { %v2859_v52 = vmul.f32 %v2852_v63, %v2846_v11  ;;  %v2884_v28 = vmul.f32 %v2883_v32, %v2875_v10  ;;  %v2885_v60 = vmul.f32 %v2883_v32, %v2874_v61  ;;  %v8883_v6 = vmov %v8879_v26 }
 0x536   : > { %v2860_v15 = vmul.f32 %v2856_v56, %v2847_v18  ;;  %v7142_v8 = vmul.f32 %v8883_v6, %v3062_v30  ;;  %v3102_v43 = vsel %vm3100_vm7, %v8880_v33, %v8881_v2  ;;  %v8884_v0 = vstv %s8882_s10  ;;  %s7266_s10 = sld [smem:[#allocation3 + $0x4e]] }
 0x537   : > { %v7150_v53 = vmul.f32 %v8884_v0, %v3101_v57  ;;  %v2923_v29 = vstv %s7088_s29  ;;  %vm3180_vm9 = vcmp.lt.s32.totalorder %v8740_v5, 115  ;;  %v2861_v46 = vadd.f32 %v2859_v52, %v7023_v22  ;;  %v2953_v57 = vpop.permute.xlu1 %2952  ;;  %v2951_v32 = vpop.permute.xlu0 %2950  ;;  %s7885_s29 = sld [smem:[#allocation3 + $0x61]] }
 0x538   : > { %v2862_v59 = vadd.f32 %v2860_v15, %v7026_v41  ;;  %v2886_v14 = vadd.f32 %v2884_v28, %v6973_v44  ;;  %v2887_v13 = vadd.f32 %v2885_v60, %v7006_v25  ;;  %v2932_v48 = vrot.slane %v4335_v7, %v5234_v24  ;;  %v4338_v44 = vld [vmem:[%s8795_s13 + $0x27] ss:$8 sm:$0x3]  ;;  %v8885_v25 = vld [vmem:[#allocation65_spill] sm:$0xff] }
 0x539   : > { %v2936_v21 = vrot.slane %v4335_v7, %v5238_v42  ;;  %v2914_v16 = vsel %vm2907_vm4, %v2911_v19, %v2913_v20  ;;  %v2915_v62 = vsel %vm2907_vm4, %v2913_v20, %v2911_v19  ;;  %v3141_v4 = vsel %vm3140_vm8, %v8886_v38, %v8885_v25 }
 0x53a   : > { %v2899_v22 = vmul.f32 %v2892_v37, %v2886_v14  ;;  %v2900_v63 = vmul.f32 %v2896_v54, %v2887_v13  ;;  %v2924_v56 = vmul.f32 %v2923_v29, %v2915_v62  ;;  %v2925_v41 = vmul.f32 %v2923_v29, %v2914_v16  ;;  %v8894_v16 = vld [vmem:[#allocation68_spill] sm:$0xff] }
 0x53b   : > { %v2963_v45 = vstv %s7121_s7  ;;  %v7177_v55 = vadd.f32 %v8887_v36, %v2861_v46  ;;  %v7180_v12 = vadd.f32 %v8888_v1, %v2862_v59  ;;  %vm3220_vm10 = vcmp.lt.s32.totalorder %v8740_v5, 114  ;;  %v3064_v29 = vpop.permute.xlu0 %3063 }
 0x53c   : > { %v2901_v30 = vadd.f32 %v2899_v22, %v7059_v50  ;;  %v2902_v26 = vadd.f32 %v2900_v63, %v7062_v39  ;;  %v2926_v33 = vadd.f32 %v2924_v56, %v7014_v17  ;;  %v2927_v2 = vadd.f32 %v2925_v41, %v7043_v40  ;;  %v4344_v17 = vld [vmem:[%s8795_s13 + $0x31] ss:$8 sm:$0x3] }
 0x53d   : > { %v2972_v11 = vrot.slane %v4338_v44, %v5234_v24  ;;  %v2976_v18 = vrot.slane %v4338_v44, %v5238_v42  ;;  %v2954_v58 = vsel %vm2947_vm5, %v2951_v32, %v2953_v57  ;;  %v2955_v50 = vsel %vm2947_vm5, %v2953_v57, %v2951_v32 }
 0x53e   : > { %v2939_v47 = vmul.f32 %v2932_v48, %v2926_v33  ;;  %v2940_v39 = vmul.f32 %v2936_v21, %v2927_v2  ;;  %v2964_v37 = vmul.f32 %v2963_v45, %v2955_v50  ;;  %v2965_v54 = vmul.f32 %v2963_v45, %v2954_v58  ;;  %v8893_v21 = vld [vmem:[#allocation67_spill] sm:$0xff]  ;;  %v8898_v58 = vld [vmem:[#allocation69_spill] sm:$0xff]  ;;  %v8899_v50 = vld [vmem:[#allocation70_spill] sm:$0xff] }
 0x53f   : > { %v8890_v40 = vmov %v8884_v0  ;;  %v3142_v10 = vsel %vm3140_vm8, %v8885_v25, %v8886_v38  ;;  %v8891_v52 = vstv %s8889_s24  ;;  %v3076_v28 = vstv %s7153_s21  ;;  %v3066_v0 = vpop.permute.xlu1 %3065  ;;  %s7294_s21 = sld [smem:[#allocation3 + $0x4f]] }
 0x540   : > { %v3114_v61 = vmul.f32 %v8890_v40, %v3102_v43  ;;  %v7204_v15 = vmul.f32 %v8891_v52, %v3141_v4  ;;  %vm3260_vm11 = vcmp.lt.s32.totalorder %v8740_v5, 113  ;;  %v7211_v60 = vadd.f32 %v2939_v47, %v7092_v23  ;;  %v3104_v4 = vpop.permute.xlu0 %3103  ;;  %s7581_s24 = sld [smem:[#allocation3 + $0x53]] }
 0x541   : > { %v7214_v7 = vadd.f32 %v2940_v39, %v7095_v3  ;;  %v2966_v6 = vadd.f32 %v2964_v37, %v7077_v35  ;;  %v2967_v43 = vadd.f32 %v2965_v54, %v7081_v9  ;;  %v3085_v46 = vrot.slane %v4344_v17, %v5234_v24  ;;  %v4347_v35 = vld [vmem:[%s8795_s13 + $0x32] ss:$8 sm:$0x3] }
 0x542   : > { %v3089_v59 = vrot.slane %v4344_v17, %v5238_v42  ;;  %v3067_v14 = vsel %vm3060_vm6, %v3064_v29, %v3066_v0  ;;  %v3068_v23 = vsel %vm3060_vm6, %v3066_v0, %v3064_v29  ;;  %v8892_v9 = vmov %v8891_v52 }
 0x543   : > { %v2979_v13 = vmul.f32 %v2972_v11, %v2966_v6  ;;  %v2980_v3 = vmul.f32 %v2976_v18, %v2967_v43  ;;  %v3077_v20 = vmul.f32 %v3076_v28, %v3067_v14  ;;  %v3078_v19 = vmul.f32 %v3076_v28, %v3068_v23  ;;  %v3106_v38 = vpop.permute.xlu1 %3105  ;;  %v8901_v23 = vld [vmem:[#allocation71_spill] sm:$0xff] }
 0x544   : > { %v3154_v48 = vmul.f32 %v8892_v9, %v3142_v10  ;;  %v3181_v62 = vsel %vm3180_vm9, %v8894_v16, %v8893_v21  ;;  %v3182_v22 = vsel %vm3180_vm9, %v8893_v21, %v8894_v16  ;;  %v3116_v63 = vstv %s7174_s19  ;;  %v3144_v52 = vpop.permute.xlu0 %3143 }
 0x545   : > { %v7241_v56 = vadd.f32 %v2979_v13, %v7124_v34  ;;  %v7244_v41 = vadd.f32 %v2980_v3, %v7127_v49  ;;  %v3079_v44 = vadd.f32 %v3077_v20, %v7114_v31  ;;  %v3080_v25 = vadd.f32 %v3078_v19, %v7142_v8  ;;  %v4350_v31 = vld [vmem:[%s8795_s13 + $0x33] ss:$8 sm:$0x3]  ;;  %v8902_v13 = vld [vmem:[#allocation72_spill] sm:$0xff] }
 0x546   : > { %v3125_v45 = vrot.slane %v4347_v35, %v5234_v24  ;;  %v3129_v36 = vrot.slane %v4347_v35, %v5238_v42  ;;  %v3107_v1 = vsel %vm3100_vm7, %v3104_v4, %v3106_v38  ;;  %v3108_v34 = vsel %vm3100_vm7, %v3106_v38, %v3104_v4 }
 0x547   : > { %v3092_v33 = vmul.f32 %v3085_v46, %v3079_v44  ;;  %v3093_v49 = vmul.f32 %v3089_v59, %v3080_v25  ;;  %v3117_v2 = vmul.f32 %v3116_v63, %v3107_v1  ;;  %v3118_v57 = vmul.f32 %v3116_v63, %v3108_v34  ;;  %v3146_v10 = vpop.permute.xlu1 %3145 }
 0x548   : > { %v8896_v8 = vstv %s8895_s4  ;;  %v3221_v47 = vsel %vm3220_vm10, %v8899_v50, %v8898_v58  ;;  %v3156_v39 = vstv %s7207_s3  ;;  %vm3300_vm12 = vcmp.lt.s32.totalorder %v8740_v5, 112  ;;  %s7601_s3 = sld [smem:[#allocation3 + $0x54]] }
 0x549   : > { %v3193_v32 = vmul.f32 %v8896_v8, %v3181_v62  ;;  %v8897_v11 = vmov %v8896_v8  ;;  %v7269_v37 = vadd.f32 %v3092_v33, %v2901_v30  ;;  %v7271_v54 = vadd.f32 %v3093_v49, %v2902_v26  ;;  %v3184_v62 = vpop.permute.xlu0 %3183  ;;  %s7644_s4 = sld [smem:[#allocation3 + $0x56]] }
 0x54a   : > { %v3194_v18 = vmul.f32 %v8897_v11, %v3182_v22  ;;  %v3119_v17 = vadd.f32 %v3117_v2, %v7150_v53  ;;  %v3120_v40 = vadd.f32 %v3118_v57, %v3114_v61  ;;  %v3165_v28 = vrot.slane %v4350_v31, %v5234_v24  ;;  %v4353_v53 = vld [vmem:[%s8795_s13 + $0x34] ss:$8 sm:$0x3] }
 0x54b   : > { %v3169_v6 = vrot.slane %v4350_v31, %v5238_v42  ;;  %v3147_v43 = vsel %vm3140_vm8, %v3144_v52, %v3146_v10  ;;  %v3148_v30 = vsel %vm3140_vm8, %v3146_v10, %v3144_v52  ;;  %v3222_v61 = vsel %vm3220_vm10, %v8898_v58, %v8899_v50  ;;  %v3186_v16 = vpop.permute.xlu1 %3185  ;;  %v8906_v52 = vld [vmem:[#allocation73_spill] sm:$0xff] }
 0x54c   : > { %v3132_v0 = vmul.f32 %v3125_v45, %v3119_v17  ;;  %v3133_v29 = vmul.f32 %v3129_v36, %v3120_v40  ;;  %v3157_v26 = vmul.f32 %v3156_v39, %v3147_v43  ;;  %v3158_v46 = vmul.f32 %v3156_v39, %v3148_v30 }
 0x54d   : > { %v8900_v59 = vstv %s6044_s6  ;;  %v3261_v3 = vsel %vm3260_vm11, %v8902_v13, %v8901_v23  ;;  %v3196_v20 = vstv %s7238_s28  ;;  %vm3340_vm13 = vcmp.lt.s32.totalorder %v8740_v5, 111  ;;  %v3224_v11 = vpop.permute.xlu0 %3223 }
 0x54e   : > { %v3233_v14 = vmul.f32 %v8900_v59, %v3221_v47  ;;  %vm3380_vm14 = vcmp.lt.s32.totalorder %v8740_v5, 110  ;;  %v7299_v19 = vadd.f32 %v3132_v0, %v7211_v60  ;;  %v7302_v35 = vadd.f32 %v3133_v29, %v7214_v7 }
 0x54f   : > { %v3159_v9 = vadd.f32 %v3157_v26, %v7204_v15  ;;  %v3160_v21 = vadd.f32 %v3158_v46, %v3154_v48  ;;  %v3205_v22 = vrot.slane %v4353_v53, %v5234_v24  ;;  %v3209_v63 = vrot.slane %v4353_v53, %v5238_v42  ;;  %v4356_v48 = vld [vmem:[%s8795_s13 + $0x35] ss:$8 sm:$0x3]  ;;  %v3226_v8 = vpop.permute.xlu1 %3225 }
 0x550   : > { %v3187_v44 = vsel %vm3180_vm9, %v3184_v62, %v3186_v16  ;;  %v3188_v60 = vsel %vm3180_vm9, %v3186_v16, %v3184_v62  ;;  %vm3420_vm15 = vcmp.lt.s32.totalorder %v8740_v5, 109  ;;  %v8903_v4 = vmov %v8900_v59 }
 0x551   : > { %v3172_v7 = vmul.f32 %v3165_v28, %v3159_v9  ;;  %v3173_v25 = vmul.f32 %v3169_v6, %v3160_v21  ;;  %v3197_v15 = vmul.f32 %v3196_v20, %v3187_v44  ;;  %v3198_v38 = vmul.f32 %v3196_v20, %v3188_v60  ;;  %v8907_v28 = vld [vmem:[#allocation74_spill] sm:$0xff]  ;;  %v8908_v9 = vld [vmem:[#allocation75_spill] sm:$0xff]  ;;  %v8909_v21 = vld [vmem:[#allocation76_spill] sm:$0xff] }
 0x552   : > { %v3234_v45 = vmul.f32 %v8903_v4, %v3222_v61  ;;  %v3262_v36 = vsel %vm3260_vm11, %v8901_v23, %v8902_v13  ;;  %v8904_v1 = vstv %s6050_s5  ;;  %vm8560_vm0 = vcmp.lt.s32.totalorder %v8740_v5, 99  ;;  %v3264_v61 = vpop.permute.xlu0 %3263  ;;  %s8913_s5 = sld [smem:[#allocation110_spill]] }
 0x553   : > { %v3273_v34 = vmul.f32 %v8904_v1, %v3261_v3  ;;  %v3236_v33 = vstv %s7266_s10  ;;  %v7326_v49 = vadd.f32 %v3172_v7, %v7241_v56  ;;  %v7329_v2 = vadd.f32 %v3173_v25, %v7244_v41  ;;  %v3266_v53 = vpop.permute.xlu1 %3265  ;;  %s7667_s10 = sld [smem:[#allocation3 + $0x57]] }
 0x554   : > { %v3199_v57 = vadd.f32 %v3197_v15, %v3193_v32  ;;  %v3200_v31 = vadd.f32 %v3198_v38, %v3194_v18  ;;  %v3245_v58 = vrot.slane %v4356_v48, %v5234_v24  ;;  %v3249_v50 = vrot.slane %v4356_v48, %v5238_v42  ;;  %v4359_v18 = vld [vmem:[%s8795_s13 + $0x36] ss:$8 sm:$0x3] }
 0x555   : > { %v3227_v47 = vsel %vm3220_vm10, %v3224_v11, %v3226_v8  ;;  %v3228_v56 = vsel %vm3220_vm10, %v3226_v8, %v3224_v11  ;;  %vm3500_vm1 = vcmp.lt.s32.totalorder %v8740_v5, 98  ;;  %v8905_v40 = vmov %v8904_v1  ;;  %v8918_v8 = vld [vmem:[#allocation82_spill] sm:$0xff] }
 0x556   : > { %v3212_v39 = vmul.f32 %v3205_v22, %v3199_v57  ;;  %v3213_v41 = vmul.f32 %v3209_v63, %v3200_v31  ;;  %v3237_v17 = vmul.f32 %v3236_v33, %v3227_v47  ;;  %v3238_v32 = vmul.f32 %v3236_v33, %v3228_v56  ;;  %v8910_v22 = vld [vmem:[#allocation77_spill] sm:$0xff]  ;;  %v8911_v63 = vld [vmem:[#allocation78_spill] sm:$0xff]  ;;  %v8915_v33 = vld [vmem:[#allocation79_spill] sm:$0xff]  ;;  %v7412_v57 = vpop.permute.xlu0 %3303 }
 0x557   : > { %v3274_v10 = vmul.f32 %v8905_v40, %v3262_v36  ;;  %v3301_v6 = vsel %vm3300_vm12, %v8907_v28, %v8906_v52  ;;  %v3302_v43 = vsel %vm3300_vm12, %v8906_v52, %v8907_v28  ;;  %vm3540_vm2 = vcmp.lt.s32.totalorder %v8740_v5, 97  ;;  %v7392_v48 = vpop.permute.xlu1 %3305  ;;  %v8917_v31 = vld [vmem:[#allocation81_spill] sm:$0xff] }
 0x558   : > { %vm3580_vm3 = vcmp.lt.s32.totalorder %v8740_v5, 96  ;;  %v3276_v30 = vstv %s7294_s21  ;;  %vm3620_vm4 = vcmp.lt.s32.totalorder %v8740_v5, 95  ;;  %vm3660_vm5 = vcmp.lt.s32.totalorder %v8740_v5, 94  ;;  %s7692_s21 = sld [smem:[#allocation3 + $0x58]] }
 0x559   : > { %v7357_v0 = vadd.f32 %v3212_v39, %v7177_v55  ;;  %v7360_v29 = vadd.f32 %v3213_v41, %v7180_v12  ;;  %v3239_v26 = vadd.f32 %v3237_v17, %v3233_v14  ;;  %v3240_v46 = vadd.f32 %v3238_v32, %v3234_v45 }
 0x55a   : > { %vm3700_vm6 = vcmp.lt.s32.totalorder %v8740_v5, 93  ;;  %v3285_v59 = vrot.slane %v4359_v18, %v5234_v24  ;;  %v3289_v23 = vrot.slane %v4359_v18, %v5238_v42  ;;  %v3267_v13 = vsel %vm3260_vm11, %v3264_v61, %v3266_v53 }
 0x55b   : > { %v3268_v55 = vsel %vm3260_vm11, %v3266_v53, %v3264_v61  ;;  %v3252_v12 = vmul.f32 %v3245_v58, %v3239_v26  ;;  %v3253_v3 = vmul.f32 %v3249_v50, %v3240_v46  ;;  %v3277_v14 = vmul.f32 %v3276_v30, %v3267_v13  ;;  %v7455_v46 = vpop.permute.xlu1 %3345  ;;  %v8927_v13 = vld [vmem:[#allocation83_spill] sm:$0xff] }
 0x55c   : > { %v3278_v20 = vmul.f32 %v3276_v30, %v3268_v55  ;;  %v3341_v16 = vsel %vm3340_vm13, %v8909_v21, %v8908_v9  ;;  %v3342_v62 = vsel %vm3340_vm13, %v8908_v9, %v8909_v21  ;;  %v3381_v44 = vsel %vm3380_vm14, %v8911_v63, %v8910_v22  ;;  %v8928_v55 = vld [vmem:[#allocation84_spill] sm:$0xff]  ;;  %v8931_v21 = vld [vmem:[#allocation89_spill] sm:$0xff] }
 0x55d   : > { %v3382_v60 = vsel %vm3380_vm14, %v8910_v22, %v8911_v63  ;;  %vm3740_vm7 = vcmp.lt.s32.totalorder %v8740_v5, 83  ;;  %v7387_v7 = vadd.f32 %v3252_v12, %v7269_v37  ;;  %v7390_v25 = vadd.f32 %v3253_v3, %v7271_v54  ;;  %v8916_v37 = vld [vmem:[#allocation80_spill] sm:$0xff]  ;;  %v8929_v3 = vld [vmem:[#allocation87_spill] sm:$0xff] }
 0x55e   : > { %v3279_v15 = vadd.f32 %v3277_v14, %v3273_v34  ;;  %v3280_v38 = vadd.f32 %v3278_v20, %v3274_v10  ;;  %v8912_v4 = vstv %s6060_s20  ;;  %v3421_v54 = vsel %vm3420_vm15, %v8916_v37, %v8915_v33  ;;  %v8930_v14 = vld [vmem:[#allocation88_spill] sm:$0xff]  ;;  %v8933_v63 = vld [vmem:[#allocation92_spill] sm:$0xff]  ;;  %s8943_s20 = sld [smem:[#allocation117_spill]] }
 0x55f   : > { %v7396_v45 = vmul.f32 %v8912_v4, %v3301_v6  ;;  %v8914_v36 = vmov %v8912_v4  ;;  %v3422_v34 = vsel %vm3420_vm15, %v8915_v33, %v8916_v37  ;;  %vm3780_vm8 = vcmp.lt.s32.totalorder %v8740_v5, 82  ;;  %v8937_v4 = vld [vmem:[#allocation95_spill] sm:$0xff] }
 0x560   : > { %v7400_v1 = vmul.f32 %v8914_v36, %v3302_v43  ;;  %vm3820_vm9 = vcmp.lt.s32.totalorder %v8740_v5, 81  ;;  %v3461_v11 = vsel %vm8560_vm0, %v8918_v8, %v8917_v31  ;;  %v3462_v58 = vsel %vm8560_vm0, %v8917_v31, %v8918_v8  ;;  %v8941_v8 = vld [vmem:[#allocation98_spill] sm:$0xff] }
 0x561   : > { %vm3860_vm10 = vcmp.lt.s32.totalorder %v8740_v5, 80  ;;  %vm3900_vm11 = vcmp.lt.s32.totalorder %v8740_v5, 79  ;;  %v3292_v50 = vmul.f32 %v3285_v59, %v3279_v15  ;;  %v3293_v47 = vmul.f32 %v3289_v23, %v3280_v38  ;;  %v8936_v38 = vld [vmem:[#allocation94_spill] sm:$0xff] }
 0x562   : > { %v8919_v56 = vstv %s6066_s26  ;;  %v8921_v32 = vstv %s8913_s5  ;;  %vm3940_vm0 = vcmp.lt.s32.totalorder %v8740_v5, 78  ;;  %v8923_v52 = vstv %s6091_s25  ;;  %s8938_s26 = sld [smem:[#allocation86_spill]] }
 0x563   : > { %v7426_v39 = vmul.f32 %v8919_v56, %v3341_v16  ;;  %v8920_v41 = vmov %v8919_v56  ;;  %v7434_v18 = vmul.f32 %v8921_v32, %v3381_v44  ;;  %v8922_v40 = vmov %v8921_v32  ;;  %v8932_v16 = vld [vmem:[#allocation90_spill] sm:$0xff]  ;;  %v8934_v44 = vld [vmem:[#allocation93_spill] sm:$0xff]  ;;  %s7523_s25 = sld [smem:[#allocation3 + $0x50]] }
 0x564   : > { %v7430_v17 = vmul.f32 %v8920_v41, %v3342_v62  ;;  %v7438_v10 = vmul.f32 %v8922_v40, %v3382_v60  ;;  %v7443_v28 = vmul.f32 %v8923_v52, %v3421_v54  ;;  %v8924_v6 = vmov %v8923_v52 }
 0x565   : > { %v7447_v43 = vmul.f32 %v8924_v6, %v3422_v34  ;;  %v7450_v30 = vadd.f32 %v3292_v50, %v7299_v19  ;;  %v7453_v26 = vadd.f32 %v3293_v47, %v7302_v35  ;;  %v8925_v53 = vstv %s6097_s22  ;;  %v7473_v35 = vpop.permute.xlu0 %3343  ;;  %s8935_s22 = sld [smem:[#allocation85_spill]]  ;;  %v7525_v47 = vpop.permute.xlu1 %3385 }
 0x566   : > { %v7459_v61 = vmul.f32 %v8925_v53, %v3461_v11  ;;  %v8926_v59 = vmov %v8925_v53  ;;  %v3501_v12 = vsel %vm3500_vm1, %v8928_v55, %v8927_v13  ;;  %v3502_v19 = vsel %vm3500_vm1, %v8927_v13, %v8928_v55  ;;  %v8942_v11 = vld [vmem:[#allocation99_spill] sm:$0xff] }
 0x567   : > { %v7463_v23 = vmul.f32 %v8926_v59, %v3462_v58  ;;  %v3541_v20 = vsel %vm3540_vm2, %v8930_v14, %v8929_v3  ;;  %v3542_v9 = vsel %vm3540_vm2, %v8929_v3, %v8930_v14  ;;  %v3581_v62 = vsel %vm3580_vm3, %v8932_v16, %v8931_v21 }
 0x568   : > { %v3582_v22 = vsel %vm3580_vm3, %v8931_v21, %v8932_v16  ;;  %v3621_v60 = vsel %vm3620_vm4, %v8934_v44, %v8933_v63  ;;  %v3622_v15 = vsel %vm3620_vm4, %v8933_v63, %v8934_v44  ;;  %v3661_v36 = vsel %vm3660_vm5, %v8937_v4, %v8936_v38  ;;  %v8958_v44 = vld [vmem:[#allocation101_spill] sm:$0xff] }
 0x569   : > { %v3662_v33 = vsel %vm3660_vm5, %v8936_v38, %v8937_v4  ;;  %v8939_v37 = vstv %s6107_s0  ;;  %v3701_v58 = vsel %vm3700_vm6, %v8942_v11, %v8941_v8  ;;  %v3702_v50 = vsel %vm3700_vm6, %v8941_v8, %v8942_v11  ;;  %s7543_s0 = sld [smem:[#allocation3 + $0x51]]  ;;  %v7545_v13 = vpop.permute.xlu0 %3383  ;;  %v8961_v4 = vld [vmem:[#allocation105_spill] sm:$0xff]  ;;  %v8964_v8 = vld [vmem:[#allocation109_spill] sm:$0xff] }
 0x56a   : > { %v7509_v54 = vmul.f32 %v8939_v37, %v3501_v12  ;;  %v8940_v34 = vmov %v8939_v37  ;;  %v8944_v56 = vstv %s6135_s8  ;;  %v8946_v52 = vstv %s6144_s27  ;;  %s7563_s8 = sld [smem:[#allocation3 + $0x52]] }
 0x56b   : > { %v7513_v31 = vmul.f32 %v8940_v34, %v3502_v19  ;;  %v7529_v41 = vmul.f32 %v8944_v56, %v3541_v20  ;;  %v8945_v32 = vmov %v8944_v56  ;;  %v7537_v6 = vmul.f32 %v8946_v52, %v3581_v62  ;;  %s8960_s27 = sld [smem:[#allocation118_spill]]  ;;  %v8963_v34 = vld [vmem:[#allocation21_spill] sm:$0xff]  ;;  %v8967_v56 = vld [vmem:[#allocation111_spill] sm:$0xff] }
 0x56c   : > { %v7533_v40 = vmul.f32 %v8945_v32, %v3542_v9  ;;  %v8947_v53 = vmov %v8946_v52  ;;  %v8948_v55 = vstv %s8935_s22  ;;  %v8950_v14 = vstv %s8938_s26  ;;  %v8968_v32 = vld [vmem:[#allocation112_spill] sm:$0xff]  ;;  %s7750_s22 = sld [smem:[#allocation3 + $0x5a]] }
 0x56d   : > { %v7541_v59 = vmul.f32 %v8947_v53, %v3582_v22  ;;  %v7549_v12 = vmul.f32 %v8948_v55, %v3621_v60  ;;  %v8949_v19 = vmov %v8948_v55  ;;  %v7557_v20 = vmul.f32 %v8950_v14, %v3661_v36  ;;  %v8959_v60 = vld [vmem:[#allocation102_spill] sm:$0xff]  ;;  %v8962_v36 = vld [vmem:[#allocation106_spill] sm:$0xff] }
 0x56e   : > { %v7553_v3 = vmul.f32 %v8949_v19, %v3622_v15  ;;  %v8952_v9 = vmov %v8950_v14  ;;  %v8954_v16 = vstv %s8943_s20  ;;  %v3741_v15 = vsel %vm3740_vm7, %v8959_v60, %v8958_v44  ;;  %v8969_v55 = vld [vmem:[#allocation113_spill] sm:$0xff]  ;;  %v8970_v19 = vld [vmem:[#allocation114_spill] sm:$0xff]  ;;  %s7869_s20 = sld [smem:[#allocation3 + $0x60]] }
 0x56f   : > { %8951 = vst [vmem:[#allocation47_spill] sm:$0xff] %v7557_v20  ;;  %v7561_v21 = vmul.f32 %v8952_v9, %v3662_v33  ;;  %v7567_v62 = vmul.f32 %v8954_v16, %v3701_v58  ;;  %v8956_v22 = vmov %v8954_v16  ;;  %v3742_v38 = vsel %vm3740_vm7, %v8958_v44, %v8959_v60  ;;  %v7619_v16 = vpop.permute.xlu0 %3423 }
 0x570   : > { %v7571_v63 = vmul.f32 %v8956_v22, %v3702_v50  ;;  %v3781_v33 = vsel %vm3780_vm8, %v8962_v36, %v8961_v4  ;;  %v3782_v37 = vsel %vm3780_vm8, %v8961_v4, %v8962_v36  ;;  %v3821_v11 = vsel %vm3820_vm9, %v8964_v8, %v8963_v34  ;;  %v7599_v50 = vpop.permute.xlu1 %3425  ;;  %v8975_v36 = vld [vmem:[#allocation115_spill] sm:$0xff] }
 0x571   : > { %8953 = vst [vmem:[#allocation48_spill] sm:$0xff] %v7561_v21  ;;  %8955 = vst [vmem:[#allocation122_spill] sm:$0xff] %v7567_v62  ;;  %v3822_v58 = vsel %vm3820_vm9, %v8963_v34, %v8964_v8  ;;  %v3861_v52 = vsel %vm3860_vm10, %v8968_v32, %v8967_v56  ;;  %v3862_v53 = vsel %vm3860_vm10, %v8967_v56, %v8968_v32  ;;  %v8971_v22 = vstv %s8960_s27  ;;  %v8976_v34 = vld [vmem:[#allocation116_spill] sm:$0xff] }
 0x572   : > { %8957 = vst [vmem:[#allocation123_spill] sm:$0xff] %v7571_v63  ;;  %v3901_v14 = vsel %vm3900_vm11, %v8970_v19, %v8969_v55  ;;  %v3902_v9 = vsel %vm3900_vm11, %v8969_v55, %v8970_v19  ;;  %v7625_v44 = vmul.f32 %v8971_v22, %v3741_v15  ;;  %v8973_v60 = vmov %v8971_v22  ;;  %v7642_v32 = vld [vmem:[%s8795_s13 + $0x37] ss:$8 sm:$0x3] }
 0x573   : > { %v7629_v4 = vmul.f32 %v8973_v60, %v3742_v38  ;;  %v3941_v8 = vsel %vm3940_vm0, %v8976_v34, %v8975_v36  ;;  %v3942_v56 = vsel %vm3940_vm0, %v8975_v36, %v8976_v34  ;;  %v8977_v15 = vstv %s8965_s14 }
 0x574   : > { %8972 = vst [vmem:[#allocation50_spill] sm:$0xff] %v7625_v44  ;;  %v7648_v38 = vmul.f32 %v8977_v15, %v3781_v33  ;;  %v8979_v55 = vmov %v8977_v15  ;;  %v8981_v22 = vstv %s8966_s18  ;;  %v8985_v51 = vstv %s6315_s11  ;;  %s7781_s18 = sld [smem:[#allocation3 + $0x5c]] }
 0x575   : > { %8974 = vst [vmem:[#allocation49_spill] sm:$0xff] %v7629_v4  ;;  %v7652_v19 = vmul.f32 %v8979_v55, %v3782_v37  ;;  %v7656_v60 = vmul.f32 %v8981_v22, %v3821_v11  ;;  %v8983_v36 = vmov %v8981_v22  ;;  %v7671_v33 = vmul.f32 %v8985_v51, %v3861_v52 }
 0x576   : > { %8978 = vst [vmem:[#allocation124_spill] sm:$0xff] %v7648_v38  ;;  %v7660_v34 = vmul.f32 %v8983_v36, %v3822_v58  ;;  %v8987_v37 = vmov %v8985_v51  ;;  %v8989_v11 = vstv %s6325_s12  ;;  %v7688_v36 = vld [vmem:[%s8795_s13 + $0x41] ss:$8 sm:$0x3]  ;;  %v8993_v51 = vstv %s6581_s1  ;;  %s7829_s1 = sld [smem:[#allocation3 + $0x5f]] }
 0x577   : > { %8980 = vst [vmem:[#allocation125_spill] sm:$0xff] %v7652_v19  ;;  %8982 = vst [vmem:[#allocation52_spill] sm:$0xff] %v7656_v60  ;;  %v7675_v15 = vmul.f32 %v8987_v37, %v3862_v53  ;;  %v7679_v55 = vmul.f32 %v8989_v11, %v3901_v14  ;;  %v8991_v58 = vmov %v8989_v11  ;;  %v7696_v52 = vmul.f32 %v8993_v51, %v3941_v8  ;;  %v8997_v14 = vld [vmem:[#allocation119_spill] sm:$0xff]  ;;  %v9000_v8 = vld [vmem:[#allocation120_spill] sm:$0xff] }
 0x578   : > { %8984 = vst [vmem:[#allocation51_spill] sm:$0xff] %v7660_v34  ;;  %8986 = vst [vmem:[#allocation126_spill] sm:$0xff] %v7671_v33  ;;  %v7683_v22 = vmul.f32 %v8991_v58, %v3902_v9  ;;  %v7690_v34 = vpop.permute.xlu1 %3465  ;;  %v8995_v53 = vmov %v8993_v51  ;;  %v8998_v11 = vstv %s6639_s15  ;;  %v7714_v33 = vpop.permute.xlu0 %3463  ;;  %v7731_v58 = vld [vmem:[%s8795_s13 + $0x43] ss:$8 sm:$0x3]  ;;  %v3347_v63 = vsel %vm3340_vm13, %v7473_v35, %v7455_v46 }
 0x579   : > { %8988 = vst [vmem:[#allocation127_spill] sm:$0xff] %v7675_v15  ;;  %8990 = vst [vmem:[#allocation128_spill] sm:$0xff] %v7679_v55  ;;  %v7700_v37 = vmul.f32 %v8995_v53, %v3942_v56  ;;  %v7705_v9 = vmul.f32 %v8998_v11, %v8997_v14  ;;  %v7712_v15 = vld [vmem:[%s8795_s13 + $0x42] ss:$8 sm:$0x3]  ;;  %v9001_v56 = vmov %v8998_v11  ;;  %v3316_v53 = vstv %s7523_s25  ;;  %s7765_s25 = sld [smem:[#allocation3 + $0x5b]] }
 0x57a   : > { %8992 = vst [vmem:[#allocation129_spill] sm:$0xff] %v7683_v22  ;;  %8994 = vst [vmem:[#allocation53_spill] sm:$0xff] %v7696_v52  ;;  %v7721_v51 = vmul.f32 %v9001_v56, %v9000_v8  ;;  %v7763_v11 = vld [vmem:[%s8795_s13 + $0x46] ss:$8 sm:$0x3]  ;;  %v3307_v52 = vsel %vm3300_vm12, %v7412_v57, %v7392_v48  ;;  %v3308_v8 = vsel %vm3300_vm12, %v7392_v48, %v7412_v57  ;;  %vm9019_vm12 = vcmp.lt.s32.totalorder %v8740_v5, 99 }
 0x57b   : > { %8996 = vst [vmem:[#allocation54_spill] sm:$0xff] %v7700_v37  ;;  %8999 = vst [vmem:[#allocation130_spill] sm:$0xff] %v7705_v9  ;;  %v7736_v9 = vld [vmem:[%s8795_s13 + $0x44] ss:$8 sm:$0x3]  ;;  %v3317_v44 = vmul.f32 %v3316_v53, %v3307_v52  ;;  %v3348_v62 = vsel %vm3340_vm13, %v7455_v46, %v7473_v35 }
 0x57c   : > { %9002 = vst [vmem:[#allocation131_spill] sm:$0xff] %v7721_v51  ;;  %9003 = vst [vmem:[#allocation56_spill] sm:$0xff] %v7736_v9  ;;  %v7748_v51 = vld [vmem:[%s8795_s13 + $0x45] ss:$8 sm:$0x3]  ;;  %v7758_v14 = vpop.permute.xlu1 %3505  ;;  %v7774_v37 = vpop.permute.xlu0 %3503 }
 0x57d   : > { %9004 = vst [vmem:[#allocation55_spill] sm:$0xff] %v7748_v51  ;;  %9005 = vst [vmem:[#allocation58_spill] sm:$0xff] %v7763_v11  ;;  %v7779_v22 = vld [vmem:[%s8795_s13 + $0x47] ss:$8 sm:$0x3] }
 0x57e   : > { %9006 = vst [vmem:[#allocation57_spill] sm:$0xff] %v7779_v22  ;;  %v7793_v55 = vld [vmem:[%s8795_s13 + $0x50] ss:$8 sm:$0x3]  ;;  %v3318_v22 = vmul.f32 %v3316_v53, %v3308_v8  ;;  %v3319_v8 = vadd.f32 %v3317_v44, %v7396_v45  ;;  %v3387_v45 = vsel %vm3380_vm14, %v7545_v13, %v7525_v47  ;;  %vm9020_vm13 = vmmov %vm9019_vm12 }
 0x57f   : > { %9007 = vst [vmem:[#allocation59_spill] sm:$0xff] %v7793_v55  ;;  %v7811_v19 = vld [vmem:[%s8795_s13 + $0x51] ss:$8 sm:$0x3]  ;;  %v9014_v55 = vstv %s7543_s0 }
 0x580   : > { %9008 = vst [vmem:[#allocation60_spill] sm:$0xff] %v7811_v19  ;;  %v7815_v38 = vpop.permute.xlu1 %3545  ;;  %v7827_v60 = vld [vmem:[%s8795_s13 + $0x52] ss:$8 sm:$0x3]  ;;  %v7831_v56 = vpop.permute.xlu0 %3543  ;;  %v3357_v11 = vmul.f32 %v9014_v55, %v3347_v63  ;;  %v9015_v21 = vmov %v9014_v55 }
 0x581   : > { %9009 = vst [vmem:[#allocation61_spill] sm:$0xff] %v7827_v60  ;;  %v7842_v57 = vld [vmem:[%s8795_s13 + $0x53] ss:$8 sm:$0x3]  ;;  %v3358_v4 = vmul.f32 %v9015_v21, %v3348_v62 }
 0x582   : > { %9010 = vst [vmem:[#allocation62_spill] sm:$0xff] %v7842_v57  ;;  %v7855_v48 = vld [vmem:[%s8795_s13 + $0x54] ss:$8 sm:$0x3]  ;;  %v3320_v57 = vadd.f32 %v3318_v22, %v7400_v1  ;;  %v3388_v1 = vsel %vm3380_vm14, %v7525_v47, %v7545_v13  ;;  %v3359_v63 = vadd.f32 %v3357_v11, %v7426_v39  ;;  %v3427_v47 = vsel %vm3420_vm15, %v7619_v16, %v7599_v50 }
 0x583   : > { %9011 = vst [vmem:[#allocation63_spill] sm:$0xff] %v7855_v48  ;;  %v7867_v46 = vld [vmem:[%s8795_s13 + $0x55] ss:$8 sm:$0x3]  ;;  %v3360_v51 = vadd.f32 %v3358_v4, %v7430_v17  ;;  %v3428_v13 = vsel %vm3420_vm15, %v7599_v50, %v7619_v16  ;;  %v9017_v22 = vrot.slane %v7642_v32, %v5234_v24  ;;  %v9018_v39 = vrot.slane %v7642_v32, %v5238_v42 }
 0x584   : > { %9012 = vst [vmem:[#allocation64_spill] sm:$0xff] %v7867_v46  ;;  %v7871_v35 = vpop.permute.xlu1 %3585  ;;  %v7883_v19 = vld [vmem:[%s8795_s13 + $0x56] ss:$8 sm:$0x3]  ;;  %v7891_v20 = vpop.permute.xlu0 %3583  ;;  %v3467_v4 = vsel %vm9019_vm12, %v7714_v33, %v7690_v34  ;;  %v3468_v50 = vsel %vm9020_vm13, %v7690_v34, %v7714_v33  ;;  %v9021_v16 = vstv %s7563_s8  ;;  %v3956_v33 = vstv %s7869_s20  ;;  %s4416_s8 = sld [smem:[#allocation5 + $0x1]] }
 0x585   : > { %9013 = vst [vmem:[#allocation65_spill] sm:$0xff] %v7883_v19  ;;  %v7922_v21 = vld [vmem:[%s8795_s13 + $0x57] ss:$8 sm:$0x3]  ;;  %v3332_v62 = vmul.f32 %v9017_v22, %v3319_v8  ;;  %v3333_v17 = vmul.f32 %v9018_v39, %v3320_v57  ;;  %v3397_v11 = vmul.f32 %v9021_v16, %v3387_v45  ;;  %v9022_v9 = vmov %v9021_v16 }
 0x586   : > { %9016 = vst [vmem:[#allocation66_spill] sm:$0xff] %v7922_v21  ;;  %v3398_v8 = vmul.f32 %v9022_v9, %v3388_v1  ;;  %v7959_v22 = vld [vmem:[%s8795_s13 + $0x60] ss:$8 sm:$0x3]  ;;  %v9023_v39 = vstv %s7581_s24  ;;  %v3996_v45 = vstv %s7885_s29  ;;  %v9025_v9 = vrot.slane %v7665_v27, %v5234_v24  ;;  %s4022_s13 = sld [smem:[#allocation5]] }
 0x587   : > { %v3437_v55 = vmul.f32 %v9023_v39, %v3427_v47  ;;  %v9024_v60 = vmov %v9023_v39  ;;  %v9026_v16 = vrot.slane %v7665_v27, %v5238_v42  ;;  %v9027_v32 = vstv %s7601_s3  ;;  %s9113_s24 = sld [smem:[#allocation10_spill]] }
 0x588   : > { %v3626_v44 = vpop.permute.xlu1 %3625  ;;  %v3624_v53 = vpop.permute.xlu0 %3623  ;;  %v3438_v52 = vmul.f32 %v9024_v60, %v3428_v13  ;;  %v3372_v1 = vmul.f32 %v9025_v9, %v3359_v63  ;;  %v3477_v46 = vmul.f32 %v9027_v32, %v3467_v4  ;;  %v9028_v21 = vmov %v9027_v32 }
 0x589   : > { %v3373_v57 = vmul.f32 %v9026_v16, %v3360_v51  ;;  %v3478_v48 = vmul.f32 %v9028_v21, %v3468_v50  ;;  %v3334_v47 = vadd.f32 %v3332_v62, %v7326_v49  ;;  %v3335_v60 = vadd.f32 %v3333_v17, %v7329_v2 }
 0x58a   : > { %v4005_v13 = vrot.slane %v7959_v22, %v5234_v24  ;;  %v4009_v63 = vrot.slane %v7959_v22, %v5238_v42  ;;  %v3399_v27 = vadd.f32 %v3397_v11, %v7434_v18  ;;  %v3400_v51 = vadd.f32 %v3398_v8, %v7438_v10 }
 0x58b   : > { %v3507_v21 = vsel %vm3500_vm1, %v7774_v37, %v7758_v14  ;;  %v3508_v49 = vsel %vm3500_vm1, %v7758_v14, %v7774_v37  ;;  %v3439_v2 = vadd.f32 %v3437_v55, %v7443_v28  ;;  %v3440_v62 = vadd.f32 %v3438_v52, %v7447_v43 }
 0x58c   : > { %v3666_v34 = vpop.permute.xlu1 %3665  ;;  %v3664_v19 = vpop.permute.xlu0 %3663  ;;  %v3547_v18 = vsel %vm3540_vm2, %v7831_v56, %v7815_v38  ;;  %v3548_v10 = vsel %vm3540_vm2, %v7815_v38, %v7831_v56  ;;  %v8004_v4 = vadd.f32 %v3372_v1, %v7357_v0  ;;  %v8007_v37 = vadd.f32 %v3373_v57, %v7360_v29 }
 0x58d   : > { %v3479_v28 = vadd.f32 %v3477_v46, %v7459_v61  ;;  %v3480_v43 = vadd.f32 %v3478_v48, %v7463_v23  ;;  %v9029_v52 = vstv %s7621_s30  ;;  %v3587_v0 = vsel %vm3580_vm3, %v7891_v20, %v7871_v35  ;;  %s9115_s3 = sshll.u32 %s9113_s24, 6 }
 0x58e   : > { %v3517_v55 = vmul.f32 %v9029_v52, %v3507_v21  ;;  %v9030_v50 = vmov %v9029_v52  ;;  %v3588_v29 = vsel %vm3580_vm3, %v7871_v35, %v7891_v20  ;;  %v9031_v61 = vstv %s7644_s4 }
 0x58f   : > { %v3518_v11 = vmul.f32 %v9030_v50, %v3508_v49  ;;  %v3557_v38 = vmul.f32 %v9031_v61, %v3547_v18  ;;  %v9032_v56 = vmov %v9031_v61  ;;  %v3627_v48 = vsel %vm3620_vm4, %v3624_v53, %v3626_v44 }
 0x590   : > { %v3706_v17 = vpop.permute.xlu1 %3705  ;;  %v3704_v14 = vpop.permute.xlu0 %3703  ;;  %v3558_v23 = vmul.f32 %v9032_v56, %v3548_v10  ;;  %v3628_v46 = vsel %vm3620_vm4, %v3626_v44, %v3624_v53  ;;  %v9033_v8 = vrot.slane %v7688_v36, %v5234_v24  ;;  %v9034_v57 = vrot.slane %v7688_v36, %v5238_v42 }
 0x591   : > { %v9035_v35 = vrot.slane %v7712_v15, %v5234_v24  ;;  %v9036_v9 = vrot.slane %v7712_v15, %v5238_v42  ;;  %v9037_v21 = vstv %s7667_s10  ;;  %v3668_v36 = vsel %vm3660_vm5, %v3666_v34, %v3664_v19  ;;  %s9116_s10 = sld [smem:[#allocation140_spill]] }
 0x592   : > { %v3412_v32 = vmul.f32 %v9033_v8, %v3399_v27  ;;  %v3413_v20 = vmul.f32 %v9034_v57, %v3400_v51  ;;  %v3597_v53 = vmul.f32 %v9037_v21, %v3587_v0  ;;  %v9038_v44 = vmov %v9037_v21 }
 0x593   : > { %v3452_v39 = vmul.f32 %v9035_v35, %v3439_v2  ;;  %v3453_v1 = vmul.f32 %v9036_v9, %v3440_v62  ;;  %v3598_v49 = vmul.f32 %v9038_v44, %v3588_v29  ;;  %v3667_v27 = vsel %vm3660_vm5, %v3664_v19, %v3666_v34 }
 0x594   : > { %v3746_v16 = vpop.permute.xlu1 %3745  ;;  %v3744_v51 = vpop.permute.xlu0 %3743  ;;  %v9039_v2 = vrot.slane %v7731_v58, %v5234_v24  ;;  %v9040_v15 = vrot.slane %v7731_v58, %v5238_v42  ;;  %v9041_v10 = vstv %s7692_s21  ;;  %v3519_v29 = vadd.f32 %v3517_v55, %v7509_v54 }
 0x595   : > { %v3637_v52 = vmul.f32 %v9041_v10, %v3627_v48  ;;  %v9042_v50 = vmov %v9041_v10  ;;  %v3520_v61 = vadd.f32 %v3518_v11, %v7513_v31  ;;  %v3559_v56 = vadd.f32 %v3557_v38, %v7529_v41  ;;  %v9045_v11 = vld [vmem:[#allocation56_spill] sm:$0xff] }
 0x596   : > { %v3492_v18 = vmul.f32 %v9039_v2, %v3479_v28  ;;  %v3493_v62 = vmul.f32 %v9040_v15, %v3480_v43  ;;  %v3638_v0 = vmul.f32 %v9042_v50, %v3628_v46  ;;  %v3560_v19 = vadd.f32 %v3558_v23, %v7533_v40 }
 0x597   : > { %v3414_v34 = vadd.f32 %v3412_v32, %v7387_v7  ;;  %v3415_v28 = vadd.f32 %v3413_v20, %v7390_v25  ;;  %v9043_v8 = vstv %s7716_s23  ;;  %v3454_v48 = vadd.f32 %v3452_v39, %v7450_v30  ;;  %v9052_v39 = vld [vmem:[#allocation48_spill] sm:$0xff]  ;;  %s8259_s21 = scalar_lea.vmem %s9116_s10, %s9115_s3 }
 0x598   : > { %v3677_v57 = vmul.f32 %v9043_v8, %v3667_v27  ;;  %v9044_v58 = vmov %v9043_v8  ;;  %v3786_v35 = vpop.permute.xlu1 %3785  ;;  %v3455_v46 = vadd.f32 %v3453_v1, %v7453_v26  ;;  %v3599_v54 = vadd.f32 %v3597_v53, %v7537_v6  ;;  %v3784_v41 = vpop.permute.xlu0 %3783  ;;  %v9048_v26 = vld [vmem:[#allocation55_spill] sm:$0xff]  ;;  %v9053_v53 = vld [vmem:[#allocation58_spill] sm:$0xff] }
 0x599   : > { %v3678_v43 = vmul.f32 %v9044_v58, %v3668_v36  ;;  %v3600_v31 = vadd.f32 %v3598_v49, %v7541_v59  ;;  %v3494_v55 = vadd.f32 %v3492_v18, %v3334_v47  ;;  %v3495_v40 = vadd.f32 %v3493_v62, %v3335_v60  ;;  %v9051_v60 = vld [vmem:[#allocation47_spill] sm:$0xff]  ;;  %v9056_v62 = vld [vmem:[#allocation57_spill] sm:$0xff] }
 0x59a   : > { %v3639_v7 = vadd.f32 %v3637_v52, %v7549_v12  ;;  %v3640_v25 = vadd.f32 %v3638_v0, %v7553_v3  ;;  %v9046_v38 = vrot.slane %v9045_v11, %v5234_v24  ;;  %v9047_v30 = vrot.slane %v9045_v11, %v5238_v42  ;;  %v9061_v8 = vld [vmem:[#allocation59_spill] sm:$0xff] }
 0x59b   : > { %v9049_v6 = vrot.slane %v9048_v26, %v5234_v24  ;;  %v9050_v59 = vrot.slane %v9048_v26, %v5238_v42  ;;  %v3679_v12 = vadd.f32 %v3677_v57, %v9051_v60  ;;  %v3680_v3 = vadd.f32 %v3678_v43, %v9052_v39 }
 0x59c   : > { %v3532_v23 = vmul.f32 %v9046_v38, %v3519_v29  ;;  %v3533_v32 = vmul.f32 %v9047_v30, %v3520_v61  ;;  %v3747_v9 = vsel %vm3740_vm7, %v3744_v51, %v3746_v16  ;;  %v3748_v1 = vsel %vm3740_vm7, %v3746_v16, %v3744_v51  ;;  %v3826_v21 = vpop.permute.xlu1 %3825  ;;  %v3824_v15 = vpop.permute.xlu0 %3823 }
 0x59d   : > { %v3572_v20 = vmul.f32 %v9049_v6, %v3559_v56  ;;  %v3573_v47 = vmul.f32 %v9050_v59, %v3560_v19  ;;  %v9054_v44 = vrot.slane %v9053_v53, %v5234_v24  ;;  %v9055_v27 = vrot.slane %v9053_v53, %v5238_v42  ;;  %v9072_v53 = vld [vmem:[#allocation124_spill] sm:$0xff] }
 0x59e   : > { %v3707_v2 = vsel %vm3700_vm6, %v3704_v14, %v3706_v17  ;;  %v3708_v18 = vsel %vm3700_vm6, %v3706_v17, %v3704_v14  ;;  %v9057_v16 = vrot.slane %v9056_v62, %v5234_v24  ;;  %v9058_v10 = vrot.slane %v9056_v62, %v5238_v42 }
 0x59f   : > { %v3612_v49 = vmul.f32 %v9054_v44, %v3599_v54  ;;  %v3613_v36 = vmul.f32 %v9055_v27, %v3600_v31  ;;  %v3787_v50 = vsel %vm3780_vm8, %v3784_v41, %v3786_v35  ;;  %v3788_v0 = vsel %vm3780_vm8, %v3786_v35, %v3784_v41 }
 0x5a0   : > { %v3652_v51 = vmul.f32 %v9057_v16, %v3639_v7  ;;  %v3653_v52 = vmul.f32 %v9058_v10, %v3640_v25  ;;  %v3534_v29 = vadd.f32 %v3532_v23, %v8004_v4  ;;  %v3535_v17 = vadd.f32 %v3533_v32, %v8007_v37  ;;  %v3866_v41 = vpop.permute.xlu1 %3865  ;;  %v3864_v32 = vpop.permute.xlu0 %3863 }
 0x5a1   : > { %v9059_v14 = vstv %s7765_s25  ;;  %v9062_v57 = vrot.slane %v9061_v8, %v5234_v24  ;;  %v9063_v43 = vrot.slane %v9061_v8, %v5238_v42  ;;  %v9064_v31 = vstv %s7750_s22  ;;  %v9081_v8 = vld [vmem:[#allocation60_spill] sm:$0xff] }
 0x5a2   : > { %v3757_v61 = vmul.f32 %v9059_v14, %v3747_v9  ;;  %v9060_v56 = vmov %v9059_v14  ;;  %v3717_v7 = vmul.f32 %v9064_v31, %v3707_v2  ;;  %v9065_v25 = vmov %v9064_v31 }
 0x5a3   : > { %v3758_v19 = vmul.f32 %v9060_v56, %v3748_v1  ;;  %v3692_v58 = vmul.f32 %v9062_v57, %v3679_v12  ;;  %v3693_v54 = vmul.f32 %v9063_v43, %v3680_v3  ;;  %v3718_v35 = vmul.f32 %v9065_v25, %v3708_v18  ;;  %v9068_v12 = vld [vmem:[#allocation50_spill] sm:$0xff]  ;;  %v9069_v3 = vld [vmem:[#allocation49_spill] sm:$0xff] }
 0x5a4   : > { %v8131_v4 = vadd.f32 %v3572_v20, %v3414_v34  ;;  %v8133_v37 = vadd.f32 %v3573_v47, %v3415_v28  ;;  %v9066_v11 = vstv %s7781_s18  ;;  %v3614_v26 = vadd.f32 %v3612_v49, %v3454_v48  ;;  %v9070_v48 = vld [vmem:[#allocation122_spill] sm:$0xff]  ;;  %v3906_v1 = vpop.permute.xlu1 %3905  ;;  %v9073_v49 = vld [vmem:[#allocation125_spill] sm:$0xff]  ;;  %v3904_v2 = vpop.permute.xlu0 %3903 }
 0x5a5   : > { %v3797_v38 = vmul.f32 %v9066_v11, %v3787_v50  ;;  %v9067_v23 = vmov %v9066_v11  ;;  %v3615_v6 = vadd.f32 %v3613_v36, %v3455_v46  ;;  %v3654_v59 = vadd.f32 %v3652_v51, %v3494_v55  ;;  %v9071_v55 = vld [vmem:[#allocation123_spill] sm:$0xff]  ;;  %v9086_v11 = vld [vmem:[#allocation62_spill] sm:$0xff] }
 0x5a6   : > { %v3798_v30 = vmul.f32 %v9067_v23, %v3788_v0  ;;  %v3655_v60 = vadd.f32 %v3653_v52, %v3495_v40  ;;  %v3759_v39 = vadd.f32 %v3757_v61, %v9068_v12  ;;  %v3760_v9 = vadd.f32 %v3758_v19, %v9069_v3  ;;  %v9076_v52 = vld [vmem:[#allocation61_spill] sm:$0xff]  ;;  %v9089_v12 = vld [vmem:[#allocation128_spill] sm:$0xff]  ;;  %v9090_v3 = vld [vmem:[#allocation129_spill] sm:$0xff] }
 0x5a7   : > { %v3827_v34 = vsel %vm3820_vm9, %v3824_v15, %v3826_v21  ;;  %v3828_v28 = vsel %vm3820_vm9, %v3826_v21, %v3824_v15  ;;  %v8145_v20 = vadd.f32 %v3692_v58, %v3534_v29  ;;  %v8147_v47 = vadd.f32 %v3693_v54, %v3535_v17 }
 0x5a8   : > { %v3719_v46 = vadd.f32 %v3717_v7, %v9070_v48  ;;  %v3720_v40 = vadd.f32 %v3718_v35, %v9071_v55  ;;  %v3799_v44 = vadd.f32 %v3797_v38, %v9072_v53  ;;  %v3800_v27 = vadd.f32 %v3798_v30, %v9073_v49 }
 0x5a9   : > { %v3867_v21 = vsel %vm3860_vm10, %v3864_v32, %v3866_v41  ;;  %v3868_v36 = vsel %vm3860_vm10, %v3866_v41, %v3864_v32  ;;  %v9074_v18 = vstv %s7795_s2  ;;  %v3907_v51 = vsel %vm3900_vm11, %v3904_v2, %v3906_v1  ;;  %v3946_v41 = vpop.permute.xlu1 %3945 }
 0x5aa   : > { %v3837_v15 = vmul.f32 %v9074_v18, %v3827_v34  ;;  %v9075_v62 = vmov %v9074_v18  ;;  %v3908_v10 = vsel %vm3900_vm11, %v3906_v1, %v3904_v2  ;;  %v9077_v50 = vrot.slane %v9076_v52, %v5234_v24  ;;  %v3944_v34 = vpop.permute.xlu0 %3943  ;;  %v9094_v2 = vld [vmem:[#allocation127_spill] sm:$0xff] }
 0x5ab   : > { %v3838_v16 = vmul.f32 %v9075_v62, %v3828_v28  ;;  %v9078_v29 = vrot.slane %v9076_v52, %v5238_v42  ;;  %v9079_v14 = vstv %s7829_s1  ;;  %v9082_v57 = vrot.slane %v9081_v8, %v5234_v24  ;;  %v9091_v28 = vld [vmem:[#allocation52_spill] sm:$0xff] }
 0x5ac   : > { %v3772_v0 = vmul.f32 %v9077_v50, %v3759_v39  ;;  %v3917_v61 = vmul.f32 %v9079_v14, %v3907_v51  ;;  %v9080_v56 = vmov %v9079_v14  ;;  %v9083_v43 = vrot.slane %v9081_v8, %v5238_v42  ;;  %v9098_v50 = vld [vmem:[#allocation53_spill] sm:$0xff]  ;;  %v9100_v14 = vld [vmem:[#allocation63_spill] sm:$0xff] }
 0x5ad   : > { %v3773_v17 = vmul.f32 %v9078_v29, %v3760_v9  ;;  %v3918_v19 = vmul.f32 %v9080_v56, %v3908_v10  ;;  %v3732_v58 = vmul.f32 %v9082_v57, %v3719_v46  ;;  %v9084_v31 = vstv %s7813_s9  ;;  %v9092_v46 = vld [vmem:[#allocation51_spill] sm:$0xff] }
 0x5ae   : > { %v3733_v54 = vmul.f32 %v9083_v43, %v3720_v40  ;;  %v3877_v7 = vmul.f32 %v9084_v31, %v3867_v21  ;;  %v9085_v25 = vmov %v9084_v31  ;;  %v9087_v38 = vrot.slane %v9086_v11, %v5234_v24  ;;  %v9093_v21 = vld [vmem:[#allocation126_spill] sm:$0xff] }
 0x5af   : > { %v3878_v35 = vmul.f32 %v9085_v25, %v3868_v36  ;;  %v9088_v30 = vrot.slane %v9086_v11, %v5238_v42  ;;  %v3919_v39 = vadd.f32 %v3917_v61, %v9089_v12  ;;  %v3920_v9 = vadd.f32 %v3918_v19, %v9090_v3  ;;  %v9108_v11 = vld [vmem:[#allocation64_spill] sm:$0xff] }
 0x5b0   : > { %v3812_v23 = vmul.f32 %v9087_v38, %v3799_v44  ;;  %v3839_v48 = vadd.f32 %v3837_v15, %v9091_v28  ;;  %v3840_v55 = vadd.f32 %v3838_v16, %v9092_v46  ;;  %v3947_v40 = vsel %vm3940_vm0, %v3944_v34, %v3946_v41  ;;  %v9095_v15 = vld [vmem:[#allocation65_spill] sm:$0xff] }
 0x5b1   : > { %v3813_v32 = vmul.f32 %v9088_v30, %v3800_v27  ;;  %v3948_v1 = vsel %vm3940_vm0, %v3946_v41, %v3944_v34  ;;  %v3774_v53 = vadd.f32 %v3772_v0, %v3614_v26  ;;  %v3775_v44 = vadd.f32 %v3773_v17, %v3615_v6  ;;  %v3986_v26 = vpop.permute.xlu1 %3985  ;;  %v3984_v17 = vpop.permute.xlu0 %3983  ;;  %v9112_v28 = vld [vmem:[#allocation131_spill] sm:$0xff] }
 0x5b2   : > { %v3957_v49 = vmul.f32 %v3956_v33, %v3947_v40  ;;  %v3958_v27 = vmul.f32 %v3956_v33, %v3948_v1  ;;  %v3879_v36 = vadd.f32 %v3877_v7, %v9093_v21  ;;  %v3880_v18 = vadd.f32 %v3878_v35, %v9094_v2  ;;  %v9099_v33 = vld [vmem:[#allocation54_spill] sm:$0xff] }
 0x5b3   : > { %v9096_v62 = vrot.slane %v9095_v15, %v5234_v24  ;;  %v9097_v51 = vrot.slane %v9095_v15, %v5238_v42  ;;  %v3814_v6 = vadd.f32 %v3812_v23, %v3654_v59  ;;  %v3815_v52 = vadd.f32 %v3813_v32, %v3655_v60  ;;  %v9105_v60 = vld [vmem:[#allocation66_spill] sm:$0xff] }
 0x5b4   : > { %v3959_v0 = vadd.f32 %v3957_v49, %v9098_v50  ;;  %v3960_v29 = vadd.f32 %v3958_v27, %v9099_v33  ;;  %v9101_v61 = vrot.slane %v9100_v14, %v5234_v24  ;;  %v9102_v19 = vrot.slane %v9100_v14, %v5238_v42  ;;  %v9114_v33 = vld [vmem:[#allocation22_spill] sm:$0xff] }
 0x5b5   : > { %v3932_v16 = vmul.f32 %v9096_v62, %v3919_v39  ;;  %v3933_v10 = vmul.f32 %v9097_v51, %v3920_v9  ;;  %vm9103_vm14 = vcmp.lt.s32.totalorder %v8740_v5, 77  ;;  %v9106_v43 = vrot.slane %v9105_v60, %v5234_v24  ;;  %v9111_v9 = vld [vmem:[#allocation130_spill] sm:$0xff] }
 0x5b6   : > { %v3852_v56 = vmul.f32 %v9101_v61, %v3839_v48  ;;  %v3853_v8 = vmul.f32 %v9102_v19, %v3840_v55  ;;  %v3987_v57 = vsel %vm9103_vm14, %v3984_v17, %v3986_v26  ;;  %vm9104_vm15 = vmmov %vm9103_vm14  ;;  %v9107_v7 = vrot.slane %v9105_v60, %v5238_v42 }
 0x5b7   : > { %v3988_v59 = vsel %vm9104_vm15, %v3986_v26, %v3984_v17  ;;  %v3972_v31 = vmul.f32 %v9106_v43, %v3959_v0  ;;  %v3997_v35 = vmul.f32 %v3996_v45, %v3987_v57  ;;  %v9109_v38 = vrot.slane %v9108_v11, %v5234_v24 }
 0x5b8   : > { %v3973_v25 = vmul.f32 %v9107_v7, %v3960_v29  ;;  %v3998_v41 = vmul.f32 %v3996_v45, %v3988_v59  ;;  %v9110_v5 = vrot.slane %v9108_v11, %v5238_v42  ;;  %v3934_v32 = vadd.f32 %v3932_v16, %v3774_v53 }
 0x5b9   : > { %v3892_v23 = vmul.f32 %v9109_v38, %v3879_v36  ;;  %v3935_v12 = vadd.f32 %v3933_v10, %v3775_v44  ;;  %v3974_v39 = vadd.f32 %v3972_v31, %v3814_v6  ;;  %v3999_v34 = vadd.f32 %v3997_v35, %v9111_v9  ;;  %v9118_v38 = vld [vmem:[#allocation26_spill] sm:$0xff]  ;;  %v9121_v9 = vld [vmem:[#allocation27_spill] sm:$0xff] }
 0x5ba   : > { %v3893_v30 = vmul.f32 %v9110_v5, %v3880_v18  ;;  %v3975_v3 = vadd.f32 %v3973_v25, %v3815_v52  ;;  %v4000_v48 = vadd.f32 %v3998_v41, %v9112_v28  ;;  %v3734_v46 = vadd.f32 %v3732_v58, %v8131_v4  ;;  %v9117_v41 = vld [vmem:[#allocation25_spill] sm:$0xff]  ;;  %v9119_v5 = vld [vmem:[#allocation23_spill] sm:$0xff]  ;;  %v9122_v28 = vld [vmem:[#allocation28_spill] sm:$0xff] }
 0x5bb   : > { %v3735_v45 = vadd.f32 %v3733_v54, %v8133_v37  ;;  %v3854_v55 = vadd.f32 %v3852_v56, %v8145_v20  ;;  %v3855_v40 = vadd.f32 %v3853_v8, %v8147_v47  ;;  %v4018_v1 = vadd.f32 %v3974_v39, %v3934_v32  ;;  %v9120_v39 = vld [vmem:[#allocation24_spill] sm:$0xff] }
 0x5bc   : > { %v4019_v49 = vadd.f32 %v3975_v3, %v3935_v12  ;;  %v4012_v53 = vmul.f32 %v4005_v13, %v3999_v34  ;;  %v4013_v44 = vmul.f32 %v4009_v63, %v4000_v48  ;;  %v3894_v27 = vadd.f32 %v3892_v23, %v3734_v46  ;;  %v9123_v46 = vld [vmem:[#allocation29_spill] sm:$0xff] }
 0x5bd   : > { %v3895_v21 = vadd.f32 %v3893_v30, %v3735_v45  ;;  %v4023_v20 = vstv %s4022_s13  ;;  %v4027_v2 = vstv %s4416_s8  ;;  %v4759_v6 = vmov 1966171168  }
 0x5be   : > { %v4014_v4 = vadd.f32 %v4012_v53, %v3854_v55  ;;  %v4015_v58 = vadd.f32 %v4013_v44, %v3855_v40  ;;  %v4046_v52 = vunpack.c.l.s4 %v4759_v6  ;;  %v9124_v55 = vld [vmem:[#allocation30_spill] sm:$0xff]  ;;  %v9127_v53 = vld [vmem:[#allocation35_spill] sm:$0xff] }
 0x5bf   : > { %v9138_v6 = vld [vmem:[#allocation18_spill] sm:$0xff] }
 0x5c0   : > { %v4016_v37 = vadd.f32 %v4014_v4, %v3894_v27  ;;  %v4017_v54 = vadd.f32 %v4015_v58, %v3895_v21  ;;  %v4047_v50 = vunpack.c.0.s8 %v4046_v52  ;;  %v9128_v27 = vld [vmem:[#allocation36_spill] sm:$0xff]  ;;  %v9129_v4 = vld [vmem:[#allocation33_spill] sm:$0xff] }
 0x5c2   : > { %v4020_v36 = vadd.f32 %v4018_v1, %v4016_v37  ;;  %v4021_v47 = vadd.f32 %v4019_v49, %v4017_v54  ;;  %v4050_v29 = vsub.s32 %v4047_v50, %v9114_v33  ;;  %v9125_v1 = vld [vmem:[#allocation31_spill] sm:$0xff]  ;;  %v9130_v37 = vld [vmem:[#allocation34_spill] sm:$0xff]  ;;  %v9140_v33 = vld [vmem:[#allocation20_spill] sm:$0xff] }
 0x5c3   : > { %v9139_v50 = vld [vmem:[#allocation19_spill] sm:$0xff] }
 0x5c4   : > { %v4024_v18 = vmul.f32 %v4023_v20, %v4020_v36  ;;  %v4025_v15 = vmul.f32 %v4023_v20, %v4021_v47  ;;  %v9131_v20 = vld [vmem:[#allocation15_spill] sm:$0xff]  ;;  %v9132_v47 = vld [vmem:[#allocation16_spill] sm:$0xff] }
 0x5c6   : > { %v4028_v62 = vadd.f32 %v4027_v2, %v4024_v18  ;;  %v4029_v16 = vadd.f32 %v4027_v2, %v4025_v15  ;;  %v9133_v18 = vld [vmem:[#allocation13_spill] sm:$0xff] }
 0x5c8   : > { %v4417_v51 = vmul.f32 -1.442695, %v4028_v62  ;;  %v4418_v13 = vmul.f32 -1.442695, %v4029_v16  ;;  %v9134_v62 = vld [vmem:[#allocation14_spill] sm:$0xff] }
 0x5ca   : > { %4645 = vpow2.f32 %v4417_v51  ;;  %v9135_v51 = vld [vmem:[#allocation11_spill] sm:$0xff] }
 0x5cb   : > { %4647 = vpow2.f32 %v4418_v13 }
 0x5d7   : > { %v4646_v22 = vpop.eup %4645 }
 0x5d8   : > { %v4648_v63 = vpop.eup %4647  ;;  %v4036_v10 = vadd.f32 1.0, %v4646_v22  ;;  %v9136_v22 = vld [vmem:[#allocation12_spill] sm:$0xff] }
 0x5d9   : > { %v4037_v26 = vadd.f32 1.0, %v4648_v63 }
 0x5da   : > { %4649 = vrcp.f32 %v4036_v10  ;;  %v9137_v10 = vld [vmem:[#allocation17_spill] sm:$0xff] }
 0x5db   : > { %4651 = vrcp.f32 %v4037_v26 }
 0x5e7   : > { %v4650_v0 = vpop.eup %4649 }
 0x5e8   : > { %v4652_v17 = vpop.eup %4651 }
 0x5e9   : > { %v4044_v14 = vcombine.low %v4650_v0, %v4652_v17  ;;  %v9141_v17 = vld [vmem:[#allocation37_spill] sm:$0xff] }
 0x5eb   : > { %v4051_v61 = vrot.slane %v4044_v14, %v4050_v29 }
 0x5ed   : > { %v4052_v56 = vcombine.high %v4051_v61, %v4051_v61  ;;  %v4059_v19 = vrot.slane %v4051_v61, %v4050_v29  ;;  %v9142_v61 = vld [vmem:[#allocation38_spill] sm:$0xff] }
 0x5ef   : > { %v4066_v8 = vrot.slane %v4052_v56, %v4050_v29  ;;  %v4067_v57 = vcombine.high %v4059_v19, %v4059_v19  ;;  %v4072_v59 = vrot.slane %v4059_v19, %v5234_v24  ;;  %v4076_v60 = vrot.slane %v4059_v19, %v5238_v42  ;;  %v9143_v19 = vld [vmem:[#allocation39_spill] sm:$0xff] }
 0x5f1   : > { %v4068_v43 = vcombine.high %v4066_v8, %v4066_v8  ;;  %v4080_v31 = vrot.slane %v4066_v8, %v5234_v24  ;;  %v4084_v7 = vrot.slane %v4066_v8, %v5238_v42  ;;  %v4088_v25 = vrot.slane %v4067_v57, %v5234_v24 }
 0x5f2   : > { %v4092_v35 = vrot.slane %v4067_v57, %v5238_v42  ;;  %v4109_v11 = vmul.f32 %v4072_v59, %v9117_v41  ;;  %v4110_v23 = vmul.f32 %v4076_v60, %v9118_v38  ;;  %v4111_v30 = vmul.f32 %v4072_v59, %v9119_v5  ;;  %v9144_v57 = vld [vmem:[#allocation40_spill] sm:$0xff] }
 0x5f3   : > { %v4096_v32 = vrot.slane %v4068_v43, %v5234_v24  ;;  %v4100_v12 = vrot.slane %v4068_v43, %v5238_v42  ;;  %v4112_v3 = vmul.f32 %v4076_v60, %v9120_v39  ;;  %v4113_v34 = vmul.f32 %v4072_v59, %v9121_v9  ;;  %v9126_v24 = vld [vmem:[#allocation32_spill] sm:$0xff] }
 0x5f4   : > { %v4114_v48 = vmul.f32 %v4076_v60, %v9122_v28  ;;  %v4115_v45 = vmul.f32 %v4072_v59, %v9123_v46  ;;  %v4116_v40 = vmul.f32 %v4076_v60, %v9124_v55  ;;  %v4117_v49 = vmul.f32 %v4080_v31, %v9125_v1  ;;  %4141 = vst [vmem:[%s8259_s21] sm:$0xff] %v4109_v11  ;;  %v9145_v60 = vld [vmem:[#allocation41_spill] sm:$0xff]  ;;  %v9148_v41 = vld [vmem:[#allocation44_spill] sm:$0xff] }
 0x5f5   : > { %4142 = vst [vmem:[%s8259_s21 + $0x8] sm:$0xff] %v4110_v23  ;;  %4143 = vst [vmem:[%s8259_s21 + $0x10] sm:$0xff] %v4111_v30  ;;  %v4118_v42 = vmul.f32 %v4084_v7, %v9126_v24  ;;  %v4119_v44 = vmul.f32 %v4080_v31, %v9127_v53  ;;  %v4120_v21 = vmul.f32 %v4084_v7, %v9128_v27 }
 0x5f6   : > { %v4121_v58 = vmul.f32 %v4080_v31, %v9129_v4  ;;  %4144 = vst [vmem:[%s8259_s21 + $0x18] sm:$0xff] %v4112_v3  ;;  %4145 = vst [vmem:[%s8259_s21 + $0x20] sm:$0xff] %v4113_v34  ;;  %v4122_v54 = vmul.f32 %v4084_v7, %v9130_v37  ;;  %v4123_v36 = vmul.f32 %v4080_v31, %v9131_v20  ;;  %v9146_v31 = vld [vmem:[#allocation42_spill] sm:$0xff] }
 0x5f7   : > { %v4124_v2 = vmul.f32 %v4084_v7, %v9132_v47  ;;  %v4125_v15 = vmul.f32 %v4088_v25, %v9133_v18  ;;  %4146 = vst [vmem:[%s8259_s21 + $0x28] sm:$0xff] %v4114_v48  ;;  %4147 = vst [vmem:[%s8259_s21 + $0x30] sm:$0xff] %v4115_v45  ;;  %v4126_v16 = vmul.f32 %v4092_v35, %v9134_v62 }
 0x5f8   : > { %4148 = vst [vmem:[%s8259_s21 + $0x38] sm:$0xff] %v4116_v40  ;;  %4149 = vst [vmem:[%s8259_s21 + $0x40] sm:$0xff] %v4117_v49  ;;  %v4127_v13 = vmul.f32 %v4088_v25, %v9135_v51  ;;  %v4128_v63 = vmul.f32 %v4092_v35, %v9136_v22  ;;  %v4129_v26 = vmul.f32 %v4088_v25, %v9137_v10 }
 0x5f9   : > { %4150 = vst [vmem:[%s8259_s21 + $0x48] sm:$0xff] %v4118_v42  ;;  %4151 = vst [vmem:[%s8259_s21 + $0x50] sm:$0xff] %v4119_v44  ;;  %v4130_v52 = vmul.f32 %v4092_v35, %v9138_v6  ;;  %v4131_v0 = vmul.f32 %v4088_v25, %v9139_v50  ;;  %v4132_v29 = vmul.f32 %v4092_v35, %v9140_v33  ;;  %v9147_v25 = vld [vmem:[#allocation43_spill] sm:$0xff] }
 0x5fa   : > { %4152 = vst [vmem:[%s8259_s21 + $0x58] sm:$0xff] %v4120_v21  ;;  %4153 = vst [vmem:[%s8259_s21 + $0x60] sm:$0xff] %v4121_v58  ;;  %v4133_v14 = vmul.f32 %v4096_v32, %v9141_v17  ;;  %v4134_v56 = vmul.f32 %v4100_v12, %v9142_v61  ;;  %v4135_v8 = vmul.f32 %v4096_v32, %v9143_v19 }
 0x5fb   : > { %4154 = vst [vmem:[%s8259_s21 + $0x68] sm:$0xff] %v4122_v54  ;;  %4155 = vst [vmem:[%s8259_s21 + $0x70] sm:$0xff] %v4123_v36  ;;  %v4136_v59 = vmul.f32 %v4100_v12, %v9144_v57  ;;  %v4137_v43 = vmul.f32 %v4096_v32, %v9145_v60  ;;  %v4138_v7 = vmul.f32 %v4100_v12, %v9146_v31 }
 0x5fc   : > { %4156 = vst [vmem:[%s8259_s21 + $0x78] sm:$0xff] %v4124_v2  ;;  %4157 = vst [vmem:[%s8259_s21 + $0x80] sm:$0xff] %v4125_v15  ;;  %v4139_v35 = vmul.f32 %v4096_v32, %v9147_v25  ;;  %v4140_v11 = vmul.f32 %v4100_v12, %v9148_v41 }
 0x5fd   : > { %4158 = vst [vmem:[%s8259_s21 + $0x88] sm:$0xff] %v4126_v16  ;;  %4159 = vst [vmem:[%s8259_s21 + $0x90] sm:$0xff] %v4127_v13 }
 0x5fe   : > { %4160 = vst [vmem:[%s8259_s21 + $0x98] sm:$0xff] %v4128_v63  ;;  %4161 = vst [vmem:[%s8259_s21 + $0xa0] sm:$0xff] %v4129_v26 }
 0x5ff   : > { %4162 = vst [vmem:[%s8259_s21 + $0xa8] sm:$0xff] %v4130_v52  ;;  %4163 = vst [vmem:[%s8259_s21 + $0xb0] sm:$0xff] %v4131_v0 }
 0x600   : > { %4164 = vst [vmem:[%s8259_s21 + $0xb8] sm:$0xff] %v4132_v29  ;;  %4165 = vst [vmem:[%s8259_s21 + $0xc0] sm:$0xff] %v4133_v14 }
 0x601   : > { %4166 = vst [vmem:[%s8259_s21 + $0xc8] sm:$0xff] %v4134_v56  ;;  %4167 = vst [vmem:[%s8259_s21 + $0xd0] sm:$0xff] %v4135_v8 }
 0x602   : > { %4168 = vst [vmem:[%s8259_s21 + $0xd8] sm:$0xff] %v4136_v59  ;;  %4169 = vst [vmem:[%s8259_s21 + $0xe0] sm:$0xff] %v4137_v43 }
 0x603   : > { %4170 = vst [vmem:[%s8259_s21 + $0xe8] sm:$0xff] %v4138_v7  ;;  %4171 = vst [vmem:[%s8259_s21 + $0xf0] sm:$0xff] %v4139_v35 }
 0x604   : > { %4172 = vst [vmem:[%s8259_s21 + $0xf8] sm:$0xff] %v4140_v11 }
 0x605 PF: > { %s9149_s23 = sld [smem:[#allocation9_spill]] }
 0x60b   : > { %s20_s27 = sadd.s32 1, %s9149_s23  }
 0x60c   : > { %p17_p3 = scmp.ge.s32.totalorder %s20_s27, 4  }
 0x60e   :  { %19 = sbr.rel (!%p17_p3) target bundleno = 12 (0xc), region = 139 }
 0x613   :  { %4197 = vsyncpa [#allocation4], 1 }
 0x614   :  { %4199 = vsyncpa [#allocation4 + $0x1], 1 }
 0x615   :  { %4200 = vsyncpa [#allocation6], 1 }

</bundles_post_ra>
